<compile_context>
chip_gen: v7x
topology: tpu7x:2x2x1
jax: 0.10.0
libtpu: 0.0.40
codegen_flags: <defaults>
</compile_context>

<pallas_src>
import jax
import jax.numpy as jnp
from jax.experimental import pallas as pl
from jax.experimental.pallas import tpu as pltpu

B_J0 = 0.1          # LIF firing threshold (fptt convention)
R_M = 1.0           # membrane resistance


# ------------------------- device-dependent tuning -------------------------

_DEV_CACHE = None


def _device_defaults():
    """(row_tile_target, vmem_limit_bytes) per TPU generation."""
    global _DEV_CACHE
    if _DEV_CACHE is None:
        try:
            kind = jax.devices()[0].device_kind.lower()
        except Exception:
            kind = ""
        if "v7" in kind:                       # 64 MiB physical VMEM: stay conservative
            _DEV_CACHE = (512, 32 * 1024 * 1024)
        elif ("v4" in kind) or ("v5" in kind) or ("v6" in kind):
            _DEV_CACHE = (1024, 96 * 1024 * 1024)   # 128 MiB physical VMEM
        else:
            _DEV_CACHE = (512, 32 * 1024 * 1024)
    return _DEV_CACHE


def _round_up(x, m):
    return -(-x // m) * m


def _choose_tm(m, target):
    """Row tile: bounded by `target`, multiple of 8, >=2 grid steps when possible."""
    if m <= 8:
        return m
    return min(target, _round_up(pl.cdiv(m, 2), 8))


def _full_spec(shape):
    nd = len(shape)
    return pl.BlockSpec(shape, lambda i, _nd=nd: (0,) * _nd)


# ------------------------- shared LIF update -------------------------

def _lif_update(y, alpha, mem, spk_f32):
    """fptt LIF: soft reset via (1-spk); alpha = sigmoid(tau) precomputed in wrapper."""
    new_mem = mem * alpha * (1.0 - spk_f32) + (1.0 - alpha) * R_M * y
    return new_mem, (new_mem > B_J0)


# ------------------------- conv-as-GEMM + LIF kernel -------------------------

def _lif_gemm_kernel(x_ref, w_ref, b_ref, a_ref, mem_ref, spk_ref,
                     mem_out_ref, spk_out_ref):
    """im2col GEMM (bf16 MXU, f32 acc) + fused LIF membrane/spike update (VPU)."""
    y = jnp.dot(x_ref[...], w_ref[...], preferred_element_type=jnp.float32)
    y = y + b_ref[...]
    new_mem, new_spk = _lif_update(y, a_ref[...], mem_ref[...],
                                   spk_ref[...].astype(jnp.float32))
    mem_out_ref[...] = new_mem
    spk_out_ref[...] = new_spk.astype(spk_out_ref.dtype)


def lif_gemm(x, w, b, alpha, mem, spk):
    """x:(M,K)bf16, w:(K,N)bf16, b/alpha:(1,N)f32, mem:(M,N)f32, spk:(M,N)bf16."""
    M, K = x.shape
    N = w.shape[1]
    target, vmem = _device_defaults()
    tm = _choose_tm(M, target)
    grid = (pl.cdiv(M, tm),)
    out_shape = (jax.ShapeDtypeStruct((M, N), jnp.float32),
                 jax.ShapeDtypeStruct((M, N), jnp.bfloat16))
    return pl.pallas_call(
        _lif_gemm_kernel,
        grid=grid,
        in_specs=[
            pl.BlockSpec((tm, K), lambda i: (i, 0)),     # row tile, pipelined
            pl.BlockSpec((K, N), lambda i: (0, 0)),      # weights stay resident
            pl.BlockSpec((1, N), lambda i: (0, 0)),
            pl.BlockSpec((1, N), lambda i: (0, 0)),
            pl.BlockSpec((tm, N), lambda i: (i, 0)),
            pl.BlockSpec((tm, N), lambda i: (i, 0)),
        ],
        out_specs=(pl.BlockSpec((tm, N), lambda i: (i, 0)),
                   pl.BlockSpec((tm, N), lambda i: (i, 0))),
        out_shape=out_shape,
        input_output_aliases={4: 0, 5: 1},               # mem/spk updated in place
        compiler_params=pltpu.CompilerParams(
            dimension_semantics=("parallel",),
            vmem_limit_bytes=vmem),
    )(x, w, b, alpha, mem, spk)


# ------------------------- depthwise conv + LIF kernels -------------------------

def _lif_dw_s1_kernel(xp_ref, w_ref, b_ref, a_ref, mem_ref, spk_ref,
                      mem_out_ref, spk_out_ref):
    """Stride-1 3x3 depthwise: 9 taps formed from static slices of the padded image."""
    _, Ho, Wo, _ = mem_ref.shape
    k = 3
    acc = None
    for di in range(k):
        for dj in range(k):
            t = di * k + dj
            tap = xp_ref[0, di:di + Ho, dj:dj + Wo, :]       # bf16 -> f32 promotion
            term = tap * w_ref[t]
            acc = term if acc is None else acc + term
    y = acc + b_ref[...]
    new_mem, new_spk = _lif_update(y, a_ref[...], mem_ref[0],
                                   spk_ref[0].astype(jnp.float32))
    mem_out_ref[0] = new_mem
    spk_out_ref[0] = new_spk.astype(spk_out_ref.dtype)


def _lif_dw_s2_kernel(xee_ref, xeo_ref, xoe_ref, xoo_ref, w_ref, b_ref, a_ref,
                      mem_ref, spk_ref, mem_out_ref, spk_out_ref):
    """Stride-2 3x3 depthwise: taps are contiguous slices of 4 even/odd phase maps."""
    _, Ho, Wo, _ = mem_ref.shape
    k = 3
    phase = ((xee_ref, xeo_ref), (xoe_ref, xoo_ref))          # [row parity][col parity]
    acc = None
    for di in range(k):
        for dj in range(k):
            t = di * k + dj
            src = phase[di % 2][dj % 2]
            r0, c0 = di // 2, dj // 2
            tap = src[0, r0:r0 + Ho, c0:c0 + Wo, :]
            term = tap * w_ref[t]
            acc = term if acc is None else acc + term
    y = acc + b_ref[...]
    new_mem, new_spk = _lif_update(y, a_ref[...], mem_ref[0],
                                   spk_ref[0].astype(jnp.float32))
    mem_out_ref[0] = new_mem
    spk_out_ref[0] = new_spk.astype(spk_out_ref.dtype)


def _img_spec(a):
    return pl.BlockSpec((1,) + a.shape[1:], lambda i: (i, 0, 0, 0))


def lif_dw_s1(xp, w, b, alpha, mem, spk):
    """xp:(B,Hp,Wp,C)bf16 padded spikes, w:(9,1,C)f32, mem:(B,Ho,Wo,C)f32, spk bf16."""
    B = xp.shape[0]
    _, Ho, Wo, C = mem.shape
    _, vmem = _device_defaults()
    st = pl.BlockSpec((1, Ho, Wo, C), lambda i: (i, 0, 0, 0))
    return pl.pallas_call(
        _lif_dw_s1_kernel,
        grid=(B,),
        in_specs=[_img_spec(xp),
                  pl.BlockSpec(w.shape, lambda i: (0, 0, 0)),
                  pl.BlockSpec(b.shape, lambda i: (0, 0)),
                  pl.BlockSpec(alpha.shape, lambda i: (0, 0)),
                  st, st],
        out_specs=(st, st),
        out_shape=(jax.ShapeDtypeStruct(mem.shape, jnp.float32),
                   jax.ShapeDtypeStruct(mem.shape, jnp.bfloat16)),
        input_output_aliases={4: 0, 5: 1},
        compiler_params=pltpu.CompilerParams(
            dimension_semantics=("parallel",),
            vmem_limit_bytes=vmem),
    )(xp, w, b, alpha, mem, spk)


def lif_dw_s2(phases, w, b, alpha, mem, spk):
    """phases: 4x (B,He,We,C) bf16 even/odd row/col phase maps of the padded image."""
    xee, xeo, xoe, xoo = phases
    B, Ho, Wo, C = mem.shape
    _, vmem = _device_defaults()
    st = pl.BlockSpec((1, Ho, Wo, C), lambda i: (i, 0, 0, 0))
    return pl.pallas_call(
        _lif_dw_s2_kernel,
        grid=(B,),
        in_specs=[_img_spec(xee), _img_spec(xeo), _img_spec(xoe), _img_spec(xoo),
                  pl.BlockSpec(w.shape, lambda i: (0, 0, 0)),
                  pl.BlockSpec(b.shape, lambda i: (0, 0)),
                  pl.BlockSpec(alpha.shape, lambda i: (0, 0)),
                  st, st],
        out_specs=(st, st),
        out_shape=(jax.ShapeDtypeStruct(mem.shape, jnp.float32),
                   jax.ShapeDtypeStruct(mem.shape, jnp.bfloat16)),
        input_output_aliases={7: 0, 8: 1},
        compiler_params=pltpu.CompilerParams(
            dimension_semantics=("parallel",),
            vmem_limit_bytes=vmem),
    )(xee, xeo, xoe, xoo, w, b, alpha, mem, spk)


# ------------------------- fused recurrent FC + readout -------------------------

def _fc_readout_kernel(x_ref, w1x_ref, w1h_ref, b1_ref, a1_ref, memh_ref, spkh_ref,
                       w3_ref, b3_ref, ao_ref, memo_ref,
                       memh_out, spkh_out, memo_out, logp_out):
    """Recurrent LIF FC -> readout linear -> leaky integrator -> log_softmax."""
    y1 = jnp.dot(x_ref[...], w1x_ref[...], preferred_element_type=jnp.float32)
    y1 = y1 + jnp.dot(spkh_ref[...], w1h_ref[...], preferred_element_type=jnp.float32)
    y1 = y1 + b1_ref[...]
    new_memh, spk_bool = _lif_update(y1, a1_ref[...], memh_ref[...],
                                     spkh_ref[...].astype(jnp.float32))
    new_spkh = spk_bool.astype(jnp.bfloat16)
    memh_out[...] = new_memh
    spkh_out[...] = new_spkh
    # dense3_x = layer3_x(spk); mem' = output_Neuron(dense3_x, mem, sigmoid(tau_m_o))
    y3 = jnp.dot(new_spkh, w3_ref[...], preferred_element_type=jnp.float32) + b3_ref[...]
    memo = memo_ref[...]
    new_memo = memo + (y3 - memo) * ao_ref[...]
    memo_out[...] = new_memo
    m = jnp.max(new_memo, axis=1, keepdims=True)
    z = new_memo - m
    lse = jnp.log(jnp.sum(jnp.exp(z), axis=1, keepdims=True))
    logp_out[...] = z - lse


def fc_readout(x, w1x, w1h, b1, a1, mem_h, spk_h, w3, b3, ao, mem_o):
    B = x.shape[0]
    Hn = w1x.shape[1]
    N = w3.shape[1]
    _, vmem = _device_defaults()
    args = (x, w1x, w1h, b1, a1, mem_h, spk_h, w3, b3, ao, mem_o)
    out_shape = (jax.ShapeDtypeStruct((B, Hn), jnp.float32),
                 jax.ShapeDtypeStruct((B, Hn), jnp.bfloat16),
                 jax.ShapeDtypeStruct((B, N), jnp.float32),
                 jax.ShapeDtypeStruct((B, N), jnp.float32))
    return pl.pallas_call(
        _fc_readout_kernel,
        grid=(1,),
        in_specs=[_full_spec(a.shape) for a in args],
        out_specs=tuple(_full_spec(s.shape) for s in out_shape),
        out_shape=out_shape,
        input_output_aliases={5: 0, 6: 1, 10: 2},
        compiler_params=pltpu.CompilerParams(
            dimension_semantics=("arbitrary",),
            vmem_limit_bytes=vmem),
    )(*args)


# ------------------------- plain-JAX glue (layout only) -------------------------

def _im2col_nhwc(x, k, s):
    """x: (B,H,W,C) -> patches (B*Ho*Wo, k*k*C), tap-major / channel-minor ordering."""
    pad = k // 2
    xp = jnp.pad(x, ((0, 0), (pad, pad), (pad, pad), (0, 0)))
    B, Hp, Wp, C = xp.shape
    Ho = (Hp - k) // s + 1
    Wo = (Wp - k) // s + 1
    cols = [xp[:, di:di + s * Ho:s, dj:dj + s * Wo:s, :]
            for di in range(k) for dj in range(k)]
    patches = jnp.stack(cols, axis=3)            # (B, Ho, Wo, k2, C)
    return patches.reshape(B * Ho * Wo, k * k * C)


# net = ['k3c64s2', 'd-k3c64s1', 'k1c64s1', 'd-k3c128s2', 'k1c128s2']
_NET = [('conv', 3, 64, 2), ('dw', 3, 64, 1), ('conv', 1, 64, 1),
        ('dw', 3, 128, 2), ('conv', 1, 128, 2)]


def init_params(key, input_size, hidden_size, output_size):
    C, H, W = input_size
    keys = jax.random.split(key, 2 * len(_NET) + 2)
    ki = 0
    conv_params, cfg, sizes = [], [], []
    c_in = C
    for (kind, k, c_out, s) in _NET:
        if kind == 'conv':
            if k == 1:
                w_raw = 0.1 * jax.random.normal(keys[ki], (c_out, c_in), jnp.float32)
                w = w_raw.T.astype(jnp.bfloat16)                     # (c_in, c_out)
            else:
                w_raw = 0.1 * jax.random.normal(keys[ki], (c_out, c_in, k, k),
                                                jnp.float32)
                w = (w_raw.transpose(2, 3, 1, 0)                     # (k,k,c_in,c_out)
                     .reshape(k * k * c_in, c_out).astype(jnp.bfloat16))
            mult = 1
        else:                                                        # depthwise taps
            mult = c_out // c_in
            w_raw = 0.1 * jax.random.normal(keys[ki], (c_out, k, k), jnp.float32)
            w = w_raw.reshape(c_out, k * k).T.reshape(k * k, 1, c_out)
        ki += 1
        tau = 4.0 + jax.random.normal(keys[ki], (1, c_out), jnp.float32)
        ki += 1
        conv_params.append(dict(w=w, b=jnp.zeros((1, c_out), jnp.float32), tau=tau))
        cfg.append((kind, k, s, mult))
        pad = k // 2
        H = (H + 2 * pad - k) // s + 1
        W = (W + 2 * pad - k) // s + 1
        c_in = c_out
        sizes.append((H, W, c_out))
    f_size = H * W * c_in
    fan_in = f_size + hidden_size                      # SNN_rec_cell(is_rec=True)
    bound = 1.0 / (fan_in ** 0.5)
    w1 = jax.random.uniform(keys[ki], (fan_in, hidden_size), jnp.float32, -bound, bound)
    ki += 1
    tau1 = 4.0 + jax.random.normal(keys[ki], (1, hidden_size), jnp.float32)
    params = dict(
        conv=conv_params,
        snn1=dict(wx=w1[:f_size].astype(jnp.bfloat16),
                  wh=w1[f_size:].astype(jnp.bfloat16),
                  b=jnp.zeros((1, hidden_size), jnp.float32), tau=tau1),
        # layer3_x weight/bias constant-initialized to 0; tau_m_o = 5.0
        out=dict(w=jnp.zeros((hidden_size, output_size), jnp.bfloat16),
                 b=jnp.zeros((1, output_size), jnp.float32),
                 tau=jnp.full((1, output_size), 5.0, jnp.float32)))
    return params, tuple(cfg), tuple(sizes)


def init_hidden(batch, sizes, hidden_size, output_size):
    # TODO(synk): conv-layer states are stored NHWC (B,H,W,C) with bf16 spikes,
    # not NCHW f32 as in the reference hidden-state contract.
    h = []
    for (H, W, C) in sizes:
        h.append(jnp.zeros((batch, H, W, C), jnp.float32))    # mem
        h.append(jnp.zeros((batch, H, W, C), jnp.bfloat16))   # spike
    h.append(jnp.zeros((batch, hidden_size), jnp.float32))    # snn1 mem
    h.append(jnp.zeros((batch, hidden_size), jnp.bfloat16))   # snn1 spike
    h.append(jnp.zeros((batch, output_size), jnp.float32))    # output mem
    h.append(jnp.zeros((batch, output_size), jnp.float32))    # output copy
    return tuple(h)


def snn_forward(params, inputs, h, cfg):
    h = list(h)
    B = inputs.shape[0]
    # NCHW -> NHWC once at the boundary; DVS inputs are small counts, bf16 is safe.
    x = jnp.transpose(inputs, (0, 2, 3, 1)).astype(jnp.bfloat16)
    n_conv = len(cfg)
    for li, (kind, k, s, mult) in enumerate(cfg):
        lp = params['conv'][li]
        alpha = jax.nn.sigmoid(lp['tau'])
        mem, spk = h[2 * li], h[2 * li + 1]
        _, Ho, Wo, C = mem.shape
        if kind == 'conv':
            if k == 1:                                 # 1x1 conv: no im2col needed
                xi = x[:, ::s, ::s, :] if s > 1 else x
                patches = xi.reshape(B * Ho * Wo, xi.shape[-1])
            else:
                patches = _im2col_nhwc(x, k, s)
            nm, ns = lif_gemm(patches, lp['w'], lp['b'], alpha,
                              mem.reshape(-1, C), spk.reshape(-1, C))
            new_mem = nm.reshape(B, Ho, Wo, C)
            new_spk = ns.reshape(B, Ho, Wo, C)
        else:                                          # depthwise: in-kernel taps
            xi = x
            if mult > 1:
                # TODO(synk): channel-multiplier repeat stays wrapper-side (fused by
                # XLA with the pad / phase-split copy) rather than an in-kernel gather.
                xi = jnp.repeat(xi, mult, axis=-1)
            pad = k // 2
            xp = jnp.pad(xi, ((0, 0), (pad, pad), (pad, pad), (0, 0)))
            if s == 1:
                new_mem, new_spk = lif_dw_s1(xp, lp['w'], lp['b'], alpha, mem, spk)
            else:
                assert s == 2 and k == 3
                phases = (xp[:, 0::2, 0::2, :], xp[:, 0::2, 1::2, :],
                          xp[:, 1::2, 0::2, :], xp[:, 1::2, 1::2, :])
                new_mem, new_spk = lif_dw_s2(phases, lp['w'], lp['b'], alpha, mem, spk)
        h[2 * li], h[2 * li + 1] = new_mem, new_spk
        x = new_spk
    # (Dropout2d is declared in __init__ but never applied in the reference forward.)
    # Flatten in NHWC order (equivalent to the reference NCHW flatten up to a fixed
    # permutation of snn1's randomly initialized input weights).
    f_spike = x.reshape(B, -1)
    li = n_conv
    sp, op = params['snn1'], params['out']
    new_mem_h, new_spk_h, new_mem_o, logp = fc_readout(
        f_spike, sp['wx'], sp['wh'], sp['b'], jax.nn.sigmoid(sp['tau']),
        h[2 * li], h[2 * li + 1],
        op['w'], op['b'], jax.nn.sigmoid(op['tau']), h[-2])
    h[2 * li], h[2 * li + 1] = new_mem_h, new_spk_h
    h[-2] = new_mem_o
    h[-1] = new_mem_o                                  # matches reference: h[-1] = h[-2]
    h = tuple(h)
    return logp, h, [h]


if __name__ == "__main__":
    batch = 2
    input_size = (2, 16, 16)        # (C, H, W) — DVS-style 2-channel input
    hidden_size = 32
    output_size = 10

    key = jax.random.PRNGKey(0)
    kx, kp = jax.random.split(key)
    x = jax.random.normal(kx, (batch,) + input_size, jnp.float32)

    params, cfg, sizes = init_params(kp, input_size, hidden_size, output_size)
    h0 = init_hidden(batch, sizes, hidden_size, output_size)

    fwd = jax.jit(snn_forward, static_argnames=('cfg',))
    f_output, final_state, hiddens = fwd(params, x, h0, cfg=cfg)
    jax.block_until_ready(f_output)
    jax.block_until_ready(final_state)

    assert f_output.shape == (batch, output_size)
    assert bool(jnp.all(jnp.isfinite(f_output)))
    print("KERNEL_OK")
</pallas_src>

<mosaic_0001>
module attributes {stable_mosaic.version = 11 : i64} {
  func.func @_lif_gemm_kernel(%arg0: i32, %arg1: memref<64x18xbf16, #tpu.memory_space<vmem>>, %arg2: memref<18x64xbf16, #tpu.memory_space<vmem>>, %arg3: memref<1x64xf32, #tpu.memory_space<vmem>>, %arg4: memref<1x64xf32, #tpu.memory_space<vmem>>, %arg5: memref<64x64xf32, #tpu.memory_space<vmem>>, %arg6: memref<64x64xbf16, #tpu.memory_space<vmem>>, %arg7: memref<64x64xf32, #tpu.memory_space<vmem>>, %arg8: memref<64x64xbf16, #tpu.memory_space<vmem>>) attributes {dimension_semantics = [#tpu.dimension_semantics<parallel>], iteration_bounds = array<i64: 2>, scalar_prefetch = 0 : i64, scratch_operands = 0 : i64, tpu.core_type = #tpu.core_type<tc>, window_params = [{transform_indices = @transform_0, window_bounds = array<i64: 64, 18>}, {pipeline_mode = #tpu.pipeline_mode<synchronous>, transform_indices = @transform_1, window_bounds = array<i64: 18, 64>}, {pipeline_mode = #tpu.pipeline_mode<synchronous>, transform_indices = @transform_2, window_bounds = array<i64: 1, 64>}, {pipeline_mode = #tpu.pipeline_mode<synchronous>, transform_indices = @transform_3, window_bounds = array<i64: 1, 64>}, {transform_indices = @transform_4, window_bounds = array<i64: 64, 64>}, {transform_indices = @transform_5, window_bounds = array<i64: 64, 64>}, {transform_indices = @transform_6, window_bounds = array<i64: 64, 64>}, {transform_indices = @transform_7, window_bounds = array<i64: 64, 64>}]} {
    %c0 = arith.constant 0 : index
    %c0_0 = arith.constant 0 : index
    %0 = vector.load %arg1[%c0, %c0_0] : memref<64x18xbf16, #tpu.memory_space<vmem>>, vector<64x18xbf16>
    %c0_1 = arith.constant 0 : index
    %c0_2 = arith.constant 0 : index
    %1 = vector.load %arg2[%c0_1, %c0_2] : memref<18x64xbf16, #tpu.memory_space<vmem>>, vector<18x64xbf16>
    %cst = arith.constant dense<0.000000e+00> : vector<64x64xf32>
    %2 = tpu.matmul %0, %1, %cst {dimension_numbers = #tpu.dot_dimension_numbers<[1], [0], [0], [1], [0, 0, 1, 1], [], []>} : vector<64x18xbf16>, vector<18x64xbf16>, vector<64x64xf32> -> vector<64x64xf32>
    %c0_3 = arith.constant 0 : index
    %c0_4 = arith.constant 0 : index
    %3 = vector.load %arg3[%c0_3, %c0_4] : memref<1x64xf32, #tpu.memory_space<vmem>>, vector<1x64xf32>
    %4 = vector.broadcast %3 : vector<1x64xf32> to vector<64x64xf32>
    %5 = arith.addf %2, %4 : vector<64x64xf32>
    %c0_5 = arith.constant 0 : index
    %c0_6 = arith.constant 0 : index
    %6 = vector.load %arg4[%c0_5, %c0_6] : memref<1x64xf32, #tpu.memory_space<vmem>>, vector<1x64xf32>
    %c0_7 = arith.constant 0 : index
    %c0_8 = arith.constant 0 : index
    %7 = vector.load %arg5[%c0_7, %c0_8] : memref<64x64xf32, #tpu.memory_space<vmem>>, vector<64x64xf32>
    %c0_9 = arith.constant 0 : index
    %c0_10 = arith.constant 0 : index
    %8 = vector.load %arg6[%c0_9, %c0_10] : memref<64x64xbf16, #tpu.memory_space<vmem>>, vector<64x64xbf16>
    %9 = arith.extf %8 : vector<64x64xbf16> to vector<64x64xf32>
    %10 = vector.broadcast %6 : vector<1x64xf32> to vector<64x64xf32>
    %11 = arith.mulf %7, %10 : vector<64x64xf32>
    %cst_11 = arith.constant 1.000000e+00 : f32
    %12 = vector.broadcast %cst_11 : f32 to vector<64x64xf32>
    %13 = arith.subf %12, %9 : vector<64x64xf32>
    %14 = arith.mulf %11, %13 : vector<64x64xf32>
    %cst_12 = arith.constant 1.000000e+00 : f32
    %15 = vector.broadcast %cst_12 : f32 to vector<1x64xf32>
    %16 = arith.subf %15, %6 : vector<1x64xf32>
    %cst_13 = arith.constant 1.000000e+00 : f32
    %17 = vector.broadcast %cst_13 : f32 to vector<1x64xf32>
    %18 = arith.mulf %16, %17 : vector<1x64xf32>
    %19 = vector.broadcast %18 : vector<1x64xf32> to vector<64x64xf32>
    %20 = arith.mulf %19, %5 : vector<64x64xf32>
    %21 = arith.addf %14, %20 : vector<64x64xf32>
    %cst_14 = arith.constant 1.000000e-01 : f32
    %22 = vector.broadcast %cst_14 : f32 to vector<64x64xf32>
    %23 = arith.cmpf ogt, %21, %22 : vector<64x64xf32>
    %c0_15 = arith.constant 0 : index
    %c0_16 = arith.constant 0 : index
    %24 = vector.load %arg7[%c0_15, %c0_16] : memref<64x64xf32, #tpu.memory_space<vmem>>, vector<64x64xf32>
    tpu.vector_store %arg7[%c0_15, %c0_16], %21 {strides = array<i32>} : memref<64x64xf32, #tpu.memory_space<vmem>>, vector<64x64xf32>,
    %25 = arith.extui %23 : vector<64x64xi1> to vector<64x64xi32>
    %26 = arith.sitofp %25 : vector<64x64xi32> to vector<64x64xf32>
    %27 = arith.truncf %26 : vector<64x64xf32> to vector<64x64xbf16>
    %c0_17 = arith.constant 0 : index
    %c0_18 = arith.constant 0 : index
    %28 = vector.load %arg8[%c0_17, %c0_18] : memref<64x64xbf16, #tpu.memory_space<vmem>>, vector<64x64xbf16>
    tpu.vector_store %arg8[%c0_17, %c0_18], %27 {strides = array<i32>} : memref<64x64xbf16, #tpu.memory_space<vmem>>, vector<64x64xbf16>,
    return
  }
  func.func @transform_0(%arg0: i32) -> (i32, i32) {
    %c0_i32 = arith.constant 0 : i32
    %c0_i32_0 = arith.constant 0 : i32
    return %arg0, %c0_i32 : i32, i32
  }
  func.func @transform_1(%arg0: i32) -> (i32, i32) {
    %c0_i32 = arith.constant 0 : i32
    %c0_i32_0 = arith.constant 0 : i32
    %c0_i32_1 = arith.constant 0 : i32
    return %c0_i32, %c0_i32_0 : i32, i32
  }
  func.func @transform_2(%arg0: i32) -> (i32, i32) {
    %c0_i32 = arith.constant 0 : i32
    %c0_i32_0 = arith.constant 0 : i32
    %c0_i32_1 = arith.constant 0 : i32
    return %c0_i32, %c0_i32_0 : i32, i32
  }
  func.func @transform_3(%arg0: i32) -> (i32, i32) {
    %c0_i32 = arith.constant 0 : i32
    %c0_i32_0 = arith.constant 0 : i32
    %c0_i32_1 = arith.constant 0 : i32
    return %c0_i32, %c0_i32_0 : i32, i32
  }
  func.func @transform_4(%arg0: i32) -> (i32, i32) {
    %c0_i32 = arith.constant 0 : i32
    %c0_i32_0 = arith.constant 0 : i32
    return %arg0, %c0_i32 : i32, i32
  }
  func.func @transform_5(%arg0: i32) -> (i32, i32) {
    %c0_i32 = arith.constant 0 : i32
    %c0_i32_0 = arith.constant 0 : i32
    return %arg0, %c0_i32 : i32, i32
  }
  func.func @transform_6(%arg0: i32) -> (i32, i32) {
    %c0_i32 = arith.constant 0 : i32
    %c0_i32_0 = arith.constant 0 : i32
    return %arg0, %c0_i32 : i32, i32
  }
  func.func @transform_7(%arg0: i32) -> (i32, i32) {
    %c0_i32 = arith.constant 0 : i32
    %c0_i32_0 = arith.constant 0 : i32
    return %arg0, %c0_i32 : i32, i32
  }
}

module attributes {stable_mosaic.version = 11 : i64} {
  func.func @_lif_dw_s1_kernel(%arg0: i32, %arg1: memref<1x10x10x64xbf16, #tpu.memory_space<vmem>>, %arg2: memref<9x1x64xf32, #tpu.memory_space<vmem>>, %arg3: memref<1x64xf32, #tpu.memory_space<vmem>>, %arg4: memref<1x64xf32, #tpu.memory_space<vmem>>, %arg5: memref<1x8x8x64xf32, #tpu.memory_space<vmem>>, %arg6: memref<1x8x8x64xbf16, #tpu.memory_space<vmem>>, %arg7: memref<1x8x8x64xf32, #tpu.memory_space<vmem>>, %arg8: memref<1x8x8x64xbf16, #tpu.memory_space<vmem>>) attributes {dimension_semantics = [#tpu.dimension_semantics<parallel>], iteration_bounds = array<i64: 2>, scalar_prefetch = 0 : i64, scratch_operands = 0 : i64, tpu.core_type = #tpu.core_type<tc>, window_params = [{transform_indices = @transform_0, window_bounds = array<i64: 1, 10, 10, 64>}, {pipeline_mode = #tpu.pipeline_mode<synchronous>, transform_indices = @transform_1, window_bounds = array<i64: 9, 1, 64>}, {pipeline_mode = #tpu.pipeline_mode<synchronous>, transform_indices = @transform_2, window_bounds = array<i64: 1, 64>}, {pipeline_mode = #tpu.pipeline_mode<synchronous>, transform_indices = @transform_3, window_bounds = array<i64: 1, 64>}, {transform_indices = @transform_4, window_bounds = array<i64: 1, 8, 8, 64>}, {transform_indices = @transform_5, window_bounds = array<i64: 1, 8, 8, 64>}, {transform_indices = @transform_6, window_bounds = array<i64: 1, 8, 8, 64>}, {transform_indices = @transform_7, window_bounds = array<i64: 1, 8, 8, 64>}]} {
    %c0 = arith.constant 0 : index
    %c0_0 = arith.constant 0 : index
    %c0_1 = arith.constant 0 : index
    %c0_2 = arith.constant 0 : index
    %0 = vector.load %arg1[%c0, %c0_0, %c0_1, %c0_2] : memref<1x10x10x64xbf16, #tpu.memory_space<vmem>>, vector<1x8x8x64xbf16>
    %1 = vector.shape_cast %0 : vector<1x8x8x64xbf16> to vector<8x8x64xbf16>
    %c0_3 = arith.constant 0 : index
    %c0_4 = arith.constant 0 : index
    %c0_5 = arith.constant 0 : index
    %2 = vector.load %arg2[%c0_3, %c0_4, %c0_5] : memref<9x1x64xf32, #tpu.memory_space<vmem>>, vector<1x1x64xf32>
    %3 = vector.shape_cast %2 : vector<1x1x64xf32> to vector<1x64xf32>
    %4 = arith.extf %1 : vector<8x8x64xbf16> to vector<8x8x64xf32>
    %5 = vector.shape_cast %3 : vector<1x64xf32> to vector<1x1x64xf32>
    %6 = vector.broadcast %5 : vector<1x1x64xf32> to vector<8x8x64xf32>
    %7 = arith.mulf %4, %6 : vector<8x8x64xf32>
    %c0_6 = arith.constant 0 : index
    %c0_7 = arith.constant 0 : index
    %c1 = arith.constant 1 : index
    %c0_8 = arith.constant 0 : index
    %8 = vector.load %arg1[%c0_6, %c0_7, %c1, %c0_8] : memref<1x10x10x64xbf16, #tpu.memory_space<vmem>>, vector<1x8x8x64xbf16>
    %9 = vector.shape_cast %8 : vector<1x8x8x64xbf16> to vector<8x8x64xbf16>
    %c1_9 = arith.constant 1 : index
    %c0_10 = arith.constant 0 : index
    %c0_11 = arith.constant 0 : index
    %10 = vector.load %arg2[%c1_9, %c0_10, %c0_11] : memref<9x1x64xf32, #tpu.memory_space<vmem>>, vector<1x1x64xf32>
    %11 = vector.shape_cast %10 : vector<1x1x64xf32> to vector<1x64xf32>
    %12 = arith.extf %9 : vector<8x8x64xbf16> to vector<8x8x64xf32>
    %13 = vector.shape_cast %11 : vector<1x64xf32> to vector<1x1x64xf32>
    %14 = vector.broadcast %13 : vector<1x1x64xf32> to vector<8x8x64xf32>
    %15 = arith.mulf %12, %14 : vector<8x8x64xf32>
    %16 = arith.addf %7, %15 : vector<8x8x64xf32>
    %c0_12 = arith.constant 0 : index
    %c0_13 = arith.constant 0 : index
    %c2 = arith.constant 2 : index
    %c0_14 = arith.constant 0 : index
    %17 = vector.load %arg1[%c0_12, %c0_13, %c2, %c0_14] : memref<1x10x10x64xbf16, #tpu.memory_space<vmem>>, vector<1x8x8x64xbf16>
    %18 = vector.shape_cast %17 : vector<1x8x8x64xbf16> to vector<8x8x64xbf16>
    %c2_15 = arith.constant 2 : index
    %c0_16 = arith.constant 0 : index
    %c0_17 = arith.constant 0 : index
    %19 = vector.load %arg2[%c2_15, %c0_16, %c0_17] : memref<9x1x64xf32, #tpu.memory_space<vmem>>, vector<1x1x64xf32>
    %20 = vector.shape_cast %19 : vector<1x1x64xf32> to vector<1x64xf32>
    %21 = arith.extf %18 : vector<8x8x64xbf16> to vector<8x8x64xf32>
    %22 = vector.shape_cast %20 : vector<1x64xf32> to vector<1x1x64xf32>
    %23 = vector.broadcast %22 : vector<1x1x64xf32> to vector<8x8x64xf32>
    %24 = arith.mulf %21, %23 : vector<8x8x64xf32>
    %25 = arith.addf %16, %24 : vector<8x8x64xf32>
    %c0_18 = arith.constant 0 : index
    %c1_19 = arith.constant 1 : index
    %c0_20 = arith.constant 0 : index
    %c0_21 = arith.constant 0 : index
    %26 = vector.load %arg1[%c0_18, %c1_19, %c0_20, %c0_21] : memref<1x10x10x64xbf16, #tpu.memory_space<vmem>>, vector<1x8x8x64xbf16>
    %27 = vector.shape_cast %26 : vector<1x8x8x64xbf16> to vector<8x8x64xbf16>
    %c3 = arith.constant 3 : index
    %c0_22 = arith.constant 0 : index
    %c0_23 = arith.constant 0 : index
    %28 = vector.load %arg2[%c3, %c0_22, %c0_23] : memref<9x1x64xf32, #tpu.memory_space<vmem>>, vector<1x1x64xf32>
    %29 = vector.shape_cast %28 : vector<1x1x64xf32> to vector<1x64xf32>
    %30 = arith.extf %27 : vector<8x8x64xbf16> to vector<8x8x64xf32>
    %31 = vector.shape_cast %29 : vector<1x64xf32> to vector<1x1x64xf32>
    %32 = vector.broadcast %31 : vector<1x1x64xf32> to vector<8x8x64xf32>
    %33 = arith.mulf %30, %32 : vector<8x8x64xf32>
    %34 = arith.addf %25, %33 : vector<8x8x64xf32>
    %c0_24 = arith.constant 0 : index
    %c1_25 = arith.constant 1 : index
    %c1_26 = arith.constant 1 : index
    %c0_27 = arith.constant 0 : index
    %35 = vector.load %arg1[%c0_24, %c1_25, %c1_26, %c0_27] : memref<1x10x10x64xbf16, #tpu.memory_space<vmem>>, vector<1x8x8x64xbf16>
    %36 = vector.shape_cast %35 : vector<1x8x8x64xbf16> to vector<8x8x64xbf16>
    %c4 = arith.constant 4 : index
    %c0_28 = arith.constant 0 : index
    %c0_29 = arith.constant 0 : index
    %37 = vector.load %arg2[%c4, %c0_28, %c0_29] : memref<9x1x64xf32, #tpu.memory_space<vmem>>, vector<1x1x64xf32>
    %38 = vector.shape_cast %37 : vector<1x1x64xf32> to vector<1x64xf32>
    %39 = arith.extf %36 : vector<8x8x64xbf16> to vector<8x8x64xf32>
    %40 = vector.shape_cast %38 : vector<1x64xf32> to vector<1x1x64xf32>
    %41 = vector.broadcast %40 : vector<1x1x64xf32> to vector<8x8x64xf32>
    %42 = arith.mulf %39, %41 : vector<8x8x64xf32>
    %43 = arith.addf %34, %42 : vector<8x8x64xf32>
    %c0_30 = arith.constant 0 : index
    %c1_31 = arith.constant 1 : index
    %c2_32 = arith.constant 2 : index
    %c0_33 = arith.constant 0 : index
    %44 = vector.load %arg1[%c0_30, %c1_31, %c2_32, %c0_33] : memref<1x10x10x64xbf16, #tpu.memory_space<vmem>>, vector<1x8x8x64xbf16>
    %45 = vector.shape_cast %44 : vector<1x8x8x64xbf16> to vector<8x8x64xbf16>
    %c5 = arith.constant 5 : index
    %c0_34 = arith.constant 0 : index
    %c0_35 = arith.constant 0 : index
    %46 = vector.load %arg2[%c5, %c0_34, %c0_35] : memref<9x1x64xf32, #tpu.memory_space<vmem>>, vector<1x1x64xf32>
    %47 = vector.shape_cast %46 : vector<1x1x64xf32> to vector<1x64xf32>
    %48 = arith.extf %45 : vector<8x8x64xbf16> to vector<8x8x64xf32>
    %49 = vector.shape_cast %47 : vector<1x64xf32> to vector<1x1x64xf32>
    %50 = vector.broadcast %49 : vector<1x1x64xf32> to vector<8x8x64xf32>
    %51 = arith.mulf %48, %50 : vector<8x8x64xf32>
    %52 = arith.addf %43, %51 : vector<8x8x64xf32>
    %c0_36 = arith.constant 0 : index
    %c2_37 = arith.constant 2 : index
    %c0_38 = arith.constant 0 : index
    %c0_39 = arith.constant 0 : index
    %53 = vector.load %arg1[%c0_36, %c2_37, %c0_38, %c0_39] : memref<1x10x10x64xbf16, #tpu.memory_space<vmem>>, vector<1x8x8x64xbf16>
    %54 = vector.shape_cast %53 : vector<1x8x8x64xbf16> to vector<8x8x64xbf16>
    %c6 = arith.constant 6 : index
    %c0_40 = arith.constant 0 : index
    %c0_41 = arith.constant 0 : index
    %55 = vector.load %arg2[%c6, %c0_40, %c0_41] : memref<9x1x64xf32, #tpu.memory_space<vmem>>, vector<1x1x64xf32>
    %56 = vector.shape_cast %55 : vector<1x1x64xf32> to vector<1x64xf32>
    %57 = arith.extf %54 : vector<8x8x64xbf16> to vector<8x8x64xf32>
    %58 = vector.shape_cast %56 : vector<1x64xf32> to vector<1x1x64xf32>
    %59 = vector.broadcast %58 : vector<1x1x64xf32> to vector<8x8x64xf32>
    %60 = arith.mulf %57, %59 : vector<8x8x64xf32>
    %61 = arith.addf %52, %60 : vector<8x8x64xf32>
    %c0_42 = arith.constant 0 : index
    %c2_43 = arith.constant 2 : index
    %c1_44 = arith.constant 1 : index
    %c0_45 = arith.constant 0 : index
    %62 = vector.load %arg1[%c0_42, %c2_43, %c1_44, %c0_45] : memref<1x10x10x64xbf16, #tpu.memory_space<vmem>>, vector<1x8x8x64xbf16>
    %63 = vector.shape_cast %62 : vector<1x8x8x64xbf16> to vector<8x8x64xbf16>
    %c7 = arith.constant 7 : index
    %c0_46 = arith.constant 0 : index
    %c0_47 = arith.constant 0 : index
    %64 = vector.load %arg2[%c7, %c0_46, %c0_47] : memref<9x1x64xf32, #tpu.memory_space<vmem>>, vector<1x1x64xf32>
    %65 = vector.shape_cast %64 : vector<1x1x64xf32> to vector<1x64xf32>
    %66 = arith.extf %63 : vector<8x8x64xbf16> to vector<8x8x64xf32>
    %67 = vector.shape_cast %65 : vector<1x64xf32> to vector<1x1x64xf32>
    %68 = vector.broadcast %67 : vector<1x1x64xf32> to vector<8x8x64xf32>
    %69 = arith.mulf %66, %68 : vector<8x8x64xf32>
    %70 = arith.addf %61, %69 : vector<8x8x64xf32>
    %c0_48 = arith.constant 0 : index
    %c2_49 = arith.constant 2 : index
    %c2_50 = arith.constant 2 : index
    %c0_51 = arith.constant 0 : index
    %71 = vector.load %arg1[%c0_48, %c2_49, %c2_50, %c0_51] : memref<1x10x10x64xbf16, #tpu.memory_space<vmem>>, vector<1x8x8x64xbf16>
    %72 = vector.shape_cast %71 : vector<1x8x8x64xbf16> to vector<8x8x64xbf16>
    %c8 = arith.constant 8 : index
    %c0_52 = arith.constant 0 : index
    %c0_53 = arith.constant 0 : index
    %73 = vector.load %arg2[%c8, %c0_52, %c0_53] : memref<9x1x64xf32, #tpu.memory_space<vmem>>, vector<1x1x64xf32>
    %74 = vector.shape_cast %73 : vector<1x1x64xf32> to vector<1x64xf32>
    %75 = arith.extf %72 : vector<8x8x64xbf16> to vector<8x8x64xf32>
    %76 = vector.shape_cast %74 : vector<1x64xf32> to vector<1x1x64xf32>
    %77 = vector.broadcast %76 : vector<1x1x64xf32> to vector<8x8x64xf32>
    %78 = arith.mulf %75, %77 : vector<8x8x64xf32>
    %79 = arith.addf %70, %78 : vector<8x8x64xf32>
    %c0_54 = arith.constant 0 : index
    %c0_55 = arith.constant 0 : index
    %80 = vector.load %arg3[%c0_54, %c0_55] : memref<1x64xf32, #tpu.memory_space<vmem>>, vector<1x64xf32>
    %81 = vector.shape_cast %80 : vector<1x64xf32> to vector<1x1x64xf32>
    %82 = vector.broadcast %81 : vector<1x1x64xf32> to vector<8x8x64xf32>
    %83 = arith.addf %79, %82 : vector<8x8x64xf32>
    %c0_56 = arith.constant 0 : index
    %c0_57 = arith.constant 0 : index
    %84 = vector.load %arg4[%c0_56, %c0_57] : memref<1x64xf32, #tpu.memory_space<vmem>>, vector<1x64xf32>
    %c0_58 = arith.constant 0 : index
    %c0_59 = arith.constant 0 : index
    %c0_60 = arith.constant 0 : index
    %c0_61 = arith.constant 0 : index
    %85 = vector.load %arg5[%c0_58, %c0_59, %c0_60, %c0_61] : memref<1x8x8x64xf32, #tpu.memory_space<vmem>>, vector<1x8x8x64xf32>
    %86 = vector.shape_cast %85 : vector<1x8x8x64xf32> to vector<8x8x64xf32>
    %c0_62 = arith.constant 0 : index
    %c0_63 = arith.constant 0 : index
    %c0_64 = arith.constant 0 : index
    %c0_65 = arith.constant 0 : index
    %87 = vector.load %arg6[%c0_62, %c0_63, %c0_64, %c0_65] : memref<1x8x8x64xbf16, #tpu.memory_space<vmem>>, vector<1x8x8x64xbf16>
    %88 = vector.shape_cast %87 : vector<1x8x8x64xbf16> to vector<8x8x64xbf16>
    %89 = arith.extf %88 : vector<8x8x64xbf16> to vector<8x8x64xf32>
    %90 = vector.shape_cast %84 : vector<1x64xf32> to vector<1x1x64xf32>
    %91 = vector.broadcast %90 : vector<1x1x64xf32> to vector<8x8x64xf32>
    %92 = arith.mulf %86, %91 : vector<8x8x64xf32>
    %cst = arith.constant 1.000000e+00 : f32
    %93 = vector.broadcast %cst : f32 to vector<8x8x64xf32>
    %94 = arith.subf %93, %89 : vector<8x8x64xf32>
    %95 = arith.mulf %92, %94 : vector<8x8x64xf32>
    %cst_66 = arith.constant 1.000000e+00 : f32
    %96 = vector.broadcast %cst_66 : f32 to vector<1x64xf32>
    %97 = arith.subf %96, %84 : vector<1x64xf32>
    %cst_67 = arith.constant 1.000000e+00 : f32
    %98 = vector.broadcast %cst_67 : f32 to vector<1x64xf32>
    %99 = arith.mulf %97, %98 : vector<1x64xf32>
    %100 = vector.shape_cast %99 : vector<1x64xf32> to vector<1x1x64xf32>
    %101 = vector.broadcast %100 : vector<1x1x64xf32> to vector<8x8x64xf32>
    %102 = arith.mulf %101, %83 : vector<8x8x64xf32>
    %103 = arith.addf %95, %102 : vector<8x8x64xf32>
    %cst_68 = arith.constant 1.000000e-01 : f32
    %104 = vector.broadcast %cst_68 : f32 to vector<8x8x64xf32>
    %105 = arith.cmpf ogt, %103, %104 : vector<8x8x64xf32>
    %c0_69 = arith.constant 0 : index
    %c0_70 = arith.constant 0 : index
    %c0_71 = arith.constant 0 : index
    %c0_72 = arith.constant 0 : index
    %106 = vector.load %arg7[%c0_69, %c0_70, %c0_71, %c0_72] : memref<1x8x8x64xf32, #tpu.memory_space<vmem>>, vector<1x8x8x64xf32>
    %107 = vector.shape_cast %106 : vector<1x8x8x64xf32> to vector<8x8x64xf32>
    %108 = vector.shape_cast %103 : vector<8x8x64xf32> to vector<1x8x8x64xf32>
    tpu.vector_store %arg7[%c0_69, %c0_70, %c0_71, %c0_72], %108 {strides = array<i32>} : memref<1x8x8x64xf32, #tpu.memory_space<vmem>>, vector<1x8x8x64xf32>,
    %109 = arith.extui %105 : vector<8x8x64xi1> to vector<8x8x64xi32>
    %110 = arith.sitofp %109 : vector<8x8x64xi32> to vector<8x8x64xf32>
    %111 = arith.truncf %110 : vector<8x8x64xf32> to vector<8x8x64xbf16>
    %c0_73 = arith.constant 0 : index
    %c0_74 = arith.constant 0 : index
    %c0_75 = arith.constant 0 : index
    %c0_76 = arith.constant 0 : index
    %112 = vector.load %arg8[%c0_73, %c0_74, %c0_75, %c0_76] : memref<1x8x8x64xbf16, #tpu.memory_space<vmem>>, vector<1x8x8x64xbf16>
    %113 = vector.shape_cast %112 : vector<1x8x8x64xbf16> to vector<8x8x64xbf16>
    %114 = vector.shape_cast %111 : vector<8x8x64xbf16> to vector<1x8x8x64xbf16>
    tpu.vector_store %arg8[%c0_73, %c0_74, %c0_75, %c0_76], %114 {strides = array<i32>} : memref<1x8x8x64xbf16, #tpu.memory_space<vmem>>, vector<1x8x8x64xbf16>,
    return
  }
  func.func @transform_0(%arg0: i32) -> (i32, i32, i32, i32) {
    %c0_i32 = arith.constant 0 : i32
    %c0_i32_0 = arith.constant 0 : i32
    %c0_i32_1 = arith.constant 0 : i32
    %c0_i32_2 = arith.constant 0 : i32
    return %arg0, %c0_i32, %c0_i32_0, %c0_i32_1 : i32, i32, i32, i32
  }
  func.func @transform_1(%arg0: i32) -> (i32, i32, i32) {
    %c0_i32 = arith.constant 0 : i32
    %c0_i32_0 = arith.constant 0 : i32
    %c0_i32_1 = arith.constant 0 : i32
    %c0_i32_2 = arith.constant 0 : i32
    return %c0_i32, %c0_i32_0, %c0_i32_1 : i32, i32, i32
  }
  func.func @transform_2(%arg0: i32) -> (i32, i32) {
    %c0_i32 = arith.constant 0 : i32
    %c0_i32_0 = arith.constant 0 : i32
    %c0_i32_1 = arith.constant 0 : i32
    return %c0_i32, %c0_i32_0 : i32, i32
  }
  func.func @transform_3(%arg0: i32) -> (i32, i32) {
    %c0_i32 = arith.constant 0 : i32
    %c0_i32_0 = arith.constant 0 : i32
    %c0_i32_1 = arith.constant 0 : i32
    return %c0_i32, %c0_i32_0 : i32, i32
  }
  func.func @transform_4(%arg0: i32) -> (i32, i32, i32, i32) {
    %c0_i32 = arith.constant 0 : i32
    %c0_i32_0 = arith.constant 0 : i32
    %c0_i32_1 = arith.constant 0 : i32
    %c0_i32_2 = arith.constant 0 : i32
    return %arg0, %c0_i32, %c0_i32_0, %c0_i32_1 : i32, i32, i32, i32
  }
  func.func @transform_5(%arg0: i32) -> (i32, i32, i32, i32) {
    %c0_i32 = arith.constant 0 : i32
    %c0_i32_0 = arith.constant 0 : i32
    %c0_i32_1 = arith.constant 0 : i32
    %c0_i32_2 = arith.constant 0 : i32
    return %arg0, %c0_i32, %c0_i32_0, %c0_i32_1 : i32, i32, i32, i32
  }
  func.func @transform_6(%arg0: i32) -> (i32, i32, i32, i32) {
    %c0_i32 = arith.constant 0 : i32
    %c0_i32_0 = arith.constant 0 : i32
    %c0_i32_1 = arith.constant 0 : i32
    %c0_i32_2 = arith.constant 0 : i32
    return %arg0, %c0_i32, %c0_i32_0, %c0_i32_1 : i32, i32, i32, i32
  }
  func.func @transform_7(%arg0: i32) -> (i32, i32, i32, i32) {
    %c0_i32 = arith.constant 0 : i32
    %c0_i32_0 = arith.constant 0 : i32
    %c0_i32_1 = arith.constant 0 : i32
    %c0_i32_2 = arith.constant 0 : i32
    return %arg0, %c0_i32, %c0_i32_0, %c0_i32_1 : i32, i32, i32, i32
  }
}

module attributes {stable_mosaic.version = 11 : i64} {
  func.func @_lif_gemm_kernel(%arg0: i32, %arg1: memref<64x64xbf16, #tpu.memory_space<vmem>>, %arg2: memref<64x64xbf16, #tpu.memory_space<vmem>>, %arg3: memref<1x64xf32, #tpu.memory_space<vmem>>, %arg4: memref<1x64xf32, #tpu.memory_space<vmem>>, %arg5: memref<64x64xf32, #tpu.memory_space<vmem>>, %arg6: memref<64x64xbf16, #tpu.memory_space<vmem>>, %arg7: memref<64x64xf32, #tpu.memory_space<vmem>>, %arg8: memref<64x64xbf16, #tpu.memory_space<vmem>>) attributes {dimension_semantics = [#tpu.dimension_semantics<parallel>], iteration_bounds = array<i64: 2>, scalar_prefetch = 0 : i64, scratch_operands = 0 : i64, tpu.core_type = #tpu.core_type<tc>, window_params = [{transform_indices = @transform_0, window_bounds = array<i64: 64, 64>}, {pipeline_mode = #tpu.pipeline_mode<synchronous>, transform_indices = @transform_1, window_bounds = array<i64: 64, 64>}, {pipeline_mode = #tpu.pipeline_mode<synchronous>, transform_indices = @transform_2, window_bounds = array<i64: 1, 64>}, {pipeline_mode = #tpu.pipeline_mode<synchronous>, transform_indices = @transform_3, window_bounds = array<i64: 1, 64>}, {transform_indices = @transform_4, window_bounds = array<i64: 64, 64>}, {transform_indices = @transform_5, window_bounds = array<i64: 64, 64>}, {transform_indices = @transform_6, window_bounds = array<i64: 64, 64>}, {transform_indices = @transform_7, window_bounds = array<i64: 64, 64>}]} {
    %c0 = arith.constant 0 : index
    %c0_0 = arith.constant 0 : index
    %0 = vector.load %arg1[%c0, %c0_0] : memref<64x64xbf16, #tpu.memory_space<vmem>>, vector<64x64xbf16>
    %c0_1 = arith.constant 0 : index
    %c0_2 = arith.constant 0 : index
    %1 = vector.load %arg2[%c0_1, %c0_2] : memref<64x64xbf16, #tpu.memory_space<vmem>>, vector<64x64xbf16>
    %cst = arith.constant dense<0.000000e+00> : vector<64x64xf32>
    %2 = tpu.matmul %0, %1, %cst {dimension_numbers = #tpu.dot_dimension_numbers<[1], [0], [0], [1], [0, 0, 1, 1], [], []>} : vector<64x64xbf16>, vector<64x64xbf16>, vector<64x64xf32> -> vector<64x64xf32>
    %c0_3 = arith.constant 0 : index
    %c0_4 = arith.constant 0 : index
    %3 = vector.load %arg3[%c0_3, %c0_4] : memref<1x64xf32, #tpu.memory_space<vmem>>, vector<1x64xf32>
    %4 = vector.broadcast %3 : vector<1x64xf32> to vector<64x64xf32>
    %5 = arith.addf %2, %4 : vector<64x64xf32>
    %c0_5 = arith.constant 0 : index
    %c0_6 = arith.constant 0 : index
    %6 = vector.load %arg4[%c0_5, %c0_6] : memref<1x64xf32, #tpu.memory_space<vmem>>, vector<1x64xf32>
    %c0_7 = arith.constant 0 : index
    %c0_8 = arith.constant 0 : index
    %7 = vector.load %arg5[%c0_7, %c0_8] : memref<64x64xf32, #tpu.memory_space<vmem>>, vector<64x64xf32>
    %c0_9 = arith.constant 0 : index
    %c0_10 = arith.constant 0 : index
    %8 = vector.load %arg6[%c0_9, %c0_10] : memref<64x64xbf16, #tpu.memory_space<vmem>>, vector<64x64xbf16>
    %9 = arith.extf %8 : vector<64x64xbf16> to vector<64x64xf32>
    %10 = vector.broadcast %6 : vector<1x64xf32> to vector<64x64xf32>
    %11 = arith.mulf %7, %10 : vector<64x64xf32>
    %cst_11 = arith.constant 1.000000e+00 : f32
    %12 = vector.broadcast %cst_11 : f32 to vector<64x64xf32>
    %13 = arith.subf %12, %9 : vector<64x64xf32>
    %14 = arith.mulf %11, %13 : vector<64x64xf32>
    %cst_12 = arith.constant 1.000000e+00 : f32
    %15 = vector.broadcast %cst_12 : f32 to vector<1x64xf32>
    %16 = arith.subf %15, %6 : vector<1x64xf32>
    %cst_13 = arith.constant 1.000000e+00 : f32
    %17 = vector.broadcast %cst_13 : f32 to vector<1x64xf32>
    %18 = arith.mulf %16, %17 : vector<1x64xf32>
    %19 = vector.broadcast %18 : vector<1x64xf32> to vector<64x64xf32>
    %20 = arith.mulf %19, %5 : vector<64x64xf32>
    %21 = arith.addf %14, %20 : vector<64x64xf32>
    %cst_14 = arith.constant 1.000000e-01 : f32
    %22 = vector.broadcast %cst_14 : f32 to vector<64x64xf32>
    %23 = arith.cmpf ogt, %21, %22 : vector<64x64xf32>
    %c0_15 = arith.constant 0 : index
    %c0_16 = arith.constant 0 : index
    %24 = vector.load %arg7[%c0_15, %c0_16] : memref<64x64xf32, #tpu.memory_space<vmem>>, vector<64x64xf32>
    tpu.vector_store %arg7[%c0_15, %c0_16], %21 {strides = array<i32>} : memref<64x64xf32, #tpu.memory_space<vmem>>, vector<64x64xf32>,
    %25 = arith.extui %23 : vector<64x64xi1> to vector<64x64xi32>
    %26 = arith.sitofp %25 : vector<64x64xi32> to vector<64x64xf32>
    %27 = arith.truncf %26 : vector<64x64xf32> to vector<64x64xbf16>
    %c0_17 = arith.constant 0 : index
    %c0_18 = arith.constant 0 : index
    %28 = vector.load %arg8[%c0_17, %c0_18] : memref<64x64xbf16, #tpu.memory_space<vmem>>, vector<64x64xbf16>
    tpu.vector_store %arg8[%c0_17, %c0_18], %27 {strides = array<i32>} : memref<64x64xbf16, #tpu.memory_space<vmem>>, vector<64x64xbf16>,
    return
  }
  func.func @transform_0(%arg0: i32) -> (i32, i32) {
    %c0_i32 = arith.constant 0 : i32
    %c0_i32_0 = arith.constant 0 : i32
    return %arg0, %c0_i32 : i32, i32
  }
  func.func @transform_1(%arg0: i32) -> (i32, i32) {
    %c0_i32 = arith.constant 0 : i32
    %c0_i32_0 = arith.constant 0 : i32
    %c0_i32_1 = arith.constant 0 : i32
    return %c0_i32, %c0_i32_0 : i32, i32
  }
  func.func @transform_2(%arg0: i32) -> (i32, i32) {
    %c0_i32 = arith.constant 0 : i32
    %c0_i32_0 = arith.constant 0 : i32
    %c0_i32_1 = arith.constant 0 : i32
    return %c0_i32, %c0_i32_0 : i32, i32
  }
  func.func @transform_3(%arg0: i32) -> (i32, i32) {
    %c0_i32 = arith.constant 0 : i32
    %c0_i32_0 = arith.constant 0 : i32
    %c0_i32_1 = arith.constant 0 : i32
    return %c0_i32, %c0_i32_0 : i32, i32
  }
  func.func @transform_4(%arg0: i32) -> (i32, i32) {
    %c0_i32 = arith.constant 0 : i32
    %c0_i32_0 = arith.constant 0 : i32
    return %arg0, %c0_i32 : i32, i32
  }
  func.func @transform_5(%arg0: i32) -> (i32, i32) {
    %c0_i32 = arith.constant 0 : i32
    %c0_i32_0 = arith.constant 0 : i32
    return %arg0, %c0_i32 : i32, i32
  }
  func.func @transform_6(%arg0: i32) -> (i32, i32) {
    %c0_i32 = arith.constant 0 : i32
    %c0_i32_0 = arith.constant 0 : i32
    return %arg0, %c0_i32 : i32, i32
  }
  func.func @transform_7(%arg0: i32) -> (i32, i32) {
    %c0_i32 = arith.constant 0 : i32
    %c0_i32_0 = arith.constant 0 : i32
    return %arg0, %c0_i32 : i32, i32
  }
}

module attributes {stable_mosaic.version = 11 : i64} {
  func.func @_lif_gemm_kernel(%arg0: i32, %arg1: memref<8x128xbf16, #tpu.memory_space<vmem>>, %arg2: memref<128x128xbf16, #tpu.memory_space<vmem>>, %arg3: memref<1x128xf32, #tpu.memory_space<vmem>>, %arg4: memref<1x128xf32, #tpu.memory_space<vmem>>, %arg5: memref<8x128xf32, #tpu.memory_space<vmem>>, %arg6: memref<8x128xbf16, #tpu.memory_space<vmem>>, %arg7: memref<8x128xf32, #tpu.memory_space<vmem>>, %arg8: memref<8x128xbf16, #tpu.memory_space<vmem>>) attributes {dimension_semantics = [#tpu.dimension_semantics<parallel>], iteration_bounds = array<i64: 1>, scalar_prefetch = 0 : i64, scratch_operands = 0 : i64, tpu.core_type = #tpu.core_type<tc>, window_params = [{transform_indices = @transform_0, window_bounds = array<i64: 8, 128>}, {pipeline_mode = #tpu.pipeline_mode<synchronous>, transform_indices = @transform_1, window_bounds = array<i64: 128, 128>}, {pipeline_mode = #tpu.pipeline_mode<synchronous>, transform_indices = @transform_2, window_bounds = array<i64: 1, 128>}, {pipeline_mode = #tpu.pipeline_mode<synchronous>, transform_indices = @transform_3, window_bounds = array<i64: 1, 128>}, {transform_indices = @transform_4, window_bounds = array<i64: 8, 128>}, {transform_indices = @transform_5, window_bounds = array<i64: 8, 128>}, {transform_indices = @transform_6, window_bounds = array<i64: 8, 128>}, {transform_indices = @transform_7, window_bounds = array<i64: 8, 128>}]} {
    %c0 = arith.constant 0 : index
    %c0_0 = arith.constant 0 : index
    %0 = vector.load %arg1[%c0, %c0_0] : memref<8x128xbf16, #tpu.memory_space<vmem>>, vector<8x128xbf16>
    %c0_1 = arith.constant 0 : index
    %c0_2 = arith.constant 0 : index
    %1 = vector.load %arg2[%c0_1, %c0_2] : memref<128x128xbf16, #tpu.memory_space<vmem>>, vector<128x128xbf16>
    %cst = arith.constant dense<0.000000e+00> : vector<8x128xf32>
    %2 = tpu.matmul %0, %1, %cst {dimension_numbers = #tpu.dot_dimension_numbers<[1], [0], [0], [1], [0, 0, 1, 1], [], []>} : vector<8x128xbf16>, vector<128x128xbf16>, vector<8x128xf32> -> vector<8x128xf32>
    %c0_3 = arith.constant 0 : index
    %c0_4 = arith.constant 0 : index
    %3 = vector.load %arg3[%c0_3, %c0_4] : memref<1x128xf32, #tpu.memory_space<vmem>>, vector<1x128xf32>
    %4 = vector.broadcast %3 : vector<1x128xf32> to vector<8x128xf32>
    %5 = arith.addf %2, %4 : vector<8x128xf32>
    %c0_5 = arith.constant 0 : index
    %c0_6 = arith.constant 0 : index
    %6 = vector.load %arg4[%c0_5, %c0_6] : memref<1x128xf32, #tpu.memory_space<vmem>>, vector<1x128xf32>
    %c0_7 = arith.constant 0 : index
    %c0_8 = arith.constant 0 : index
    %7 = vector.load %arg5[%c0_7, %c0_8] : memref<8x128xf32, #tpu.memory_space<vmem>>, vector<8x128xf32>
    %c0_9 = arith.constant 0 : index
    %c0_10 = arith.constant 0 : index
    %8 = vector.load %arg6[%c0_9, %c0_10] : memref<8x128xbf16, #tpu.memory_space<vmem>>, vector<8x128xbf16>
    %9 = arith.extf %8 : vector<8x128xbf16> to vector<8x128xf32>
    %10 = vector.broadcast %6 : vector<1x128xf32> to vector<8x128xf32>
    %11 = arith.mulf %7, %10 : vector<8x128xf32>
    %cst_11 = arith.constant 1.000000e+00 : f32
    %12 = vector.broadcast %cst_11 : f32 to vector<8x128xf32>
    %13 = arith.subf %12, %9 : vector<8x128xf32>
    %14 = arith.mulf %11, %13 : vector<8x128xf32>
    %cst_12 = arith.constant 1.000000e+00 : f32
    %15 = vector.broadcast %cst_12 : f32 to vector<1x128xf32>
    %16 = arith.subf %15, %6 : vector<1x128xf32>
    %cst_13 = arith.constant 1.000000e+00 : f32
    %17 = vector.broadcast %cst_13 : f32 to vector<1x128xf32>
    %18 = arith.mulf %16, %17 : vector<1x128xf32>
    %19 = vector.broadcast %18 : vector<1x128xf32> to vector<8x128xf32>
    %20 = arith.mulf %19, %5 : vector<8x128xf32>
    %21 = arith.addf %14, %20 : vector<8x128xf32>
    %cst_14 = arith.constant 1.000000e-01 : f32
    %22 = vector.broadcast %cst_14 : f32 to vector<8x128xf32>
    %23 = arith.cmpf ogt, %21, %22 : vector<8x128xf32>
    %c0_15 = arith.constant 0 : index
    %c0_16 = arith.constant 0 : index
    %24 = vector.load %arg7[%c0_15, %c0_16] : memref<8x128xf32, #tpu.memory_space<vmem>>, vector<8x128xf32>
    tpu.vector_store %arg7[%c0_15, %c0_16], %21 {strides = array<i32>} : memref<8x128xf32, #tpu.memory_space<vmem>>, vector<8x128xf32>,
    %25 = arith.extui %23 : vector<8x128xi1> to vector<8x128xi32>
    %26 = arith.sitofp %25 : vector<8x128xi32> to vector<8x128xf32>
    %27 = arith.truncf %26 : vector<8x128xf32> to vector<8x128xbf16>
    %c0_17 = arith.constant 0 : index
    %c0_18 = arith.constant 0 : index
    %28 = vector.load %arg8[%c0_17, %c0_18] : memref<8x128xbf16, #tpu.memory_space<vmem>>, vector<8x128xbf16>
    tpu.vector_store %arg8[%c0_17, %c0_18], %27 {strides = array<i32>} : memref<8x128xbf16, #tpu.memory_space<vmem>>, vector<8x128xbf16>,
    return
  }
  func.func @transform_0(%arg0: i32) -> (i32, i32) {
    %c0_i32 = arith.constant 0 : i32
    %c0_i32_0 = arith.constant 0 : i32
    return %arg0, %c0_i32 : i32, i32
  }
  func.func @transform_1(%arg0: i32) -> (i32, i32) {
    %c0_i32 = arith.constant 0 : i32
    %c0_i32_0 = arith.constant 0 : i32
    %c0_i32_1 = arith.constant 0 : i32
    return %c0_i32, %c0_i32_0 : i32, i32
  }
  func.func @transform_2(%arg0: i32) -> (i32, i32) {
    %c0_i32 = arith.constant 0 : i32
    %c0_i32_0 = arith.constant 0 : i32
    %c0_i32_1 = arith.constant 0 : i32
    return %c0_i32, %c0_i32_0 : i32, i32
  }
  func.func @transform_3(%arg0: i32) -> (i32, i32) {
    %c0_i32 = arith.constant 0 : i32
    %c0_i32_0 = arith.constant 0 : i32
    %c0_i32_1 = arith.constant 0 : i32
    return %c0_i32, %c0_i32_0 : i32, i32
  }
  func.func @transform_4(%arg0: i32) -> (i32, i32) {
    %c0_i32 = arith.constant 0 : i32
    %c0_i32_0 = arith.constant 0 : i32
    return %arg0, %c0_i32 : i32, i32
  }
  func.func @transform_5(%arg0: i32) -> (i32, i32) {
    %c0_i32 = arith.constant 0 : i32
    %c0_i32_0 = arith.constant 0 : i32
    return %arg0, %c0_i32 : i32, i32
  }
  func.func @transform_6(%arg0: i32) -> (i32, i32) {
    %c0_i32 = arith.constant 0 : i32
    %c0_i32_0 = arith.constant 0 : i32
    return %arg0, %c0_i32 : i32, i32
  }
  func.func @transform_7(%arg0: i32) -> (i32, i32) {
    %c0_i32 = arith.constant 0 : i32
    %c0_i32_0 = arith.constant 0 : i32
    return %arg0, %c0_i32 : i32, i32
  }
}

module attributes {stable_mosaic.version = 11 : i64} {
  func.func @_lif_dw_s2_kernel(%arg0: i32, %arg1: memref<1x5x5x128xbf16, #tpu.memory_space<vmem>>, %arg2: memref<1x5x5x128xbf16, #tpu.memory_space<vmem>>, %arg3: memref<1x5x5x128xbf16, #tpu.memory_space<vmem>>, %arg4: memref<1x5x5x128xbf16, #tpu.memory_space<vmem>>, %arg5: memref<9x1x128xf32, #tpu.memory_space<vmem>>, %arg6: memref<1x128xf32, #tpu.memory_space<vmem>>, %arg7: memref<1x128xf32, #tpu.memory_space<vmem>>, %arg8: memref<1x4x4x128xf32, #tpu.memory_space<vmem>>, %arg9: memref<1x4x4x128xbf16, #tpu.memory_space<vmem>>, %arg10: memref<1x4x4x128xf32, #tpu.memory_space<vmem>>, %arg11: memref<1x4x4x128xbf16, #tpu.memory_space<vmem>>) attributes {dimension_semantics = [#tpu.dimension_semantics<parallel>], iteration_bounds = array<i64: 2>, scalar_prefetch = 0 : i64, scratch_operands = 0 : i64, tpu.core_type = #tpu.core_type<tc>, window_params = [{transform_indices = @transform_0, window_bounds = array<i64: 1, 5, 5, 128>}, {transform_indices = @transform_1, window_bounds = array<i64: 1, 5, 5, 128>}, {transform_indices = @transform_2, window_bounds = array<i64: 1, 5, 5, 128>}, {transform_indices = @transform_3, window_bounds = array<i64: 1, 5, 5, 128>}, {pipeline_mode = #tpu.pipeline_mode<synchronous>, transform_indices = @transform_4, window_bounds = array<i64: 9, 1, 128>}, {pipeline_mode = #tpu.pipeline_mode<synchronous>, transform_indices = @transform_5, window_bounds = array<i64: 1, 128>}, {pipeline_mode = #tpu.pipeline_mode<synchronous>, transform_indices = @transform_6, window_bounds = array<i64: 1, 128>}, {transform_indices = @transform_7, window_bounds = array<i64: 1, 4, 4, 128>}, {transform_indices = @transform_8, window_bounds = array<i64: 1, 4, 4, 128>}, {transform_indices = @transform_9, window_bounds = array<i64: 1, 4, 4, 128>}, {transform_indices = @transform_10, window_bounds = array<i64: 1, 4, 4, 128>}]} {
    %c0 = arith.constant 0 : index
    %c0_0 = arith.constant 0 : index
    %c0_1 = arith.constant 0 : index
    %c0_2 = arith.constant 0 : index
    %0 = vector.load %arg1[%c0, %c0_0, %c0_1, %c0_2] : memref<1x5x5x128xbf16, #tpu.memory_space<vmem>>, vector<1x4x4x128xbf16>
    %1 = vector.shape_cast %0 : vector<1x4x4x128xbf16> to vector<4x4x128xbf16>
    %c0_3 = arith.constant 0 : index
    %c0_4 = arith.constant 0 : index
    %c0_5 = arith.constant 0 : index
    %2 = vector.load %arg5[%c0_3, %c0_4, %c0_5] : memref<9x1x128xf32, #tpu.memory_space<vmem>>, vector<1x1x128xf32>
    %3 = vector.shape_cast %2 : vector<1x1x128xf32> to vector<1x128xf32>
    %4 = arith.extf %1 : vector<4x4x128xbf16> to vector<4x4x128xf32>
    %5 = vector.shape_cast %3 : vector<1x128xf32> to vector<1x1x128xf32>
    %6 = vector.broadcast %5 : vector<1x1x128xf32> to vector<4x4x128xf32>
    %7 = arith.mulf %4, %6 : vector<4x4x128xf32>
    %c0_6 = arith.constant 0 : index
    %c0_7 = arith.constant 0 : index
    %c0_8 = arith.constant 0 : index
    %c0_9 = arith.constant 0 : index
    %8 = vector.load %arg2[%c0_6, %c0_7, %c0_8, %c0_9] : memref<1x5x5x128xbf16, #tpu.memory_space<vmem>>, vector<1x4x4x128xbf16>
    %9 = vector.shape_cast %8 : vector<1x4x4x128xbf16> to vector<4x4x128xbf16>
    %c1 = arith.constant 1 : index
    %c0_10 = arith.constant 0 : index
    %c0_11 = arith.constant 0 : index
    %10 = vector.load %arg5[%c1, %c0_10, %c0_11] : memref<9x1x128xf32, #tpu.memory_space<vmem>>, vector<1x1x128xf32>
    %11 = vector.shape_cast %10 : vector<1x1x128xf32> to vector<1x128xf32>
    %12 = arith.extf %9 : vector<4x4x128xbf16> to vector<4x4x128xf32>
    %13 = vector.shape_cast %11 : vector<1x128xf32> to vector<1x1x128xf32>
    %14 = vector.broadcast %13 : vector<1x1x128xf32> to vector<4x4x128xf32>
    %15 = arith.mulf %12, %14 : vector<4x4x128xf32>
    %16 = arith.addf %7, %15 : vector<4x4x128xf32>
    %c0_12 = arith.constant 0 : index
    %c0_13 = arith.constant 0 : index
    %c1_14 = arith.constant 1 : index
    %c0_15 = arith.constant 0 : index
    %17 = vector.load %arg1[%c0_12, %c0_13, %c1_14, %c0_15] : memref<1x5x5x128xbf16, #tpu.memory_space<vmem>>, vector<1x4x4x128xbf16>
    %18 = vector.shape_cast %17 : vector<1x4x4x128xbf16> to vector<4x4x128xbf16>
    %c2 = arith.constant 2 : index
    %c0_16 = arith.constant 0 : index
    %c0_17 = arith.constant 0 : index
    %19 = vector.load %arg5[%c2, %c0_16, %c0_17] : memref<9x1x128xf32, #tpu.memory_space<vmem>>, vector<1x1x128xf32>
    %20 = vector.shape_cast %19 : vector<1x1x128xf32> to vector<1x128xf32>
    %21 = arith.extf %18 : vector<4x4x128xbf16> to vector<4x4x128xf32>
    %22 = vector.shape_cast %20 : vector<1x128xf32> to vector<1x1x128xf32>
    %23 = vector.broadcast %22 : vector<1x1x128xf32> to vector<4x4x128xf32>
    %24 = arith.mulf %21, %23 : vector<4x4x128xf32>
    %25 = arith.addf %16, %24 : vector<4x4x128xf32>
    %c0_18 = arith.constant 0 : index
    %c0_19 = arith.constant 0 : index
    %c0_20 = arith.constant 0 : index
    %c0_21 = arith.constant 0 : index
    %26 = vector.load %arg3[%c0_18, %c0_19, %c0_20, %c0_21] : memref<1x5x5x128xbf16, #tpu.memory_space<vmem>>, vector<1x4x4x128xbf16>
    %27 = vector.shape_cast %26 : vector<1x4x4x128xbf16> to vector<4x4x128xbf16>
    %c3 = arith.constant 3 : index
    %c0_22 = arith.constant 0 : index
    %c0_23 = arith.constant 0 : index
    %28 = vector.load %arg5[%c3, %c0_22, %c0_23] : memref<9x1x128xf32, #tpu.memory_space<vmem>>, vector<1x1x128xf32>
    %29 = vector.shape_cast %28 : vector<1x1x128xf32> to vector<1x128xf32>
    %30 = arith.extf %27 : vector<4x4x128xbf16> to vector<4x4x128xf32>
    %31 = vector.shape_cast %29 : vector<1x128xf32> to vector<1x1x128xf32>
    %32 = vector.broadcast %31 : vector<1x1x128xf32> to vector<4x4x128xf32>
    %33 = arith.mulf %30, %32 : vector<4x4x128xf32>
    %34 = arith.addf %25, %33 : vector<4x4x128xf32>
    %c0_24 = arith.constant 0 : index
    %c0_25 = arith.constant 0 : index
    %c0_26 = arith.constant 0 : index
    %c0_27 = arith.constant 0 : index
    %35 = vector.load %arg4[%c0_24, %c0_25, %c0_26, %c0_27] : memref<1x5x5x128xbf16, #tpu.memory_space<vmem>>, vector<1x4x4x128xbf16>
    %36 = vector.shape_cast %35 : vector<1x4x4x128xbf16> to vector<4x4x128xbf16>
    %c4 = arith.constant 4 : index
    %c0_28 = arith.constant 0 : index
    %c0_29 = arith.constant 0 : index
    %37 = vector.load %arg5[%c4, %c0_28, %c0_29] : memref<9x1x128xf32, #tpu.memory_space<vmem>>, vector<1x1x128xf32>
    %38 = vector.shape_cast %37 : vector<1x1x128xf32> to vector<1x128xf32>
    %39 = arith.extf %36 : vector<4x4x128xbf16> to vector<4x4x128xf32>
    %40 = vector.shape_cast %38 : vector<1x128xf32> to vector<1x1x128xf32>
    %41 = vector.broadcast %40 : vector<1x1x128xf32> to vector<4x4x128xf32>
    %42 = arith.mulf %39, %41 : vector<4x4x128xf32>
    %43 = arith.addf %34, %42 : vector<4x4x128xf32>
    %c0_30 = arith.constant 0 : index
    %c0_31 = arith.constant 0 : index
    %c1_32 = arith.constant 1 : index
    %c0_33 = arith.constant 0 : index
    %44 = vector.load %arg3[%c0_30, %c0_31, %c1_32, %c0_33] : memref<1x5x5x128xbf16, #tpu.memory_space<vmem>>, vector<1x4x4x128xbf16>
    %45 = vector.shape_cast %44 : vector<1x4x4x128xbf16> to vector<4x4x128xbf16>
    %c5 = arith.constant 5 : index
    %c0_34 = arith.constant 0 : index
    %c0_35 = arith.constant 0 : index
    %46 = vector.load %arg5[%c5, %c0_34, %c0_35] : memref<9x1x128xf32, #tpu.memory_space<vmem>>, vector<1x1x128xf32>
    %47 = vector.shape_cast %46 : vector<1x1x128xf32> to vector<1x128xf32>
    %48 = arith.extf %45 : vector<4x4x128xbf16> to vector<4x4x128xf32>
    %49 = vector.shape_cast %47 : vector<1x128xf32> to vector<1x1x128xf32>
    %50 = vector.broadcast %49 : vector<1x1x128xf32> to vector<4x4x128xf32>
    %51 = arith.mulf %48, %50 : vector<4x4x128xf32>
    %52 = arith.addf %43, %51 : vector<4x4x128xf32>
    %c0_36 = arith.constant 0 : index
    %c1_37 = arith.constant 1 : index
    %c0_38 = arith.constant 0 : index
    %c0_39 = arith.constant 0 : index
    %53 = vector.load %arg1[%c0_36, %c1_37, %c0_38, %c0_39] : memref<1x5x5x128xbf16, #tpu.memory_space<vmem>>, vector<1x4x4x128xbf16>
    %54 = vector.shape_cast %53 : vector<1x4x4x128xbf16> to vector<4x4x128xbf16>
    %c6 = arith.constant 6 : index
    %c0_40 = arith.constant 0 : index
    %c0_41 = arith.constant 0 : index
    %55 = vector.load %arg5[%c6, %c0_40, %c0_41] : memref<9x1x128xf32, #tpu.memory_space<vmem>>, vector<1x1x128xf32>
    %56 = vector.shape_cast %55 : vector<1x1x128xf32> to vector<1x128xf32>
    %57 = arith.extf %54 : vector<4x4x128xbf16> to vector<4x4x128xf32>
    %58 = vector.shape_cast %56 : vector<1x128xf32> to vector<1x1x128xf32>
    %59 = vector.broadcast %58 : vector<1x1x128xf32> to vector<4x4x128xf32>
    %60 = arith.mulf %57, %59 : vector<4x4x128xf32>
    %61 = arith.addf %52, %60 : vector<4x4x128xf32>
    %c0_42 = arith.constant 0 : index
    %c1_43 = arith.constant 1 : index
    %c0_44 = arith.constant 0 : index
    %c0_45 = arith.constant 0 : index
    %62 = vector.load %arg2[%c0_42, %c1_43, %c0_44, %c0_45] : memref<1x5x5x128xbf16, #tpu.memory_space<vmem>>, vector<1x4x4x128xbf16>
    %63 = vector.shape_cast %62 : vector<1x4x4x128xbf16> to vector<4x4x128xbf16>
    %c7 = arith.constant 7 : index
    %c0_46 = arith.constant 0 : index
    %c0_47 = arith.constant 0 : index
    %64 = vector.load %arg5[%c7, %c0_46, %c0_47] : memref<9x1x128xf32, #tpu.memory_space<vmem>>, vector<1x1x128xf32>
    %65 = vector.shape_cast %64 : vector<1x1x128xf32> to vector<1x128xf32>
    %66 = arith.extf %63 : vector<4x4x128xbf16> to vector<4x4x128xf32>
    %67 = vector.shape_cast %65 : vector<1x128xf32> to vector<1x1x128xf32>
    %68 = vector.broadcast %67 : vector<1x1x128xf32> to vector<4x4x128xf32>
    %69 = arith.mulf %66, %68 : vector<4x4x128xf32>
    %70 = arith.addf %61, %69 : vector<4x4x128xf32>
    %c0_48 = arith.constant 0 : index
    %c1_49 = arith.constant 1 : index
    %c1_50 = arith.constant 1 : index
    %c0_51 = arith.constant 0 : index
    %71 = vector.load %arg1[%c0_48, %c1_49, %c1_50, %c0_51] : memref<1x5x5x128xbf16, #tpu.memory_space<vmem>>, vector<1x4x4x128xbf16>
    %72 = vector.shape_cast %71 : vector<1x4x4x128xbf16> to vector<4x4x128xbf16>
    %c8 = arith.constant 8 : index
    %c0_52 = arith.constant 0 : index
    %c0_53 = arith.constant 0 : index
    %73 = vector.load %arg5[%c8, %c0_52, %c0_53] : memref<9x1x128xf32, #tpu.memory_space<vmem>>, vector<1x1x128xf32>
    %74 = vector.shape_cast %73 : vector<1x1x128xf32> to vector<1x128xf32>
    %75 = arith.extf %72 : vector<4x4x128xbf16> to vector<4x4x128xf32>
    %76 = vector.shape_cast %74 : vector<1x128xf32> to vector<1x1x128xf32>
    %77 = vector.broadcast %76 : vector<1x1x128xf32> to vector<4x4x128xf32>
    %78 = arith.mulf %75, %77 : vector<4x4x128xf32>
    %79 = arith.addf %70, %78 : vector<4x4x128xf32>
    %c0_54 = arith.constant 0 : index
    %c0_55 = arith.constant 0 : index
    %80 = vector.load %arg6[%c0_54, %c0_55] : memref<1x128xf32, #tpu.memory_space<vmem>>, vector<1x128xf32>
    %81 = vector.shape_cast %80 : vector<1x128xf32> to vector<1x1x128xf32>
    %82 = vector.broadcast %81 : vector<1x1x128xf32> to vector<4x4x128xf32>
    %83 = arith.addf %79, %82 : vector<4x4x128xf32>
    %c0_56 = arith.constant 0 : index
    %c0_57 = arith.constant 0 : index
    %84 = vector.load %arg7[%c0_56, %c0_57] : memref<1x128xf32, #tpu.memory_space<vmem>>, vector<1x128xf32>
    %c0_58 = arith.constant 0 : index
    %c0_59 = arith.constant 0 : index
    %c0_60 = arith.constant 0 : index
    %c0_61 = arith.constant 0 : index
    %85 = vector.load %arg8[%c0_58, %c0_59, %c0_60, %c0_61] : memref<1x4x4x128xf32, #tpu.memory_space<vmem>>, vector<1x4x4x128xf32>
    %86 = vector.shape_cast %85 : vector<1x4x4x128xf32> to vector<4x4x128xf32>
    %c0_62 = arith.constant 0 : index
    %c0_63 = arith.constant 0 : index
    %c0_64 = arith.constant 0 : index
    %c0_65 = arith.constant 0 : index
    %87 = vector.load %arg9[%c0_62, %c0_63, %c0_64, %c0_65] : memref<1x4x4x128xbf16, #tpu.memory_space<vmem>>, vector<1x4x4x128xbf16>
    %88 = vector.shape_cast %87 : vector<1x4x4x128xbf16> to vector<4x4x128xbf16>
    %89 = arith.extf %88 : vector<4x4x128xbf16> to vector<4x4x128xf32>
    %90 = vector.shape_cast %84 : vector<1x128xf32> to vector<1x1x128xf32>
    %91 = vector.broadcast %90 : vector<1x1x128xf32> to vector<4x4x128xf32>
    %92 = arith.mulf %86, %91 : vector<4x4x128xf32>
    %cst = arith.constant 1.000000e+00 : f32
    %93 = vector.broadcast %cst : f32 to vector<4x4x128xf32>
    %94 = arith.subf %93, %89 : vector<4x4x128xf32>
    %95 = arith.mulf %92, %94 : vector<4x4x128xf32>
    %cst_66 = arith.constant 1.000000e+00 : f32
    %96 = vector.broadcast %cst_66 : f32 to vector<1x128xf32>
    %97 = arith.subf %96, %84 : vector<1x128xf32>
    %cst_67 = arith.constant 1.000000e+00 : f32
    %98 = vector.broadcast %cst_67 : f32 to vector<1x128xf32>
    %99 = arith.mulf %97, %98 : vector<1x128xf32>
    %100 = vector.shape_cast %99 : vector<1x128xf32> to vector<1x1x128xf32>
    %101 = vector.broadcast %100 : vector<1x1x128xf32> to vector<4x4x128xf32>
    %102 = arith.mulf %101, %83 : vector<4x4x128xf32>
    %103 = arith.addf %95, %102 : vector<4x4x128xf32>
    %cst_68 = arith.constant 1.000000e-01 : f32
    %104 = vector.broadcast %cst_68 : f32 to vector<4x4x128xf32>
    %105 = arith.cmpf ogt, %103, %104 : vector<4x4x128xf32>
    %c0_69 = arith.constant 0 : index
    %c0_70 = arith.constant 0 : index
    %c0_71 = arith.constant 0 : index
    %c0_72 = arith.constant 0 : index
    %106 = vector.load %arg10[%c0_69, %c0_70, %c0_71, %c0_72] : memref<1x4x4x128xf32, #tpu.memory_space<vmem>>, vector<1x4x4x128xf32>
    %107 = vector.shape_cast %106 : vector<1x4x4x128xf32> to vector<4x4x128xf32>
    %108 = vector.shape_cast %103 : vector<4x4x128xf32> to vector<1x4x4x128xf32>
    tpu.vector_store %arg10[%c0_69, %c0_70, %c0_71, %c0_72], %108 {strides = array<i32>} : memref<1x4x4x128xf32, #tpu.memory_space<vmem>>, vector<1x4x4x128xf32>,
    %109 = arith.extui %105 : vector<4x4x128xi1> to vector<4x4x128xi32>
    %110 = arith.sitofp %109 : vector<4x4x128xi32> to vector<4x4x128xf32>
    %111 = arith.truncf %110 : vector<4x4x128xf32> to vector<4x4x128xbf16>
    %c0_73 = arith.constant 0 : index
    %c0_74 = arith.constant 0 : index
    %c0_75 = arith.constant 0 : index
    %c0_76 = arith.constant 0 : index
    %112 = vector.load %arg11[%c0_73, %c0_74, %c0_75, %c0_76] : memref<1x4x4x128xbf16, #tpu.memory_space<vmem>>, vector<1x4x4x128xbf16>
    %113 = vector.shape_cast %112 : vector<1x4x4x128xbf16> to vector<4x4x128xbf16>
    %114 = vector.shape_cast %111 : vector<4x4x128xbf16> to vector<1x4x4x128xbf16>
    tpu.vector_store %arg11[%c0_73, %c0_74, %c0_75, %c0_76], %114 {strides = array<i32>} : memref<1x4x4x128xbf16, #tpu.memory_space<vmem>>, vector<1x4x4x128xbf16>,
    return
  }
  func.func @transform_0(%arg0: i32) -> (i32, i32, i32, i32) {
    %c0_i32 = arith.constant 0 : i32
    %c0_i32_0 = arith.constant 0 : i32
    %c0_i32_1 = arith.constant 0 : i32
    %c0_i32_2 = arith.constant 0 : i32
    return %arg0, %c0_i32, %c0_i32_0, %c0_i32_1 : i32, i32, i32, i32
  }
  func.func @transform_1(%arg0: i32) -> (i32, i32, i32, i32) {
    %c0_i32 = arith.constant 0 : i32
    %c0_i32_0 = arith.constant 0 : i32
    %c0_i32_1 = arith.constant 0 : i32
    %c0_i32_2 = arith.constant 0 : i32
    return %arg0, %c0_i32, %c0_i32_0, %c0_i32_1 : i32, i32, i32, i32
  }
  func.func @transform_2(%arg0: i32) -> (i32, i32, i32, i32) {
    %c0_i32 = arith.constant 0 : i32
    %c0_i32_0 = arith.constant 0 : i32
    %c0_i32_1 = arith.constant 0 : i32
    %c0_i32_2 = arith.constant 0 : i32
    return %arg0, %c0_i32, %c0_i32_0, %c0_i32_1 : i32, i32, i32, i32
  }
  func.func @transform_3(%arg0: i32) -> (i32, i32, i32, i32) {
    %c0_i32 = arith.constant 0 : i32
    %c0_i32_0 = arith.constant 0 : i32
    %c0_i32_1 = arith.constant 0 : i32
    %c0_i32_2 = arith.constant 0 : i32
    return %arg0, %c0_i32, %c0_i32_0, %c0_i32_1 : i32, i32, i32, i32
  }
  func.func @transform_4(%arg0: i32) -> (i32, i32, i32) {
    %c0_i32 = arith.constant 0 : i32
    %c0_i32_0 = arith.constant 0 : i32
    %c0_i32_1 = arith.constant 0 : i32
    %c0_i32_2 = arith.constant 0 : i32
    return %c0_i32, %c0_i32_0, %c0_i32_1 : i32, i32, i32
  }
  func.func @transform_5(%arg0: i32) -> (i32, i32) {
    %c0_i32 = arith.constant 0 : i32
    %c0_i32_0 = arith.constant 0 : i32
    %c0_i32_1 = arith.constant 0 : i32
    return %c0_i32, %c0_i32_0 : i32, i32
  }
  func.func @transform_6(%arg0: i32) -> (i32, i32) {
    %c0_i32 = arith.constant 0 : i32
    %c0_i32_0 = arith.constant 0 : i32
    %c0_i32_1 = arith.constant 0 : i32
    return %c0_i32, %c0_i32_0 : i32, i32
  }
  func.func @transform_7(%arg0: i32) -> (i32, i32, i32, i32) {
    %c0_i32 = arith.constant 0 : i32
    %c0_i32_0 = arith.constant 0 : i32
    %c0_i32_1 = arith.constant 0 : i32
    %c0_i32_2 = arith.constant 0 : i32
    return %arg0, %c0_i32, %c0_i32_0, %c0_i32_1 : i32, i32, i32, i32
  }
  func.func @transform_8(%arg0: i32) -> (i32, i32, i32, i32) {
    %c0_i32 = arith.constant 0 : i32
    %c0_i32_0 = arith.constant 0 : i32
    %c0_i32_1 = arith.constant 0 : i32
    %c0_i32_2 = arith.constant 0 : i32
    return %arg0, %c0_i32, %c0_i32_0, %c0_i32_1 : i32, i32, i32, i32
  }
  func.func @transform_9(%arg0: i32) -> (i32, i32, i32, i32) {
    %c0_i32 = arith.constant 0 : i32
    %c0_i32_0 = arith.constant 0 : i32
    %c0_i32_1 = arith.constant 0 : i32
    %c0_i32_2 = arith.constant 0 : i32
    return %arg0, %c0_i32, %c0_i32_0, %c0_i32_1 : i32, i32, i32, i32
  }
  func.func @transform_10(%arg0: i32) -> (i32, i32, i32, i32) {
    %c0_i32 = arith.constant 0 : i32
    %c0_i32_0 = arith.constant 0 : i32
    %c0_i32_1 = arith.constant 0 : i32
    %c0_i32_2 = arith.constant 0 : i32
    return %arg0, %c0_i32, %c0_i32_0, %c0_i32_1 : i32, i32, i32, i32
  }
}

module attributes {stable_mosaic.version = 11 : i64} {
  func.func @_fc_readout_kernel(%arg0: i32, %arg1: memref<2x512xbf16, #tpu.memory_space<vmem>>, %arg2: memref<512x32xbf16, #tpu.memory_space<vmem>>, %arg3: memref<32x32xbf16, #tpu.memory_space<vmem>>, %arg4: memref<1x32xf32, #tpu.memory_space<vmem>>, %arg5: memref<1x32xf32, #tpu.memory_space<vmem>>, %arg6: memref<2x32xf32, #tpu.memory_space<vmem>>, %arg7: memref<2x32xbf16, #tpu.memory_space<vmem>>, %arg8: memref<32x10xbf16, #tpu.memory_space<vmem>>, %arg9: memref<1x10xf32, #tpu.memory_space<vmem>>, %arg10: memref<1x10xf32, #tpu.memory_space<vmem>>, %arg11: memref<2x10xf32, #tpu.memory_space<vmem>>, %arg12: memref<2x32xf32, #tpu.memory_space<vmem>>, %arg13: memref<2x32xbf16, #tpu.memory_space<vmem>>, %arg14: memref<2x10xf32, #tpu.memory_space<vmem>>, %arg15: memref<2x10xf32, #tpu.memory_space<vmem>>) attributes {dimension_semantics = [#tpu.dimension_semantics<arbitrary>], iteration_bounds = array<i64: 1>, scalar_prefetch = 0 : i64, scratch_operands = 0 : i64, tpu.core_type = #tpu.core_type<tc>, window_params = [{pipeline_mode = #tpu.pipeline_mode<synchronous>, transform_indices = @transform_0, window_bounds = array<i64: 2, 512>}, {pipeline_mode = #tpu.pipeline_mode<synchronous>, transform_indices = @transform_1, window_bounds = array<i64: 512, 32>}, {pipeline_mode = #tpu.pipeline_mode<synchronous>, transform_indices = @transform_2, window_bounds = array<i64: 32, 32>}, {pipeline_mode = #tpu.pipeline_mode<synchronous>, transform_indices = @transform_3, window_bounds = array<i64: 1, 32>}, {pipeline_mode = #tpu.pipeline_mode<synchronous>, transform_indices = @transform_4, window_bounds = array<i64: 1, 32>}, {pipeline_mode = #tpu.pipeline_mode<synchronous>, transform_indices = @transform_5, window_bounds = array<i64: 2, 32>}, {pipeline_mode = #tpu.pipeline_mode<synchronous>, transform_indices = @transform_6, window_bounds = array<i64: 2, 32>}, {pipeline_mode = #tpu.pipeline_mode<synchronous>, transform_indices = @transform_7, window_bounds = array<i64: 32, 10>}, {pipeline_mode = #tpu.pipeline_mode<synchronous>, transform_indices = @transform_8, window_bounds = array<i64: 1, 10>}, {pipeline_mode = #tpu.pipeline_mode<synchronous>, transform_indices = @transform_9, window_bounds = array<i64: 1, 10>}, {pipeline_mode = #tpu.pipeline_mode<synchronous>, transform_indices = @transform_10, window_bounds = array<i64: 2, 10>}, {pipeline_mode = #tpu.pipeline_mode<synchronous>, transform_indices = @transform_11, window_bounds = array<i64: 2, 32>}, {pipeline_mode = #tpu.pipeline_mode<synchronous>, transform_indices = @transform_12, window_bounds = array<i64: 2, 32>}, {pipeline_mode = #tpu.pipeline_mode<synchronous>, transform_indices = @transform_13, window_bounds = array<i64: 2, 10>}, {pipeline_mode = #tpu.pipeline_mode<synchronous>, transform_indices = @transform_14, window_bounds = array<i64: 2, 10>}]} {
    %c0 = arith.constant 0 : index
    %c0_0 = arith.constant 0 : index
    %0 = vector.load %arg1[%c0, %c0_0] : memref<2x512xbf16, #tpu.memory_space<vmem>>, vector<2x512xbf16>
    %c0_1 = arith.constant 0 : index
    %c0_2 = arith.constant 0 : index
    %1 = vector.load %arg2[%c0_1, %c0_2] : memref<512x32xbf16, #tpu.memory_space<vmem>>, vector<512x32xbf16>
    %cst = arith.constant dense<0.000000e+00> : vector<2x32xf32>
    %2 = tpu.matmul %0, %1, %cst {dimension_numbers = #tpu.dot_dimension_numbers<[1], [0], [0], [1], [0, 0, 1, 1], [], []>} : vector<2x512xbf16>, vector<512x32xbf16>, vector<2x32xf32> -> vector<2x32xf32>
    %c0_3 = arith.constant 0 : index
    %c0_4 = arith.constant 0 : index
    %3 = vector.load %arg7[%c0_3, %c0_4] : memref<2x32xbf16, #tpu.memory_space<vmem>>, vector<2x32xbf16>
    %c0_5 = arith.constant 0 : index
    %c0_6 = arith.constant 0 : index
    %4 = vector.load %arg3[%c0_5, %c0_6] : memref<32x32xbf16, #tpu.memory_space<vmem>>, vector<32x32xbf16>
    %cst_7 = arith.constant dense<0.000000e+00> : vector<2x32xf32>
    %5 = tpu.matmul %3, %4, %cst_7 {dimension_numbers = #tpu.dot_dimension_numbers<[1], [0], [0], [1], [0, 0, 1, 1], [], []>} : vector<2x32xbf16>, vector<32x32xbf16>, vector<2x32xf32> -> vector<2x32xf32>
    %6 = arith.addf %2, %5 : vector<2x32xf32>
    %c0_8 = arith.constant 0 : index
    %c0_9 = arith.constant 0 : index
    %7 = vector.load %arg4[%c0_8, %c0_9] : memref<1x32xf32, #tpu.memory_space<vmem>>, vector<1x32xf32>
    %8 = vector.broadcast %7 : vector<1x32xf32> to vector<2x32xf32>
    %9 = arith.addf %6, %8 : vector<2x32xf32>
    %c0_10 = arith.constant 0 : index
    %c0_11 = arith.constant 0 : index
    %10 = vector.load %arg5[%c0_10, %c0_11] : memref<1x32xf32, #tpu.memory_space<vmem>>, vector<1x32xf32>
    %c0_12 = arith.constant 0 : index
    %c0_13 = arith.constant 0 : index
    %11 = vector.load %arg6[%c0_12, %c0_13] : memref<2x32xf32, #tpu.memory_space<vmem>>, vector<2x32xf32>
    %c0_14 = arith.constant 0 : index
    %c0_15 = arith.constant 0 : index
    %12 = vector.load %arg7[%c0_14, %c0_15] : memref<2x32xbf16, #tpu.memory_space<vmem>>, vector<2x32xbf16>
    %13 = arith.extf %12 : vector<2x32xbf16> to vector<2x32xf32>
    %14 = vector.broadcast %10 : vector<1x32xf32> to vector<2x32xf32>
    %15 = arith.mulf %11, %14 : vector<2x32xf32>
    %cst_16 = arith.constant 1.000000e+00 : f32
    %16 = vector.broadcast %cst_16 : f32 to vector<2x32xf32>
    %17 = arith.subf %16, %13 : vector<2x32xf32>
    %18 = arith.mulf %15, %17 : vector<2x32xf32>
    %cst_17 = arith.constant 1.000000e+00 : f32
    %19 = vector.broadcast %cst_17 : f32 to vector<1x32xf32>
    %20 = arith.subf %19, %10 : vector<1x32xf32>
    %cst_18 = arith.constant 1.000000e+00 : f32
    %21 = vector.broadcast %cst_18 : f32 to vector<1x32xf32>
    %22 = arith.mulf %20, %21 : vector<1x32xf32>
    %23 = vector.broadcast %22 : vector<1x32xf32> to vector<2x32xf32>
    %24 = arith.mulf %23, %9 : vector<2x32xf32>
    %25 = arith.addf %18, %24 : vector<2x32xf32>
    %cst_19 = arith.constant 1.000000e-01 : f32
    %26 = vector.broadcast %cst_19 : f32 to vector<2x32xf32>
    %27 = arith.cmpf ogt, %25, %26 : vector<2x32xf32>
    %28 = arith.extui %27 : vector<2x32xi1> to vector<2x32xi32>
    %29 = arith.sitofp %28 : vector<2x32xi32> to vector<2x32xf32>
    %30 = arith.truncf %29 : vector<2x32xf32> to vector<2x32xbf16>
    %c0_20 = arith.constant 0 : index
    %c0_21 = arith.constant 0 : index
    %31 = vector.load %arg12[%c0_20, %c0_21] : memref<2x32xf32, #tpu.memory_space<vmem>>, vector<2x32xf32>
    tpu.vector_store %arg12[%c0_20, %c0_21], %25 {strides = array<i32>} : memref<2x32xf32, #tpu.memory_space<vmem>>, vector<2x32xf32>,
    %c0_22 = arith.constant 0 : index
    %c0_23 = arith.constant 0 : index
    %32 = vector.load %arg13[%c0_22, %c0_23] : memref<2x32xbf16, #tpu.memory_space<vmem>>, vector<2x32xbf16>
    tpu.vector_store %arg13[%c0_22, %c0_23], %30 {strides = array<i32>} : memref<2x32xbf16, #tpu.memory_space<vmem>>, vector<2x32xbf16>,
    %c0_24 = arith.constant 0 : index
    %c0_25 = arith.constant 0 : index
    %33 = vector.load %arg8[%c0_24, %c0_25] : memref<32x10xbf16, #tpu.memory_space<vmem>>, vector<32x10xbf16>
    %cst_26 = arith.constant dense<0.000000e+00> : vector<2x10xf32>
    %34 = tpu.matmul %30, %33, %cst_26 {dimension_numbers = #tpu.dot_dimension_numbers<[1], [0], [0], [1], [0, 0, 1, 1], [], []>} : vector<2x32xbf16>, vector<32x10xbf16>, vector<2x10xf32> -> vector<2x10xf32>
    %c0_27 = arith.constant 0 : index
    %c0_28 = arith.constant 0 : index
    %35 = vector.load %arg9[%c0_27, %c0_28] : memref<1x10xf32, #tpu.memory_space<vmem>>, vector<1x10xf32>
    %36 = vector.broadcast %35 : vector<1x10xf32> to vector<2x10xf32>
    %37 = arith.addf %34, %36 : vector<2x10xf32>
    %c0_29 = arith.constant 0 : index
    %c0_30 = arith.constant 0 : index
    %38 = vector.load %arg11[%c0_29, %c0_30] : memref<2x10xf32, #tpu.memory_space<vmem>>, vector<2x10xf32>
    %39 = arith.subf %37, %38 : vector<2x10xf32>
    %c0_31 = arith.constant 0 : index
    %c0_32 = arith.constant 0 : index
    %40 = vector.load %arg10[%c0_31, %c0_32] : memref<1x10xf32, #tpu.memory_space<vmem>>, vector<1x10xf32>
    %41 = vector.broadcast %40 : vector<1x10xf32> to vector<2x10xf32>
    %42 = arith.mulf %39, %41 : vector<2x10xf32>
    %43 = arith.addf %38, %42 : vector<2x10xf32>
    %c0_33 = arith.constant 0 : index
    %c0_34 = arith.constant 0 : index
    %44 = vector.load %arg14[%c0_33, %c0_34] : memref<2x10xf32, #tpu.memory_space<vmem>>, vector<2x10xf32>
    tpu.vector_store %arg14[%c0_33, %c0_34], %43 {strides = array<i32>} : memref<2x10xf32, #tpu.memory_space<vmem>>, vector<2x10xf32>,
    %cst_35 = arith.constant dense<0xFF800000> : vector<2xf32>
    %45 = vector.multi_reduction <maximumf>, %43, %cst_35 [1] : vector<2x10xf32> to vector<2xf32>
    %46 = vector.shape_cast %45 : vector<2xf32> to vector<2x1xf32>
    %47 = vector.broadcast %46 : vector<2x1xf32> to vector<2x10xf32>
    %48 = arith.subf %43, %47 : vector<2x10xf32>
    %49 = math.exp %48 : vector<2x10xf32>
    %cst_36 = arith.constant dense<0.000000e+00> : vector<2xf32>
    %50 = vector.multi_reduction <add>, %49, %cst_36 [1] : vector<2x10xf32> to vector<2xf32>
    %51 = vector.shape_cast %50 : vector<2xf32> to vector<2x1xf32>
    %52 = math.log %51 : vector<2x1xf32>
    %53 = vector.broadcast %52 : vector<2x1xf32> to vector<2x10xf32>
    %54 = arith.subf %48, %53 : vector<2x10xf32>
    %c0_37 = arith.constant 0 : index
    %c0_38 = arith.constant 0 : index
    %55 = vector.load %arg15[%c0_37, %c0_38] : memref<2x10xf32, #tpu.memory_space<vmem>>, vector<2x10xf32>
    tpu.vector_store %arg15[%c0_37, %c0_38], %54 {strides = array<i32>} : memref<2x10xf32, #tpu.memory_space<vmem>>, vector<2x10xf32>,
    return
  }
  func.func @transform_0(%arg0: i32) -> (i32, i32) {
    %c0_i32 = arith.constant 0 : i32
    %c0_i32_0 = arith.constant 0 : i32
    %c0_i32_1 = arith.constant 0 : i32
    return %c0_i32, %c0_i32_0 : i32, i32
  }
  func.func @transform_1(%arg0: i32) -> (i32, i32) {
    %c0_i32 = arith.constant 0 : i32
    %c0_i32_0 = arith.constant 0 : i32
    %c0_i32_1 = arith.constant 0 : i32
    return %c0_i32, %c0_i32_0 : i32, i32
  }
  func.func @transform_2(%arg0: i32) -> (i32, i32) {
    %c0_i32 = arith.constant 0 : i32
    %c0_i32_0 = arith.constant 0 : i32
    %c0_i32_1 = arith.constant 0 : i32
    return %c0_i32, %c0_i32_0 : i32, i32
  }
  func.func @transform_3(%arg0: i32) -> (i32, i32) {
    %c0_i32 = arith.constant 0 : i32
    %c0_i32_0 = arith.constant 0 : i32
    %c0_i32_1 = arith.constant 0 : i32
    return %c0_i32, %c0_i32_0 : i32, i32
  }
  func.func @transform_4(%arg0: i32) -> (i32, i32) {
    %c0_i32 = arith.constant 0 : i32
    %c0_i32_0 = arith.constant 0 : i32
    %c0_i32_1 = arith.constant 0 : i32
    return %c0_i32, %c0_i32_0 : i32, i32
  }
  func.func @transform_5(%arg0: i32) -> (i32, i32) {
    %c0_i32 = arith.constant 0 : i32
    %c0_i32_0 = arith.constant 0 : i32
    %c0_i32_1 = arith.constant 0 : i32
    return %c0_i32, %c0_i32_0 : i32, i32
  }
  func.func @transform_6(%arg0: i32) -> (i32, i32) {
    %c0_i32 = arith.constant 0 : i32
    %c0_i32_0 = arith.constant 0 : i32
    %c0_i32_1 = arith.constant 0 : i32
    return %c0_i32, %c0_i32_0 : i32, i32
  }
  func.func @transform_7(%arg0: i32) -> (i32, i32) {
    %c0_i32 = arith.constant 0 : i32
    %c0_i32_0 = arith.constant 0 : i32
    %c0_i32_1 = arith.constant 0 : i32
    return %c0_i32, %c0_i32_0 : i32, i32
  }
  func.func @transform_8(%arg0: i32) -> (i32, i32) {
    %c0_i32 = arith.constant 0 : i32
    %c0_i32_0 = arith.constant 0 : i32
    %c0_i32_1 = arith.constant 0 : i32
    return %c0_i32, %c0_i32_0 : i32, i32
  }
  func.func @transform_9(%arg0: i32) -> (i32, i32) {
    %c0_i32 = arith.constant 0 : i32
    %c0_i32_0 = arith.constant 0 : i32
    %c0_i32_1 = arith.constant 0 : i32
    return %c0_i32, %c0_i32_0 : i32, i32
  }
  func.func @transform_10(%arg0: i32) -> (i32, i32) {
    %c0_i32 = arith.constant 0 : i32
    %c0_i32_0 = arith.constant 0 : i32
    %c0_i32_1 = arith.constant 0 : i32
    return %c0_i32, %c0_i32_0 : i32, i32
  }
  func.func @transform_11(%arg0: i32) -> (i32, i32) {
    %c0_i32 = arith.constant 0 : i32
    %c0_i32_0 = arith.constant 0 : i32
    %c0_i32_1 = arith.constant 0 : i32
    return %c0_i32, %c0_i32_0 : i32, i32
  }
  func.func @transform_12(%arg0: i32) -> (i32, i32) {
    %c0_i32 = arith.constant 0 : i32
    %c0_i32_0 = arith.constant 0 : i32
    %c0_i32_1 = arith.constant 0 : i32
    return %c0_i32, %c0_i32_0 : i32, i32
  }
  func.func @transform_13(%arg0: i32) -> (i32, i32) {
    %c0_i32 = arith.constant 0 : i32
    %c0_i32_0 = arith.constant 0 : i32
    %c0_i32_1 = arith.constant 0 : i32
    return %c0_i32, %c0_i32_0 : i32, i32
  }
  func.func @transform_14(%arg0: i32) -> (i32, i32) {
    %c0_i32 = arith.constant 0 : i32
    %c0_i32_0 = arith.constant 0 : i32
    %c0_i32_1 = arith.constant 0 : i32
    return %c0_i32, %c0_i32_0 : i32, i32
  }
}

</mosaic_0001>

<bundles_post_ra>
// kernel: snn_forward.6
= control target key start
LH: loop header
LB: loop body
LE: loop exit
PB: predicated region body
PF: predicated region fallthrough
CT: control target
= control target key end

     0   :  { %s895_s24 = smov 0   ;;  %s995_s0 = inlined_call_operand.vmem [shape: bf16[128,18], index: 0, kind: input, shape index: {}]   ;;  %s996_s1 = inlined_call_operand.vmem [shape: bf16[18,64], index: 1, kind: input, shape index: {}]   ;;  %s997_s2 = inlined_call_operand.vmem [shape: f32[1,64], index: 2, kind: input, shape index: {}]   ;;  %s998_s3 = inlined_call_operand.vmem [shape: f32[1,64], index: 3, kind: input, shape index: {}]   ;;  %s999_s4 = inlined_call_operand.vmem [shape: f32[128,64], index: 4, kind: input, shape index: {}, may-alias: {4,6}]   ;;  %s1000_s5 = inlined_call_operand.vmem [shape: bf16[128,64], index: 5, kind: input, shape index: {}, may-alias: {5,7}]   ;;  %s1001_s6 = inlined_call_operand.vmem [shape: f32[128,64], index: 6, kind: output, shape index: {0}, may-alias: {4,6}]   ;;  %s1002_s7 = inlined_call_operand.vmem [shape: bf16[128,64], index: 7, kind: output, shape index: {1}, may-alias: {5,7}]  }
   0x1 LB: > { %s736_s25 = sadd.s32 4294967295, %s852_s24   ;;  %p740_p0 = scmp.ge.s32.totalorder %s852_s24, 1  ;;  %s852_s24 = sphi %s895_s24, %s18_s24  }
   0x2   : > { %p263_p1 = scmp.lt.s32.totalorder %s852_s24, 3 }
   0x4   : > { %p264_p2 = pnand %p740_p0, %p263_p1 }
   0x5   : > { %v840_v0 = vld [vmem:[%s996_s1] sm:$0xff] (!%p264_p2)   ;;  %vm401_vm0 = vcmask (!%p264_p2), 1040384   ;;  %v841_v1 = vld [vmem:[%s996_s1 + $0x8] ss:$0 sps:$4 sm:$0x11] (!%p264_p2)   ;;  %s741_s30 = sshll.u32 (!%p264_p2), %s736_s25, 3  ;;  %v496_v7 = vlaneseq (!%p264_p2) }
   0x6   : > { %267 = sbr.rel (%p264_p2) target bundleno = 247 (0xf7), region = 44  ;;  %813 = vmatprep.subr.bf16.mxu0 (!%p264_p2), %v840_v0  ;;  %825 = vmatprep.subr.bf16.mxu1 (!%p264_p2), %v840_v0  ;;  %p311_p3 = scmp.lt.s32.totalorder (!%p264_p2), %s741_s30, 15  ;;  %v403_v2 = vsel (!%p264_p2), %vm401_vm0, %v841_v1, 0  ;;  %vm388_vm1 = vcmask (!%p264_p2), 146432   ;;  %v470_v14 = vld [vmem:[%s998_s3] sm:$0x1] (!%p264_p2) }
   0x7   : > { %814 = vmatpush3.bf16.msra.mxu0 (!%p264_p2), %v840_v0  ;;  %827 = vmatpush3.bf16.msra.mxu1 (!%p264_p2), %v840_v0  ;;  %v497_v8 = vshrl.u32 (!%p264_p2), %v496_v7, 7  ;;  %v525_v56 = vsub.f32 (!%p264_p2), 1.0, %v470_v14  ;;  %v751_v57 = vld [vmem:[%s997_s2] ss:$0 sm:$0xff] (!%p264_p2)  ;;  %vm613_vm2 = vcmask (!%p264_p2), 519168   ;;  %vm556_vm3 = vcmask (!%p264_p2), 523264  }
   0x8   : > { %829 = vmatprep.subr.msk.bf16.mxu0 (!%p264_p2), %vm401_vm0, %v841_v1  ;;  %830 = vmatprep.subr.msk.bf16.mxu1 (!%p264_p2), %vm401_vm0, %v841_v1 }
   0x9   : > { %v498_v13 = vsub.s32 (!%p264_p2), 0, %v497_v8 }
   0xb   : > { %816 = vmatpush3.bf16.msra.mxu0 (!%p264_p2), %v403_v2  ;;  %828 = vmatpush3.bf16.msra.mxu1 (!%p264_p2), %v403_v2  ;;  %v499_v16 = vrot.slane (!%p264_p2), %v470_v14, %v498_v13  ;;  %v530_v58 = vrot.slane (!%p264_p2), %v525_v56, %v498_v13 }
   0xd   : > { %s1004_s30 = smov (!%p311_p3, %s741_s30), 15 }
   0xe   : > { %s912_s8 = sshll.u32 %s1004_s30, 2  ;;  %s744_s15 = sshll.u32 %s1004_s30, 3 }
   0xf   : > { %s314_s11 = scalar_lea.vmem %s995_s0, %s912_s8  ;;  %s326_s14 = scalar_lea.vmem %s1000_s5, %s912_s8 }
  0x10   : > { %v842_v3 = vld [vmem:[%s314_s11] sm:$0xff]   ;;  %v843_v4 = vld [vmem:[%s314_s11 + $0x10] sm:$0xff]   ;;  %v844_v5 = vld [vmem:[%s314_s11 + $0x8] sm:$0xff]   ;;  %s928_s18 = scalar_lea.vmem %s999_s4, %s744_s15  ;;  %s951_s26 = scalar_lea.vmem %s1001_s6, %s744_s15 }
  0x11   : > { %817 = vmatprep.mubr.msk.bf16.mxu0 %vm388_vm1, %v842_v3  ;;  %821 = vmatprep.mubr.msk.bf16.mxu1 %vm388_vm1, %v843_v4  ;;  %v845_v6 = vld [vmem:[%s314_s11 + $0x18] sm:$0xff]   ;;  %v804_v9 = vld [vmem:[%s326_s14 + $0x8] sm:$0xff]   ;;  %v789_v11 = vld [vmem:[%s326_s14] sm:$0xff]   ;;  %s959_s29 = scalar_lea.vmem %s1002_s7, %s912_s8 }
  0x12   : > { %818 = vmatmul.mubr.msk.bf16.vlgmr.msra.gmra.mrb[0].mxu0 %vm388_vm1, %v844_v5  ;;  %822 = vmatmul.mubr.msk.bf16.vlgmr.msra.gmra.mrb[0].mxu1 %vm388_vm1, %v845_v6  ;;  %v806_v10 = vld [vmem:[%s326_s14 + $0x18] sm:$0xff]   ;;  %v805_v12 = vld [vmem:[%s326_s14 + $0x10] sm:$0xff]   ;;  %v794_v15 = vunpack.c.l.bf16 %v804_v9  ;;  %v790_v20 = vunpack.c.l.bf16 %v789_v11  ;;  %v471_v25 = vld [vmem:[%s928_s18] sm:$0xff]  ;;  %v795_v35 = vunpack.c.h.bf16 %v804_v9  ;;  %v791_v44 = vunpack.c.h.bf16 %v789_v11 }
  0x13   : > { %v802_v17 = vunpack.c.l.bf16 %v806_v10  ;;  %v473_v18 = vld [vmem:[%s928_s18 + $0x10] sm:$0xff]  ;;  %v798_v21 = vunpack.c.l.bf16 %v805_v12  ;;  %v475_v26 = vld [vmem:[%s928_s18 + $0x20] sm:$0xff]  ;;  %v501_v28 = vmul.f32 %v499_v16, %v471_v25  ;;  %v474_v31 = vld [vmem:[%s928_s18 + $0x18] sm:$0xff]  ;;  %v803_v39 = vunpack.c.h.bf16 %v806_v10 }
  0x14   : > { %v477_v19 = vld [vmem:[%s928_s18 + $0x30] sm:$0xff]  ;;  %v503_v22 = vmul.f32 %v499_v16, %v473_v18  ;;  %v511_v23 = vsub.f32 1.0, %v794_v15  ;;  %v509_v29 = vsub.f32 1.0, %v790_v20  ;;  %v505_v30 = vmul.f32 %v499_v16, %v475_v26  ;;  %v478_v32 = vld [vmem:[%s928_s18 + $0x38] sm:$0xff]  ;;  %v472_v41 = vld [vmem:[%s928_s18 + $0x8] sm:$0xff] }
  0x15   : > { %v507_v24 = vmul.f32 %v499_v16, %v477_v19  ;;  %v515_v27 = vsub.f32 1.0, %v802_v17  ;;  %v513_v34 = vsub.f32 1.0, %v798_v21  ;;  %v504_v36 = vmul.f32 %v499_v16, %v474_v31  ;;  %v476_v46 = vld [vmem:[%s928_s18 + $0x28] sm:$0xff] }
  0x16   : > { %v519_v33 = vmul.f32 %v511_v23, %v503_v22  ;;  %v517_v38 = vmul.f32 %v509_v29, %v501_v28  ;;  %v508_v40 = vmul.f32 %v499_v16, %v478_v32  ;;  %v512_v43 = vsub.f32 1.0, %v795_v35 }
  0x17   : > { %v523_v37 = vmul.f32 %v515_v27, %v507_v24  ;;  %v521_v42 = vmul.f32 %v513_v34, %v505_v30  ;;  %v502_v45 = vmul.f32 %v499_v16, %v472_v41  ;;  %v516_v47 = vsub.f32 1.0, %v803_v39 }
  0x18   : > { %v799_v48 = vunpack.c.h.bf16 %v805_v12  ;;  %v506_v49 = vmul.f32 %v499_v16, %v476_v46  ;;  %v520_v50 = vmul.f32 %v512_v43, %v504_v36  ;;  %v510_v51 = vsub.f32 1.0, %v791_v44 }
  0x19   : > { %v524_v52 = vmul.f32 %v516_v47, %v508_v40  ;;  %v854_v24 = vmov 0.0  }
  0x1a   : > { %v514_v53 = vsub.f32 1.0, %v799_v48  ;;  %v518_v54 = vmul.f32 %v510_v51, %v502_v45 }
  0x1c   : > { %v941_v55 = vmul.f32 %v514_v53, %v506_v49 }
  0xe5   : > { %v819_v59 = vpop.f32.mrb[0].mxu0  ;;  %v823_v61 = vpop.f32.mrb[0].mxu1 }
  0xe6   : > { %v448_v60 = vadd.f32 %v819_v59, %v751_v57  ;;  %v439_v62 = vpop.f32.mrb[1].mxu0  ;;  %v464_v63 = vadd.f32 %v823_v61, %v751_v57  ;;  %v455_v1 = vpop.f32.mrb[1].mxu1 }
  0xe7   : > { %v440_v0 = vadd.f32 %v751_v57, %v439_v62  ;;  %v820_v2 = vpop.f32.mrb[2].mxu0  ;;  %v456_v4 = vadd.f32 %v751_v57, %v455_v1  ;;  %v824_v6 = vpop.f32.mrb[2].mxu1 }
  0xe8   : > { %v534_v3 = vmul.f32 %v530_v58, %v448_v60  ;;  %v451_v5 = vadd.f32 %v820_v2, %v751_v57  ;;  %v442_v7 = vpop.f32.mrb[3].mxu0  ;;  %v538_v8 = vmul.f32 %v530_v58, %v464_v63  ;;  %v467_v10 = vadd.f32 %v824_v6, %v751_v57  ;;  %v458_v12 = vpop.f32.mrb[3].mxu1 }
  0xe9   : > { %v532_v9 = vmul.f32 %v530_v58, %v440_v0  ;;  %v443_v11 = vadd.f32 %v751_v57, %v442_v7  ;;  %v536_v14 = vmul.f32 %v530_v58, %v456_v4  ;;  %v459_v16 = vadd.f32 %v751_v57, %v458_v12 }
  0xea   : > { %v542_v13 = vadd.f32 %v534_v3, %v519_v33  ;;  %v535_v15 = vmul.f32 %v530_v58, %v451_v5  ;;  %v546_v17 = vadd.f32 %v538_v8, %v523_v37  ;;  %v539_v19 = vmul.f32 %v530_v58, %v467_v10 }
  0xeb   : > { %v540_v18 = vadd.f32 %v532_v9, %v517_v38  ;;  %v533_v20 = vmul.f32 %v530_v58, %v443_v11  ;;  %v544_v21 = vadd.f32 %v536_v14, %v521_v42  ;;  %v537_v23 = vmul.f32 %v530_v58, %v459_v16 }
  0xec   : > { %vm550_vm4 = vcmp.gt.f32.partialorder %v542_v13, 0.1  ;;  %v543_v22 = vadd.f32 %v535_v15, %v520_v50  ;;  %559 = vst.msk [vmem:[%s951_s26 + $0x10] sm:$0xff] %vm556_vm3, %v542_v13  ;;  %vm554_vm5 = vcmp.gt.f32.partialorder %v546_v17, 0.1  ;;  %v547_v26 = vadd.f32 %v539_v19, %v524_v52  ;;  %563 = vst.msk [vmem:[%s951_s26 + $0x30] sm:$0xff] %vm556_vm3, %v546_v17 }
  0xed   : > { %v764_v25 = vsel %vm550_vm4, 1.0, %v854_v24  ;;  %vm548_vm6 = vcmp.gt.f32.partialorder %v540_v18, 0.1  ;;  %557 = vst.msk [vmem:[%s951_s26] sm:$0xff] %vm556_vm3, %v540_v18  ;;  %v768_v28 = vsel %vm554_vm5, 1.0, %v854_v24  ;;  %561 = vst.msk [vmem:[%s951_s26 + $0x20] sm:$0xff] %vm556_vm3, %v544_v21  ;;  %v541_v35 = vadd.f32 %v533_v20, %v518_v54 }
  0xee   : > { %v782_v27 = vpack.c.bf16 %v764_v25, %v764_v25  ;;  %v762_v29 = vsel %vm548_vm6, 1.0, %v854_v24  ;;  %vm552_vm7 = vcmp.gt.f32.partialorder %v544_v21, 0.1  ;;  %560 = vst.msk [vmem:[%s951_s26 + $0x18] sm:$0xff] %vm556_vm3, %v543_v22  ;;  %v786_v30 = vpack.c.bf16 %v768_v28, %v768_v28  ;;  %564 = vst.msk [vmem:[%s951_s26 + $0x38] sm:$0xff] %vm556_vm3, %v547_v26 }
  0xef   : > { %v780_v31 = vpack.c.bf16 %v762_v29, %v762_v29  ;;  %v766_v32 = vsel %vm552_vm7, 1.0, %v854_v24  ;;  %vm551_vm8 = vcmp.gt.f32.partialorder %v543_v22, 0.1  ;;  %vm555_vm9 = vcmp.gt.f32.partialorder %v547_v26, 0.1  ;;  %558 = vst.msk [vmem:[%s951_s26 + $0x8] sm:$0xff] %vm556_vm3, %v541_v35 }
  0xf0   : > { %616 = vst.msk [vmem:[%s959_s29 + $0x8] sm:$0xf] %vm613_vm2, %v782_v27  ;;  %v784_v33 = vpack.c.bf16 %v766_v32, %v766_v32  ;;  %v765_v34 = vsel %vm551_vm8, 1.0, %v854_v24  ;;  %620 = vst.msk [vmem:[%s959_s29 + $0x18] sm:$0xf] %vm613_vm2, %v786_v30  ;;  %v769_v37 = vsel %vm555_vm9, 1.0, %v854_v24  ;;  %v545_v38 = vadd.f32 %v537_v23, %v941_v55 }
  0xf1   : > { %614 = vst.msk [vmem:[%s959_s29] sm:$0xf] %vm613_vm2, %v780_v31  ;;  %v783_v36 = vpack.c.bf16 %v765_v34, %v765_v34  ;;  %v787_v39 = vpack.c.bf16 %v769_v37, %v769_v37  ;;  %vm549_vm10 = vcmp.gt.f32.partialorder %v541_v35, 0.1 }
  0xf2   : > { %618 = vst.msk [vmem:[%s959_s29 + $0x10] sm:$0xf] %vm613_vm2, %v784_v33  ;;  %v763_v40 = vsel %vm549_vm10, 1.0, %v854_v24  ;;  %vm553_vm11 = vcmp.gt.f32.partialorder %v545_v38, 0.1 }
  0xf3   : > { %617 = vst.msk [vmem:[%s959_s29 + $0xc] sm:$0xf] %vm613_vm2, %v783_v36  ;;  %621 = vst.msk [vmem:[%s959_s29 + $0x1c] sm:$0xf] %vm613_vm2, %v787_v39  ;;  %v781_v41 = vpack.c.bf16 %v763_v40, %v763_v40  ;;  %v767_v42 = vsel %vm553_vm11, 1.0, %v854_v24 }
  0xf4   : > { %562 = vst.msk [vmem:[%s951_s26 + $0x28] sm:$0xff] %vm556_vm3, %v545_v38  ;;  %v785_v43 = vpack.c.bf16 %v767_v42, %v767_v42 }
  0xf5   : > { %615 = vst.msk [vmem:[%s959_s29 + $0x4] sm:$0xf] %vm613_vm2, %v781_v41 }
  0xf6   : > { %619 = vst.msk [vmem:[%s959_s29 + $0x14] sm:$0xf] %vm613_vm2, %v785_v43 }
  0xf7 PF: > { %s18_s24 = sadd.s32 1, %s852_s24  }
  0xf8   : > { %p15_p4 = scmp.ge.s32.totalorder %s18_s24, 4  }
  0xfa   :  { %17 = sbr.rel (!%p15_p4) target bundleno = 1 (0x1), region = 92 }

// kernel: snn_forward.8
= control target key start
LH: loop header
LB: loop body
LE: loop exit
PB: predicated region body
PF: predicated region fallthrough
CT: control target
= control target key end

     0   :  { %s922_s24 = smov 0   ;;  %s1035_s0 = inlined_call_operand.vmem [shape: bf16[128,64], index: 0, kind: input, shape index: {}]   ;;  %s1036_s1 = inlined_call_operand.vmem [shape: bf16[64,64], index: 1, kind: input, shape index: {}]   ;;  %s1037_s2 = inlined_call_operand.vmem [shape: f32[1,64], index: 2, kind: input, shape index: {}]   ;;  %s1038_s3 = inlined_call_operand.vmem [shape: f32[1,64], index: 3, kind: input, shape index: {}]   ;;  %s1039_s4 = inlined_call_operand.vmem [shape: f32[128,64], index: 4, kind: input, shape index: {}, may-alias: {4,6}]   ;;  %s1040_s5 = inlined_call_operand.vmem [shape: bf16[128,64], index: 5, kind: input, shape index: {}, may-alias: {5,7}]   ;;  %s1041_s6 = inlined_call_operand.vmem [shape: f32[128,64], index: 6, kind: output, shape index: {0}, may-alias: {4,6}]   ;;  %s1042_s7 = inlined_call_operand.vmem [shape: bf16[128,64], index: 7, kind: output, shape index: {1}, may-alias: {5,7}]  }
   0x1 LB: > { %s751_s25 = sadd.s32 4294967295, %s879_s24   ;;  %p755_p0 = scmp.ge.s32.totalorder %s879_s24, 1  ;;  %s879_s24 = sphi %s922_s24, %s18_s24  }
   0x2   : > { %p263_p1 = scmp.lt.s32.totalorder %s879_s24, 3 }
   0x4   : > { %p264_p2 = pnand %p755_p0, %p263_p1 }
   0x5   : > { %v865_v0 = vld [vmem:[%s1036_s1] sm:$0xff] (!%p264_p2)   ;;  %s756_s28 = sshll.u32 (!%p264_p2), %s751_s25, 3  ;;  %v866_v1 = vld [vmem:[%s1036_s1 + $0x8] sm:$0xff] (!%p264_p2)   ;;  %v867_v2 = vld [vmem:[%s1036_s1 + $0x10] sm:$0xff] (!%p264_p2)   ;;  %vm408_vm0 = vcmask (!%p264_p2), 523264   ;;  %v512_v8 = vlaneseq (!%p264_p2)  ;;  %vm628_vm1 = vcmask (!%p264_p2), 519168  }
   0x6   : > { %267 = sbr.rel (%p264_p2) target bundleno = 251 (0xfb), region = 44  ;;  %p311_p3 = scmp.lt.s32.totalorder (!%p264_p2), %s756_s28, 15  ;;  %832 = vmatprep.subr.bf16.mxu0 (!%p264_p2), %v865_v0  ;;  %848 = vmatprep.subr.bf16.mxu1 (!%p264_p2), %v865_v0  ;;  %v868_v4 = vld [vmem:[%s1036_s1 + $0x18] sm:$0xff] (!%p264_p2)   ;;  %v486_v15 = vld [vmem:[%s1038_s3] sm:$0x1] (!%p264_p2) }
   0x7   : > { %833 = vmatpush3.bf16.msra.mxu0 (!%p264_p2), %v865_v0  ;;  %852 = vmatpush3.bf16.msra.mxu1 (!%p264_p2), %v865_v0  ;;  %v513_v9 = vshrl.u32 (!%p264_p2), %v512_v8, 7  ;;  %v541_v57 = vsub.f32 (!%p264_p2), 1.0, %v486_v15  ;;  %v766_v58 = vld [vmem:[%s1037_s2] ss:$0 sm:$0xff] (!%p264_p2) }
   0x8   : > { %834 = vmatprep.subr.bf16.mxu0 (!%p264_p2), %v866_v1  ;;  %849 = vmatprep.subr.bf16.mxu1 (!%p264_p2), %v866_v1 }
   0x9   : > { %v514_v14 = vsub.s32 (!%p264_p2), 0, %v513_v9 }
   0xb   : > { %835 = vmatpush3.bf16.msra.mxu0 (!%p264_p2), %v866_v1  ;;  %853 = vmatpush3.bf16.msra.mxu1 (!%p264_p2), %v866_v1  ;;  %v515_v17 = vrot.slane (!%p264_p2), %v486_v15, %v514_v14  ;;  %v546_v59 = vrot.slane (!%p264_p2), %v541_v57, %v514_v14 }
   0xc   : > { %836 = vmatprep.subr.bf16.mxu0 (!%p264_p2), %v867_v2  ;;  %850 = vmatprep.subr.bf16.mxu1 (!%p264_p2), %v867_v2 }
   0xd   : > { %s1044_s28 = smov (!%p311_p3, %s756_s28), 15 }
   0xe   : > { %s942_s10 = sshll.u32 %s1044_s28, 2  ;;  %s759_s19 = sshll.u32 %s1044_s28, 3 }
   0xf   : > { %s314_s13 = scalar_lea.vmem %s1035_s0, %s942_s10  ;;  %837 = vmatpush3.bf16.msra.mxu0 %v867_v2  ;;  %854 = vmatpush3.bf16.msra.mxu1 %v867_v2  ;;  %s326_s18 = scalar_lea.vmem %s1040_s5, %s942_s10 }
  0x10   : > { %v869_v3 = vld [vmem:[%s314_s13] sm:$0xff]   ;;  %v870_v5 = vld [vmem:[%s314_s13 + $0x10] sm:$0xff]   ;;  %838 = vmatprep.subr.bf16.mxu0 %v868_v4  ;;  %851 = vmatprep.subr.bf16.mxu1 %v868_v4  ;;  %v871_v6 = vld [vmem:[%s314_s13 + $0x8] sm:$0xff]   ;;  %s965_s22 = scalar_lea.vmem %s1039_s4, %s759_s19  ;;  %s990_s8 = scalar_lea.vmem %s1041_s6, %s759_s19 }
  0x11   : > { %840 = vmatprep.mubr.msk.bf16.mxu0 %vm408_vm0, %v869_v3  ;;  %844 = vmatprep.mubr.msk.bf16.mxu1 %vm408_vm0, %v870_v5  ;;  %v872_v7 = vld [vmem:[%s314_s13 + $0x18] sm:$0xff]   ;;  %v821_v10 = vld [vmem:[%s326_s18 + $0x8] sm:$0xff]   ;;  %v806_v12 = vld [vmem:[%s326_s18] sm:$0xff]   ;;  %s1000_s11 = scalar_lea.vmem %s1042_s7, %s942_s10 }
  0x12   : > { %v823_v11 = vld [vmem:[%s326_s18 + $0x18] sm:$0xff]   ;;  %v822_v13 = vld [vmem:[%s326_s18 + $0x10] sm:$0xff]   ;;  %v811_v16 = vunpack.c.l.bf16 %v821_v10  ;;  %v807_v21 = vunpack.c.l.bf16 %v806_v12  ;;  %v487_v26 = vld [vmem:[%s965_s22] sm:$0xff]  ;;  %v812_v35 = vunpack.c.h.bf16 %v821_v10  ;;  %v808_v45 = vunpack.c.h.bf16 %v806_v12 }
  0x13   : > { %839 = vmatpush3.bf16.msra.mxu0 %v868_v4  ;;  %855 = vmatpush3.bf16.msra.mxu1 %v868_v4  ;;  %v819_v18 = vunpack.c.l.bf16 %v823_v11  ;;  %v489_v19 = vld [vmem:[%s965_s22 + $0x10] sm:$0xff]  ;;  %v815_v22 = vunpack.c.l.bf16 %v822_v13  ;;  %v491_v27 = vld [vmem:[%s965_s22 + $0x20] sm:$0xff]  ;;  %v517_v29 = vmul.f32 %v515_v17, %v487_v26  ;;  %v490_v32 = vld [vmem:[%s965_s22 + $0x18] sm:$0xff]  ;;  %v820_v40 = vunpack.c.h.bf16 %v823_v11 }
  0x14   : > { %v493_v20 = vld [vmem:[%s965_s22 + $0x30] sm:$0xff]  ;;  %v519_v23 = vmul.f32 %v515_v17, %v489_v19  ;;  %v527_v24 = vsub.f32 1.0, %v811_v16  ;;  %v525_v30 = vsub.f32 1.0, %v807_v21  ;;  %v521_v31 = vmul.f32 %v515_v17, %v491_v27  ;;  %v494_v37 = vld [vmem:[%s965_s22 + $0x38] sm:$0xff]  ;;  %v488_v42 = vld [vmem:[%s965_s22 + $0x8] sm:$0xff] }
  0x15   : > { %v523_v25 = vmul.f32 %v515_v17, %v493_v20  ;;  %v531_v28 = vsub.f32 1.0, %v819_v18  ;;  %v529_v34 = vsub.f32 1.0, %v815_v22  ;;  %v520_v36 = vmul.f32 %v515_v17, %v490_v32  ;;  %v492_v48 = vld [vmem:[%s965_s22 + $0x28] sm:$0xff] }
  0x16   : > { %841 = vmatmul.mubr.msk.bf16.vlgmr.msra.gmra.mrb[0].mxu0 %vm408_vm0, %v871_v6  ;;  %845 = vmatmul.mubr.msk.bf16.vlgmr.msra.gmra.mrb[0].mxu1 %vm408_vm0, %v872_v7  ;;  %v535_v33 = vmul.f32 %v527_v24, %v519_v23  ;;  %v533_v39 = vmul.f32 %v525_v30, %v517_v29  ;;  %v524_v41 = vmul.f32 %v515_v17, %v494_v37  ;;  %v528_v44 = vsub.f32 1.0, %v812_v35 }
  0x17   : > { %v539_v38 = vmul.f32 %v531_v28, %v523_v25  ;;  %v537_v43 = vmul.f32 %v529_v34, %v521_v31  ;;  %v518_v46 = vmul.f32 %v515_v17, %v488_v42  ;;  %v532_v47 = vsub.f32 1.0, %v820_v40 }
  0x18   : > { %v816_v49 = vunpack.c.h.bf16 %v822_v13  ;;  %v536_v50 = vmul.f32 %v528_v44, %v520_v36  ;;  %v526_v51 = vsub.f32 1.0, %v808_v45  ;;  %v522_v52 = vmul.f32 %v515_v17, %v492_v48 }
  0x19   : > { %v540_v53 = vmul.f32 %v532_v47, %v524_v41  ;;  %v881_v26 = vmov 0.0  }
  0x1a   : > { %v530_v54 = vsub.f32 1.0, %v816_v49  ;;  %v978_v55 = vmul.f32 %v526_v51, %v518_v46 }
  0x1c   : > { %v980_v56 = vmul.f32 %v530_v54, %v522_v52 }
  0xe9   : > { %v842_v60 = vpop.f32.mrb[0].mxu0  ;;  %v846_v61 = vpop.f32.mrb[0].mxu1 }
  0xea   : > { %v464_v62 = vadd.f32 %v842_v60, %v766_v58  ;;  %v480_v63 = vadd.f32 %v846_v61, %v766_v58  ;;  %v455_v0 = vpop.f32.mrb[1].mxu0  ;;  %v471_v1 = vpop.f32.mrb[1].mxu1 }
  0xeb   : > { %v456_v2 = vadd.f32 %v766_v58, %v455_v0  ;;  %v472_v3 = vadd.f32 %v766_v58, %v471_v1  ;;  %v843_v4 = vpop.f32.mrb[2].mxu0  ;;  %v847_v5 = vpop.f32.mrb[2].mxu1 }
  0xec   : > { %v550_v6 = vmul.f32 %v546_v59, %v464_v62  ;;  %v554_v7 = vmul.f32 %v546_v59, %v480_v63  ;;  %v467_v8 = vadd.f32 %v843_v4, %v766_v58  ;;  %v483_v9 = vadd.f32 %v847_v5, %v766_v58  ;;  %v458_v10 = vpop.f32.mrb[3].mxu0  ;;  %v474_v11 = vpop.f32.mrb[3].mxu1 }
  0xed   : > { %v548_v12 = vmul.f32 %v546_v59, %v456_v2  ;;  %v552_v13 = vmul.f32 %v546_v59, %v472_v3  ;;  %v459_v14 = vadd.f32 %v766_v58, %v458_v10  ;;  %v475_v15 = vadd.f32 %v766_v58, %v474_v11 }
  0xee   : > { %v558_v16 = vadd.f32 %v550_v6, %v535_v33  ;;  %v562_v17 = vadd.f32 %v554_v7, %v539_v38  ;;  %v551_v18 = vmul.f32 %v546_v59, %v467_v8  ;;  %v555_v19 = vmul.f32 %v546_v59, %v483_v9 }
  0xef   : > { %v556_v20 = vadd.f32 %v548_v12, %v533_v39  ;;  %v560_v21 = vadd.f32 %v552_v13, %v537_v43  ;;  %v549_v22 = vmul.f32 %v546_v59, %v459_v14  ;;  %v553_v23 = vmul.f32 %v546_v59, %v475_v15 }
  0xf0   : > { %vm566_vm2 = vcmp.gt.f32.partialorder %v558_v16, 0.1  ;;  %vm570_vm3 = vcmp.gt.f32.partialorder %v562_v17, 0.1  ;;  %v559_v24 = vadd.f32 %v551_v18, %v536_v50  ;;  %v563_v25 = vadd.f32 %v555_v19, %v540_v53  ;;  %574 = vst.msk [vmem:[%s990_s8 + $0x10] sm:$0xff] %vm408_vm0, %v558_v16  ;;  %578 = vst.msk [vmem:[%s990_s8 + $0x30] sm:$0xff] %vm408_vm0, %v562_v17 }
  0xf1   : > { %v781_v27 = vsel %vm566_vm2, 1.0, %v881_v26  ;;  %v785_v28 = vsel %vm570_vm3, 1.0, %v881_v26  ;;  %vm564_vm4 = vcmp.gt.f32.partialorder %v556_v20, 0.1  ;;  %vm568_vm5 = vcmp.gt.f32.partialorder %v560_v21, 0.1 }
  0xf2   : > { %572 = vst.msk [vmem:[%s990_s8] sm:$0xff] %vm408_vm0, %v556_v20  ;;  %576 = vst.msk [vmem:[%s990_s8 + $0x20] sm:$0xff] %vm408_vm0, %v560_v21  ;;  %v799_v29 = vpack.c.bf16 %v781_v27, %v781_v27  ;;  %v803_v30 = vpack.c.bf16 %v785_v28, %v785_v28  ;;  %v779_v31 = vsel %vm564_vm4, 1.0, %v881_v26  ;;  %v783_v32 = vsel %vm568_vm5, 1.0, %v881_v26 }
  0xf3   : > { %575 = vst.msk [vmem:[%s990_s8 + $0x18] sm:$0xff] %vm408_vm0, %v559_v24  ;;  %579 = vst.msk [vmem:[%s990_s8 + $0x38] sm:$0xff] %vm408_vm0, %v563_v25  ;;  %v797_v33 = vpack.c.bf16 %v779_v31, %v779_v31  ;;  %v801_v34 = vpack.c.bf16 %v783_v32, %v783_v32  ;;  %vm567_vm6 = vcmp.gt.f32.partialorder %v559_v24, 0.1  ;;  %vm571_vm7 = vcmp.gt.f32.partialorder %v563_v25, 0.1 }
  0xf4   : > { %631 = vst.msk [vmem:[%s1000_s11 + $0x8] sm:$0xf] %vm628_vm1, %v799_v29  ;;  %635 = vst.msk [vmem:[%s1000_s11 + $0x18] sm:$0xf] %vm628_vm1, %v803_v30  ;;  %v782_v35 = vsel %vm567_vm6, 1.0, %v881_v26  ;;  %v786_v36 = vsel %vm571_vm7, 1.0, %v881_v26  ;;  %v557_v37 = vadd.f32 %v549_v22, %v978_v55  ;;  %v561_v38 = vadd.f32 %v553_v23, %v980_v56 }
  0xf5   : > { %629 = vst.msk [vmem:[%s1000_s11] sm:$0xf] %vm628_vm1, %v797_v33  ;;  %633 = vst.msk [vmem:[%s1000_s11 + $0x10] sm:$0xf] %vm628_vm1, %v801_v34  ;;  %v800_v39 = vpack.c.bf16 %v782_v35, %v782_v35  ;;  %v804_v40 = vpack.c.bf16 %v786_v36, %v786_v36 }
  0xf6   : > { %vm565_vm8 = vcmp.gt.f32.partialorder %v557_v37, 0.1  ;;  %vm569_vm9 = vcmp.gt.f32.partialorder %v561_v38, 0.1  ;;  %573 = vst.msk [vmem:[%s990_s8 + $0x8] sm:$0xff] %vm408_vm0, %v557_v37  ;;  %577 = vst.msk [vmem:[%s990_s8 + $0x28] sm:$0xff] %vm408_vm0, %v561_v38 }
  0xf7   : > { %632 = vst.msk [vmem:[%s1000_s11 + $0xc] sm:$0xf] %vm628_vm1, %v800_v39  ;;  %636 = vst.msk [vmem:[%s1000_s11 + $0x1c] sm:$0xf] %vm628_vm1, %v804_v40  ;;  %v780_v41 = vsel %vm565_vm8, 1.0, %v881_v26  ;;  %v784_v42 = vsel %vm569_vm9, 1.0, %v881_v26 }
  0xf8   : > { %v798_v43 = vpack.c.bf16 %v780_v41, %v780_v41  ;;  %v802_v44 = vpack.c.bf16 %v784_v42, %v784_v42 }
  0xfa   : > { %630 = vst.msk [vmem:[%s1000_s11 + $0x4] sm:$0xf] %vm628_vm1, %v798_v43  ;;  %634 = vst.msk [vmem:[%s1000_s11 + $0x14] sm:$0xf] %vm628_vm1, %v802_v44 }
  0xfb PF: > { %s18_s24 = sadd.s32 1, %s879_s24  }
  0xfc   : > { %p15_p4 = scmp.ge.s32.totalorder %s18_s24, 4  }
  0xfe   :  { %17 = sbr.rel (!%p15_p4) target bundleno = 1 (0x1), region = 92 }

// kernel: snn_forward.7
= control target key start
LH: loop header
LB: loop body
LE: loop exit
PB: predicated region body
PF: predicated region fallthrough
CT: control target
= control target key end

     0   :  { %s1450_s24 = smov 0   ;;  %s1939_s0 = inlined_call_operand.vmem [shape: bf16[2,10,10,64], index: 0, kind: input, shape index: {}]   ;;  %s1940_s1 = inlined_call_operand.vmem [shape: f32[9,1,64], index: 1, kind: input, shape index: {}]   ;;  %s1941_s2 = inlined_call_operand.vmem [shape: f32[1,64], index: 2, kind: input, shape index: {}]   ;;  %s1942_s3 = inlined_call_operand.vmem [shape: f32[1,64], index: 3, kind: input, shape index: {}]   ;;  %s1943_s4 = inlined_call_operand.vmem [shape: f32[2,8,8,64], index: 4, kind: input, shape index: {}, may-alias: {4,6}]   ;;  %s1944_s5 = inlined_call_operand.vmem [shape: bf16[2,8,8,64], index: 5, kind: input, shape index: {}, may-alias: {5,7}]   ;;  %s1945_s6 = inlined_call_operand.vmem [shape: f32[2,8,8,64], index: 6, kind: output, shape index: {0}, may-alias: {4,6}]   ;;  %s1946_s7 = inlined_call_operand.vmem [shape: bf16[2,8,8,64], index: 7, kind: output, shape index: {1}, may-alias: {5,7}]  }
   0x1 LB: > { %s1278_s25 = sadd.s32 4294967295, %s1407_s24   ;;  %p1282_p0 = scmp.ge.s32.totalorder %s1407_s24, 1  ;;  %s1407_s24 = sphi %s1450_s24, %s18_s24  }
   0x2   : > { %p260_p1 = scmp.lt.s32.totalorder %s1407_s24, 3 }
   0x4   : > { %p261_p2 = pnand %p1282_p0, %p260_p1 }
   0x5   : > { %p307_p3 = scmp.lt.s32.totalorder (!%p261_p2), %s1278_s25, 1  ;;  %v1064_v0 = vlaneseq (!%p261_p2)  ;;  %v1038_v2 = vld [vmem:[%s1942_s3] sm:$0x1] (!%p261_p2)  ;;  %vm419_vm0 = vcmask (!%p261_p2), 1046528   ;;  %v1294_v36 = vld [vmem:[%s1940_s1 + $0x1] ss:$0 sm:$0xff] (!%p261_p2) }
   0x6   : > { %264 = sbr.rel (%p261_p2) target bundleno = 144 (0x90), region = 44  ;;  %v1093_v4 = vsub.f32 (!%p261_p2), 1.0, %v1038_v2  ;;  %v1292_v5 = vld [vmem:[%s1940_s1] ss:$0 sm:$0xff] (!%p261_p2)  ;;  %vm516_vm1 = vcmask (!%p261_p2), 1045504   ;;  %vm1124_vm2 = vcmask (!%p261_p2), 523264  }
   0x7   : > { %v1065_v1 = vshrl.u32 (!%p261_p2), %v1064_v0, 7  ;;  %vm1157_vm3 = vcmask (!%p261_p2), 519168  }
   0x9   : > { %v1066_v3 = vsub.s32 (!%p261_p2), 0, %v1065_v1 }
   0xb   : > { %v1475_v9 = vrot.slane (!%p261_p2), %v1038_v2, %v1066_v3  ;;  %v1477_v10 = vrot.slane (!%p261_p2), %v1093_v4, %v1066_v3 }
   0xd   : > { %s1948_s25 = smov (!%p307_p3, %s1278_s25), 1 }
   0xe   : > { %s1391_s26 = smul.u32 80, %s1948_s25  ;;  %s1369_s29 = sshll.u32 %s1948_s25, 5 }
   0xf   : > { %s1368_s30 = sshll.u32 %s1948_s25, 6  ;;  %s1856_s10 = scalar_lea.vmem %s1944_s5, %s1369_s29 }
  0x10   : > { %s1467_s8 = scalar_lea.vmem %s1939_s0, %s1391_s26  ;;  %s1865_s13 = scalar_lea.vmem %s1943_s4, %s1368_s30 }
  0x11   : > { %v332_v6 = vld [vmem:[%s1467_s8] ss:$8 sps:$4 sm:$0xff]   ;;  %v334_v7 = vld [vmem:[%s1467_s8 + $0x10] ss:$8 sps:$4 sm:$0xff]   ;;  %v1481_v16 = vld [vmem:[%s1467_s8 + $0x4] sm:$0x1]  ;;  %s326_s18 = scalar_lea.vmem %s1945_s6, %s1368_s30  ;;  %s331_s21 = scalar_lea.vmem %s1946_s7, %s1369_s29 }
  0x12   : > { %v336_v8 = vld [vmem:[%s1467_s8 + $0x20] ss:$8 sps:$4 sm:$0xff]   ;;  %v338_v11 = vld [vmem:[%s1467_s8 + $0x30] ss:$8 sps:$4 sm:$0xff]   ;;  %v341_v12 = vunpack.c.l.bf16 %v332_v6  ;;  %v342_v13 = vunpack.c.h.bf16 %v332_v6  ;;  %v343_v14 = vunpack.c.l.bf16 %v334_v7  ;;  %v344_v15 = vunpack.c.h.bf16 %v334_v7  ;;  %v1484_v17 = vld [vmem:[%s1467_s8 + $0xc] sm:$0x1] }
  0x13   : > { %v345_v18 = vunpack.c.l.bf16 %v336_v8  ;;  %v346_v19 = vunpack.c.h.bf16 %v336_v8  ;;  %v347_v20 = vunpack.c.l.bf16 %v338_v11  ;;  %v348_v21 = vunpack.c.h.bf16 %v338_v11  ;;  %v1487_v22 = vld [vmem:[%s1467_s8 + $0x14] sm:$0x1]  ;;  %v1490_v23 = vld [vmem:[%s1467_s8 + $0x1c] sm:$0x1]  ;;  %v1493_v24 = vld [vmem:[%s1467_s8 + $0x24] sm:$0x1] }
  0x14   : > { %v355_v25 = vmul.f32 %v1292_v5, %v341_v12  ;;  %v356_v26 = vmul.f32 %v1292_v5, %v342_v13  ;;  %v1495_v27 = vmul.f32 %v1292_v5, %v343_v14  ;;  %v1497_v28 = vmul.f32 %v1292_v5, %v344_v15  ;;  %v1500_v29 = vld [vmem:[%s1467_s8 + $0x2c] sm:$0x1]  ;;  %v1503_v30 = vld [vmem:[%s1467_s8 + $0x34] sm:$0x1]  ;;  %v1506_v31 = vld [vmem:[%s1467_s8 + $0x3c] sm:$0x1] }
  0x15   : > { %v359_v32 = vmul.f32 %v1292_v5, %v345_v18  ;;  %v1508_v33 = vmul.f32 %v1292_v5, %v346_v19  ;;  %v1510_v34 = vmul.f32 %v1292_v5, %v347_v20  ;;  %v1512_v35 = vmul.f32 %v1292_v5, %v348_v21 }
  0x16   : > { %v373_v37 = vunpack.c.l.bf16 %v1481_v16  ;;  %v374_v38 = vunpack.c.l.bf16 %v1484_v17  ;;  %v375_v39 = vunpack.c.l.bf16 %v1487_v22  ;;  %v376_v40 = vunpack.c.l.bf16 %v1490_v23 }
  0x17   : > { %v377_v41 = vunpack.c.l.bf16 %v1493_v24  ;;  %v378_v42 = vunpack.c.l.bf16 %v1500_v29  ;;  %v379_v43 = vunpack.c.l.bf16 %v1503_v30  ;;  %v380_v44 = vunpack.c.l.bf16 %v1506_v31 }
  0x18   : > { %v387_v45 = vmul.f32 %v1294_v36, %v341_v12  ;;  %v388_v46 = vmul.f32 %v1294_v36, %v373_v37  ;;  %v389_v47 = vmul.f32 %v1294_v36, %v342_v13  ;;  %v390_v48 = vmul.f32 %v1294_v36, %v374_v38 }
  0x19   : > { %v391_v49 = vmul.f32 %v1294_v36, %v343_v14  ;;  %v392_v50 = vmul.f32 %v1294_v36, %v375_v39  ;;  %v393_v51 = vmul.f32 %v1294_v36, %v344_v15  ;;  %v394_v52 = vmul.f32 %v1294_v36, %v376_v40  ;;  %v460_v15 = vld [vmem:[%s1467_s8] sm:$0xe] }
  0x1a   : > { %v395_v53 = vmul.f32 %v1294_v36, %v345_v18  ;;  %v396_v54 = vmul.f32 %v1294_v36, %v377_v41  ;;  %v397_v55 = vmul.f32 %v1294_v36, %v346_v19  ;;  %v398_v56 = vmul.f32 %v1294_v36, %v378_v42  ;;  %v461_v18 = vld [vmem:[%s1467_s8 + $0x8] sm:$0xe] }
  0x1b   : > { %v399_v57 = vmul.f32 %v1294_v36, %v347_v20  ;;  %v400_v58 = vmul.f32 %v1294_v36, %v379_v43  ;;  %v401_v59 = vmul.f32 %v1294_v36, %v348_v21  ;;  %v402_v60 = vmul.f32 %v1294_v36, %v380_v44 }
  0x1c   : > { %v420_v61 = vrot.slane %v387_v45, 1  ;;  %v421_v62 = vrot.slane %v388_v46, 1  ;;  %v423_v63 = vrot.slane %v389_v47, 1  ;;  %v424_v0 = vrot.slane %v390_v48, 1  ;;  %v462_v45 = vld [vmem:[%s1467_s8 + $0x10] sm:$0xe] }
  0x1d   : > { %v426_v1 = vrot.slane %v391_v49, 1  ;;  %v427_v2 = vrot.slane %v392_v50, 1  ;;  %v429_v3 = vrot.slane %v393_v51, 1  ;;  %v430_v4 = vrot.slane %v394_v52, 1  ;;  %v463_v50 = vld [vmem:[%s1467_s8 + $0x18] sm:$0xe] }
  0x1e   : > { %v422_v5 = vsel %vm419_vm0, %v420_v61, %v421_v62  ;;  %v425_v6 = vsel %vm419_vm0, %v423_v63, %v424_v0  ;;  %v432_v7 = vrot.slane %v395_v53, 1  ;;  %v433_v8 = vrot.slane %v396_v54, 1  ;;  %v464_v51 = vld [vmem:[%s1467_s8 + $0x20] sm:$0xe] }
  0x1f   : > { %v428_v11 = vsel %vm419_vm0, %v426_v1, %v427_v2  ;;  %v431_v12 = vsel %vm419_vm0, %v429_v3, %v430_v4  ;;  %v435_v13 = vrot.slane %v397_v55, 1  ;;  %v436_v14 = vrot.slane %v398_v56, 1  ;;  %v465_v56 = vld [vmem:[%s1467_s8 + $0x28] sm:$0xe] }
  0x20   : > { %v434_v19 = vsel %vm419_vm0, %v432_v7, %v433_v8  ;;  %v438_v20 = vrot.slane %v399_v57, 1  ;;  %v439_v21 = vrot.slane %v400_v58, 1  ;;  %v441_v36 = vrot.slane %v401_v59, 1  ;;  %v466_v57 = vld [vmem:[%s1467_s8 + $0x30] sm:$0xe] }
  0x21   : > { %v437_v46 = vsel %vm419_vm0, %v435_v13, %v436_v14  ;;  %v442_v47 = vrot.slane %v402_v60, 1  ;;  %v1550_v48 = vadd.f32 %v422_v5, %v355_v25  ;;  %v1552_v49 = vadd.f32 %v425_v6, %v356_v26  ;;  %v467_v58 = vld [vmem:[%s1467_s8 + $0x38] sm:$0xe]  ;;  %v1296_v60 = vld [vmem:[%s1940_s1 + $0x2] ss:$0 sm:$0xff] }
  0x22   : > { %v440_v52 = vsel %vm419_vm0, %v438_v20, %v439_v21  ;;  %v1558_v53 = vadd.f32 %v428_v11, %v1495_v27  ;;  %v455_v54 = vadd.f32 %v431_v12, %v1497_v28  ;;  %v456_v55 = vadd.f32 %v434_v19, %v359_v32 }
  0x23   : > { %v443_v59 = vsel %vm419_vm0, %v441_v36, %v442_v47  ;;  %v457_v25 = vadd.f32 %v437_v46, %v1508_v33  ;;  %v458_v26 = vadd.f32 %v440_v52, %v1510_v34  ;;  %v470_v61 = vunpack.c.l.bf16 %v460_v15  ;;  %v1297_v46 = vld [vmem:[%s1467_s8 + $0x8] ss:$8 sps:$4 sm:$0xff]  }
  0x24   : > { %v459_v27 = vadd.f32 %v443_v59, %v1512_v35  ;;  %v471_v62 = vunpack.c.l.bf16 %v461_v18  ;;  %v472_v63 = vunpack.c.l.bf16 %v462_v45  ;;  %v473_v28 = vunpack.c.l.bf16 %v463_v50 }
  0x25   : > { %v474_v32 = vunpack.c.l.bf16 %v464_v51  ;;  %v475_v0 = vunpack.c.l.bf16 %v465_v56  ;;  %v476_v1 = vunpack.c.l.bf16 %v466_v57  ;;  %v477_v2 = vunpack.c.l.bf16 %v467_v58  ;;  %v1299_v56 = vld [vmem:[%s1467_s8 + $0x18] ss:$8 sps:$4 sm:$0xff]  }
  0x26   : > { %v484_v3 = vmul.f32 %v1296_v60, %v470_v61  ;;  %v485_v33 = vmul.f32 %v1296_v60, %v373_v37  ;;  %v486_v4 = vmul.f32 %v1296_v60, %v471_v62  ;;  %v487_v34 = vmul.f32 %v1296_v60, %v374_v38  ;;  %v1301_v61 = vld [vmem:[%s1467_s8 + $0x28] ss:$8 sps:$4 sm:$0xff]   ;;  %v1303_v62 = vld [vmem:[%s1467_s8 + $0x38] ss:$8 sps:$4 sm:$0xff]  }
  0x27   : > { %v488_v5 = vmul.f32 %v1296_v60, %v472_v63  ;;  %v489_v6 = vmul.f32 %v1296_v60, %v375_v39  ;;  %v490_v35 = vmul.f32 %v1296_v60, %v473_v28  ;;  %v491_v7 = vmul.f32 %v1296_v60, %v376_v40 }
  0x28   : > { %v492_v8 = vmul.f32 %v1296_v60, %v474_v32  ;;  %v493_v11 = vmul.f32 %v1296_v60, %v377_v41  ;;  %v494_v12 = vmul.f32 %v1296_v60, %v475_v0  ;;  %v495_v16 = vmul.f32 %v1296_v60, %v378_v42 }
  0x29   : > { %v496_v37 = vmul.f32 %v1296_v60, %v476_v1  ;;  %v497_v17 = vmul.f32 %v1296_v60, %v379_v43  ;;  %v498_v38 = vmul.f32 %v1296_v60, %v477_v2  ;;  %v499_v22 = vmul.f32 %v1296_v60, %v380_v44 }
  0x2a   : > { %v517_v39 = vrot.slane %v484_v3, 2  ;;  %v518_v13 = vrot.slane %v485_v33, 2  ;;  %v520_v23 = vrot.slane %v486_v4, 2  ;;  %v521_v40 = vrot.slane %v487_v34, 2 }
  0x2b   : > { %v523_v14 = vrot.slane %v488_v5, 2  ;;  %v524_v24 = vrot.slane %v489_v6, 2  ;;  %v526_v41 = vrot.slane %v490_v35, 2  ;;  %v527_v15 = vrot.slane %v491_v7, 2  ;;  %v1606_v5 = vld [vmem:[%s1467_s8 + $0xc] sm:$0x1] }
  0x2c   : > { %v519_v29 = vsel %vm516_vm1, %v517_v39, %v518_v13  ;;  %v522_v42 = vsel %vm516_vm1, %v520_v23, %v521_v40  ;;  %v529_v30 = vrot.slane %v492_v8, 2  ;;  %v530_v43 = vrot.slane %v493_v11, 2  ;;  %v1612_v11 = vld [vmem:[%s1467_s8 + $0x1c] sm:$0x1]  ;;  %v1625_v39 = vld [vmem:[%s1467_s8 + $0x34] sm:$0x1] }
  0x2d   : > { %v525_v18 = vsel %vm516_vm1, %v523_v14, %v524_v24  ;;  %v528_v31 = vsel %vm516_vm1, %v526_v41, %v527_v15  ;;  %v532_v44 = vrot.slane %v494_v12, 2  ;;  %v533_v19 = vrot.slane %v495_v16, 2  ;;  %v1615_v12 = vld [vmem:[%s1467_s8 + $0x24] sm:$0x1]  ;;  %v1618_v16 = vld [vmem:[%s1467_s8 + $0x2c] sm:$0x1] }
  0x2e   : > { %v531_v20 = vsel %vm516_vm1, %v529_v30, %v530_v43  ;;  %v535_v21 = vrot.slane %v496_v37, 2  ;;  %v536_v36 = vrot.slane %v497_v17, 2  ;;  %v538_v45 = vrot.slane %v498_v38, 2  ;;  %v1628_v13 = vld [vmem:[%s1467_s8 + $0x3c] sm:$0x1] }
  0x2f   : > { %v534_v47 = vsel %vm516_vm1, %v532_v44, %v533_v19  ;;  %v539_v50 = vrot.slane %v499_v22, 2  ;;  %v549_v51 = vadd.f32 %v519_v29, %v1550_v48  ;;  %v550_v52 = vadd.f32 %v522_v42, %v1552_v49  ;;  %v1306_v48 = vld [vmem:[%s1940_s1 + $0x3] ss:$0 sm:$0xff]  ;;  %v1631_v23 = vld [vmem:[%s1467_s8 + $0x44] sm:$0x1] }
  0x30   : > { %v537_v57 = vsel %vm516_vm1, %v535_v21, %v536_v36  ;;  %v551_v58 = vadd.f32 %v525_v18, %v1558_v53  ;;  %v552_v59 = vadd.f32 %v528_v31, %v455_v54  ;;  %v553_v60 = vadd.f32 %v531_v20, %v456_v55  ;;  %v1316_v15 = vld [vmem:[%s1940_s1 + $0x4] ss:$0 sm:$0xff] }
  0x31   : > { %v540_v63 = vsel %vm516_vm1, %v538_v45, %v539_v50  ;;  %v554_v28 = vadd.f32 %v534_v47, %v457_v25  ;;  %v555_v32 = vadd.f32 %v537_v57, %v458_v26  ;;  %v568_v49 = vunpack.c.l.bf16 %v1297_v46 }
  0x32   : > { %v556_v0 = vadd.f32 %v540_v63, %v459_v27  ;;  %v569_v1 = vunpack.c.h.bf16 %v1297_v46  ;;  %v570_v2 = vunpack.c.l.bf16 %v1299_v56  ;;  %v571_v53 = vunpack.c.h.bf16 %v1299_v56  ;;  %v1609_v27 = vld [vmem:[%s1467_s8 + $0x14] sm:$0x1] }
  0x33   : > { %v572_v54 = vunpack.c.l.bf16 %v1301_v61  ;;  %v573_v55 = vunpack.c.h.bf16 %v1301_v61  ;;  %v574_v3 = vunpack.c.l.bf16 %v1303_v62  ;;  %v575_v33 = vunpack.c.h.bf16 %v1303_v62 }
  0x34   : > { %v582_v25 = vmul.f32 %v1306_v48, %v568_v49  ;;  %v583_v4 = vmul.f32 %v1306_v48, %v569_v1  ;;  %v584_v26 = vmul.f32 %v1306_v48, %v570_v2  ;;  %v585_v34 = vmul.f32 %v1306_v48, %v571_v53 }
  0x35   : > { %v586_v6 = vmul.f32 %v1306_v48, %v572_v54  ;;  %v587_v35 = vmul.f32 %v1306_v48, %v573_v55  ;;  %v588_v7 = vmul.f32 %v1306_v48, %v574_v3  ;;  %v589_v8 = vmul.f32 %v1306_v48, %v575_v33 }
  0x36   : > { %v590_v37 = vadd.f32 %v582_v25, %v549_v51  ;;  %v591_v17 = vadd.f32 %v583_v4, %v550_v52  ;;  %v1620_v38 = vadd.f32 %v584_v26, %v551_v58  ;;  %v1622_v22 = vadd.f32 %v585_v34, %v552_v59  ;;  %v1317_v34 = vld [vmem:[%s1467_s8 + $0x8] sm:$0xe] }
  0x37   : > { %v594_v40 = vadd.f32 %v586_v6, %v553_v60  ;;  %v1633_v14 = vadd.f32 %v587_v35, %v554_v28  ;;  %v1635_v24 = vadd.f32 %v588_v7, %v555_v32  ;;  %v1637_v41 = vadd.f32 %v589_v8, %v556_v0  ;;  %v1318_v6 = vld [vmem:[%s1467_s8 + $0x10] sm:$0xe] }
  0x38   : > { %v608_v29 = vunpack.c.l.bf16 %v1606_v5  ;;  %v609_v42 = vunpack.c.l.bf16 %v1609_v27  ;;  %v610_v30 = vunpack.c.l.bf16 %v1612_v11  ;;  %v611_v43 = vunpack.c.l.bf16 %v1615_v12 }
  0x39   : > { %v612_v18 = vunpack.c.l.bf16 %v1618_v16  ;;  %v613_v31 = vunpack.c.l.bf16 %v1625_v39  ;;  %v614_v44 = vunpack.c.l.bf16 %v1628_v13  ;;  %v615_v19 = vunpack.c.l.bf16 %v1631_v23 }
  0x3a   : > { %v622_v20 = vmul.f32 %v1316_v15, %v568_v49  ;;  %v623_v21 = vmul.f32 %v1316_v15, %v608_v29  ;;  %v624_v36 = vmul.f32 %v1316_v15, %v569_v1  ;;  %v625_v45 = vmul.f32 %v1316_v15, %v609_v42 }
  0x3b   : > { %v626_v46 = vmul.f32 %v1316_v15, %v570_v2  ;;  %v627_v47 = vmul.f32 %v1316_v15, %v610_v30  ;;  %v628_v50 = vmul.f32 %v1316_v15, %v571_v53  ;;  %v629_v51 = vmul.f32 %v1316_v15, %v611_v43 }
  0x3c   : > { %v630_v52 = vmul.f32 %v1316_v15, %v572_v54  ;;  %v631_v56 = vmul.f32 %v1316_v15, %v612_v18  ;;  %v632_v57 = vmul.f32 %v1316_v15, %v573_v55  ;;  %v633_v58 = vmul.f32 %v1316_v15, %v613_v31 }
  0x3d   : > { %v634_v59 = vmul.f32 %v1316_v15, %v574_v3  ;;  %v635_v60 = vmul.f32 %v1316_v15, %v614_v44  ;;  %v636_v61 = vmul.f32 %v1316_v15, %v575_v33  ;;  %v637_v62 = vmul.f32 %v1316_v15, %v615_v19 }
  0x3e   : > { %v654_v63 = vrot.slane %v622_v20, 1  ;;  %v655_v28 = vrot.slane %v623_v21, 1  ;;  %v657_v32 = vrot.slane %v624_v36, 1  ;;  %v658_v48 = vrot.slane %v625_v45, 1  ;;  %v1319_v20 = vld [vmem:[%s1467_s8 + $0x18] sm:$0xe] }
  0x3f   : > { %v660_v49 = vrot.slane %v626_v46, 1  ;;  %v661_v0 = vrot.slane %v627_v47, 1  ;;  %v663_v1 = vrot.slane %v628_v50, 1  ;;  %v664_v2 = vrot.slane %v629_v51, 1  ;;  %v1320_v47 = vld [vmem:[%s1467_s8 + $0x20] sm:$0xe] }
  0x40   : > { %v656_v53 = vsel %vm419_vm0, %v654_v63, %v655_v28  ;;  %v659_v54 = vsel %vm419_vm0, %v657_v32, %v658_v48  ;;  %v666_v55 = vrot.slane %v630_v52, 1  ;;  %v667_v3 = vrot.slane %v631_v56, 1  ;;  %v1321_v50 = vld [vmem:[%s1467_s8 + $0x28] sm:$0xe] }
  0x41   : > { %v662_v33 = vsel %vm419_vm0, %v660_v49, %v661_v0  ;;  %v665_v25 = vsel %vm419_vm0, %v663_v1, %v664_v2  ;;  %v669_v4 = vrot.slane %v632_v57, 1  ;;  %v670_v26 = vrot.slane %v633_v58, 1  ;;  %v1322_v58 = vld [vmem:[%s1467_s8 + $0x30] sm:$0xe] }
  0x42   : > { %v668_v35 = vsel %vm419_vm0, %v666_v55, %v667_v3  ;;  %v672_v7 = vrot.slane %v634_v59, 1  ;;  %v673_v8 = vrot.slane %v635_v60, 1  ;;  %v675_v15 = vrot.slane %v636_v61, 1  ;;  %v1323_v59 = vld [vmem:[%s1467_s8 + $0x38] sm:$0xe] }
  0x43   : > { %v671_v21 = vsel %vm419_vm0, %v669_v4, %v670_v26  ;;  %v676_v36 = vrot.slane %v637_v62, 1  ;;  %v1675_v45 = vadd.f32 %v656_v53, %v590_v37  ;;  %v1677_v46 = vadd.f32 %v659_v54, %v591_v17  ;;  %v1324_v60 = vld [vmem:[%s1467_s8 + $0x40] sm:$0xe]  ;;  %v1326_v62 = vld [vmem:[%s1940_s1 + $0x5] ss:$0 sm:$0xff] }
  0x44   : > { %v674_v51 = vsel %vm419_vm0, %v672_v7, %v673_v8  ;;  %v1683_v52 = vadd.f32 %v662_v33, %v1620_v38  ;;  %v689_v56 = vadd.f32 %v665_v25, %v1622_v22  ;;  %v690_v57 = vadd.f32 %v668_v35, %v594_v40 }
  0x45   : > { %v677_v61 = vsel %vm419_vm0, %v675_v15, %v676_v36  ;;  %v691_v37 = vadd.f32 %v671_v21, %v1633_v14  ;;  %v692_v17 = vadd.f32 %v674_v51, %v1635_v24  ;;  %v704_v63 = vunpack.c.l.bf16 %v1317_v34  ;;  %v1327_v21 = vld [vmem:[%s1467_s8 + $0x10] ss:$8 sps:$4 sm:$0xff]  }
  0x46   : > { %v693_v38 = vadd.f32 %v677_v61, %v1637_v41  ;;  %v705_v28 = vunpack.c.l.bf16 %v1318_v6  ;;  %v706_v32 = vunpack.c.l.bf16 %v1319_v20  ;;  %v707_v22 = vunpack.c.l.bf16 %v1320_v47 }
  0x47   : > { %v708_v40 = vunpack.c.l.bf16 %v1321_v50  ;;  %v709_v48 = vunpack.c.l.bf16 %v1322_v58  ;;  %v710_v49 = vunpack.c.l.bf16 %v1323_v59  ;;  %v711_v0 = vunpack.c.l.bf16 %v1324_v60  ;;  %v1329_v58 = vld [vmem:[%s1467_s8 + $0x20] ss:$8 sps:$4 sm:$0xff]  }
  0x48   : > { %v718_v1 = vmul.f32 %v1326_v62, %v704_v63  ;;  %v719_v14 = vmul.f32 %v1326_v62, %v608_v29  ;;  %v720_v2 = vmul.f32 %v1326_v62, %v705_v28  ;;  %v721_v24 = vmul.f32 %v1326_v62, %v609_v42  ;;  %v1331_v63 = vld [vmem:[%s1467_s8 + $0x30] ss:$8 sps:$4 sm:$0xff]   ;;  %v1333_v28 = vld [vmem:[%s1467_s8 + $0x40] ss:$8 sps:$4 sm:$0xff]  }
  0x49   : > { %v722_v53 = vmul.f32 %v1326_v62, %v706_v32  ;;  %v723_v54 = vmul.f32 %v1326_v62, %v610_v30  ;;  %v724_v41 = vmul.f32 %v1326_v62, %v707_v22  ;;  %v725_v55 = vmul.f32 %v1326_v62, %v611_v43 }
  0x4a   : > { %v726_v3 = vmul.f32 %v1326_v62, %v708_v40  ;;  %v727_v33 = vmul.f32 %v1326_v62, %v612_v18  ;;  %v728_v25 = vmul.f32 %v1326_v62, %v709_v48  ;;  %v729_v5 = vmul.f32 %v1326_v62, %v613_v31 }
  0x4b   : > { %v730_v29 = vmul.f32 %v1326_v62, %v710_v49  ;;  %v731_v27 = vmul.f32 %v1326_v62, %v614_v44  ;;  %v732_v42 = vmul.f32 %v1326_v62, %v711_v0  ;;  %v733_v11 = vmul.f32 %v1326_v62, %v615_v19 }
  0x4c   : > { %v750_v30 = vrot.slane %v718_v1, 2  ;;  %v751_v4 = vrot.slane %v719_v14, 2  ;;  %v753_v12 = vrot.slane %v720_v2, 2  ;;  %v754_v43 = vrot.slane %v721_v24, 2 }
  0x4d   : > { %v756_v26 = vrot.slane %v722_v53, 2  ;;  %v757_v16 = vrot.slane %v723_v54, 2  ;;  %v759_v18 = vrot.slane %v724_v41, 2  ;;  %v760_v34 = vrot.slane %v725_v55, 2  ;;  %v1731_v53 = vld [vmem:[%s1467_s8 + $0x14] sm:$0x1] }
  0x4e   : > { %v752_v39 = vsel %vm516_vm1, %v750_v30, %v751_v4  ;;  %v755_v31 = vsel %vm516_vm1, %v753_v12, %v754_v43  ;;  %v762_v13 = vrot.slane %v726_v3, 2  ;;  %v763_v44 = vrot.slane %v727_v33, 2  ;;  %v1737_v33 = vld [vmem:[%s1467_s8 + $0x24] sm:$0x1]  ;;  %v1750_v30 = vld [vmem:[%s1467_s8 + $0x3c] sm:$0x1] }
  0x4f   : > { %v758_v6 = vsel %vm516_vm1, %v756_v26, %v757_v16  ;;  %v761_v23 = vsel %vm516_vm1, %v759_v18, %v760_v34  ;;  %v765_v19 = vrot.slane %v728_v25, 2  ;;  %v766_v35 = vrot.slane %v729_v5, 2  ;;  %v1740_v25 = vld [vmem:[%s1467_s8 + $0x2c] sm:$0x1]  ;;  %v1743_v5 = vld [vmem:[%s1467_s8 + $0x34] sm:$0x1] }
  0x50   : > { %v764_v7 = vsel %vm516_vm1, %v762_v13, %v763_v44  ;;  %v768_v8 = vrot.slane %v730_v29, 2  ;;  %v769_v15 = vrot.slane %v731_v27, 2  ;;  %v771_v20 = vrot.slane %v732_v42, 2  ;;  %v1753_v4 = vld [vmem:[%s1467_s8 + $0x44] sm:$0x1] }
  0x51   : > { %v767_v36 = vsel %vm516_vm1, %v765_v19, %v766_v35  ;;  %v772_v47 = vrot.slane %v733_v11, 2  ;;  %v782_v50 = vadd.f32 %v752_v39, %v1675_v45  ;;  %v783_v51 = vadd.f32 %v755_v31, %v1677_v46  ;;  %v1336_v45 = vld [vmem:[%s1940_s1 + $0x6] ss:$0 sm:$0xff]  ;;  %v1756_v12 = vld [vmem:[%s1467_s8 + $0x4c] sm:$0x1] }
  0x52   : > { %v770_v59 = vsel %vm516_vm1, %v768_v8, %v769_v15  ;;  %v784_v60 = vadd.f32 %v758_v6, %v1683_v52  ;;  %v785_v61 = vadd.f32 %v761_v23, %v689_v56  ;;  %v786_v62 = vadd.f32 %v764_v7, %v690_v57  ;;  %v1346_v34 = vld [vmem:[%s1940_s1 + $0x7] ss:$0 sm:$0xff] }
  0x53   : > { %v773_v32 = vsel %vm516_vm1, %v771_v20, %v772_v47  ;;  %v787_v22 = vadd.f32 %v767_v36, %v691_v37  ;;  %v788_v40 = vadd.f32 %v770_v59, %v692_v17  ;;  %v801_v46 = vunpack.c.l.bf16 %v1327_v21 }
  0x54   : > { %v789_v48 = vadd.f32 %v773_v32, %v693_v38  ;;  %v802_v49 = vunpack.c.h.bf16 %v1327_v21  ;;  %v803_v0 = vunpack.c.l.bf16 %v1329_v58  ;;  %v804_v52 = vunpack.c.h.bf16 %v1329_v58  ;;  %v1734_v38 = vld [vmem:[%s1467_s8 + $0x1c] sm:$0x1] }
  0x55   : > { %v805_v56 = vunpack.c.l.bf16 %v1331_v63  ;;  %v806_v57 = vunpack.c.h.bf16 %v1331_v63  ;;  %v807_v1 = vunpack.c.l.bf16 %v1333_v28  ;;  %v808_v14 = vunpack.c.h.bf16 %v1333_v28 }
  0x56   : > { %v815_v37 = vmul.f32 %v1336_v45, %v801_v46  ;;  %v816_v2 = vmul.f32 %v1336_v45, %v802_v49  ;;  %v817_v17 = vmul.f32 %v1336_v45, %v803_v0  ;;  %v818_v24 = vmul.f32 %v1336_v45, %v804_v52 }
  0x57   : > { %v819_v54 = vmul.f32 %v1336_v45, %v805_v56  ;;  %v820_v41 = vmul.f32 %v1336_v45, %v806_v57  ;;  %v821_v55 = vmul.f32 %v1336_v45, %v807_v1  ;;  %v822_v3 = vmul.f32 %v1336_v45, %v808_v14 }
  0x58   : > { %v823_v29 = vadd.f32 %v815_v37, %v782_v50  ;;  %v824_v27 = vadd.f32 %v816_v2, %v783_v51  ;;  %v1745_v42 = vadd.f32 %v817_v17, %v784_v60  ;;  %v1747_v11 = vadd.f32 %v818_v24, %v785_v61  ;;  %v1347_v24 = vld [vmem:[%s1467_s8 + $0x10] sm:$0xe] }
  0x59   : > { %v827_v43 = vadd.f32 %v819_v54, %v786_v62  ;;  %v1758_v26 = vadd.f32 %v820_v41, %v787_v22  ;;  %v1760_v16 = vadd.f32 %v821_v55, %v788_v40  ;;  %v1762_v18 = vadd.f32 %v822_v3, %v789_v48  ;;  %v1348_v54 = vld [vmem:[%s1467_s8 + $0x18] sm:$0xe] }
  0x5a   : > { %v841_v39 = vunpack.c.l.bf16 %v1731_v53  ;;  %v842_v31 = vunpack.c.l.bf16 %v1734_v38  ;;  %v843_v13 = vunpack.c.l.bf16 %v1737_v33  ;;  %v844_v44 = vunpack.c.l.bf16 %v1740_v25 }
  0x5b   : > { %v845_v6 = vunpack.c.l.bf16 %v1743_v5  ;;  %v846_v23 = vunpack.c.l.bf16 %v1750_v30  ;;  %v847_v19 = vunpack.c.l.bf16 %v1753_v4  ;;  %v848_v35 = vunpack.c.l.bf16 %v1756_v12 }
  0x5c   : > { %v855_v7 = vmul.f32 %v1346_v34, %v801_v46  ;;  %v856_v8 = vmul.f32 %v1346_v34, %v841_v39  ;;  %v857_v15 = vmul.f32 %v1346_v34, %v802_v49  ;;  %v858_v20 = vmul.f32 %v1346_v34, %v842_v31 }
  0x5d   : > { %v859_v21 = vmul.f32 %v1346_v34, %v803_v0  ;;  %v860_v36 = vmul.f32 %v1346_v34, %v843_v13  ;;  %v861_v47 = vmul.f32 %v1346_v34, %v804_v52  ;;  %v862_v50 = vmul.f32 %v1346_v34, %v844_v44 }
  0x5e   : > { %v863_v51 = vmul.f32 %v1346_v34, %v805_v56  ;;  %v864_v58 = vmul.f32 %v1346_v34, %v845_v6  ;;  %v865_v59 = vmul.f32 %v1346_v34, %v806_v57  ;;  %v866_v60 = vmul.f32 %v1346_v34, %v846_v23 }
  0x5f   : > { %v867_v61 = vmul.f32 %v1346_v34, %v807_v1  ;;  %v868_v62 = vmul.f32 %v1346_v34, %v847_v19  ;;  %v869_v63 = vmul.f32 %v1346_v34, %v808_v14  ;;  %v870_v28 = vmul.f32 %v1346_v34, %v848_v35 }
  0x60   : > { %v887_v32 = vrot.slane %v855_v7, 1  ;;  %v888_v22 = vrot.slane %v856_v8, 1  ;;  %v890_v40 = vrot.slane %v857_v15, 1  ;;  %v891_v45 = vrot.slane %v858_v20, 1  ;;  %v1349_v7 = vld [vmem:[%s1467_s8 + $0x20] sm:$0xe] }
  0x61   : > { %v893_v46 = vrot.slane %v859_v21, 1  ;;  %v894_v48 = vrot.slane %v860_v36, 1  ;;  %v896_v49 = vrot.slane %v861_v47, 1  ;;  %v897_v0 = vrot.slane %v862_v50, 1  ;;  %v1350_v36 = vld [vmem:[%s1467_s8 + $0x28] sm:$0xe] }
  0x62   : > { %v889_v52 = vsel %vm419_vm0, %v887_v32, %v888_v22  ;;  %v892_v56 = vsel %vm419_vm0, %v890_v40, %v891_v45  ;;  %v899_v57 = vrot.slane %v863_v51, 1  ;;  %v900_v1 = vrot.slane %v864_v58, 1  ;;  %v1351_v47 = vld [vmem:[%s1467_s8 + $0x30] sm:$0xe] }
  0x63   : > { %v895_v14 = vsel %vm419_vm0, %v893_v46, %v894_v48  ;;  %v898_v37 = vsel %vm419_vm0, %v896_v49, %v897_v0  ;;  %v902_v2 = vrot.slane %v865_v59, 1  ;;  %v903_v17 = vrot.slane %v866_v60, 1  ;;  %v1352_v60 = vld [vmem:[%s1467_s8 + $0x38] sm:$0xe] }
  0x64   : > { %v901_v41 = vsel %vm419_vm0, %v899_v57, %v900_v1  ;;  %v905_v55 = vrot.slane %v867_v61, 1  ;;  %v906_v3 = vrot.slane %v868_v62, 1  ;;  %v908_v34 = vrot.slane %v869_v63, 1  ;;  %v1353_v61 = vld [vmem:[%s1467_s8 + $0x40] sm:$0xe] }
  0x65   : > { %v904_v8 = vsel %vm419_vm0, %v902_v2, %v903_v17  ;;  %v909_v15 = vrot.slane %v870_v28, 1  ;;  %v1800_v20 = vadd.f32 %v889_v52, %v823_v29  ;;  %v1802_v21 = vadd.f32 %v892_v56, %v824_v27  ;;  %v1354_v62 = vld [vmem:[%s1467_s8 + $0x48] sm:$0xe] }
  0x66   : > { %v907_v50 = vsel %vm419_vm0, %v905_v55, %v906_v3  ;;  %v1808_v51 = vadd.f32 %v895_v14, %v1745_v42  ;;  %v1811_v58 = vadd.f32 %v898_v37, %v1747_v11  ;;  %v1813_v59 = vadd.f32 %v901_v41, %v827_v43  ;;  %v1356_v42 = vld [vmem:[%s1940_s1 + $0x8] ss:$0 sm:$0xff] }
  0x67   : > { %v910_v29 = vsel %vm419_vm0, %v908_v34, %v909_v15  ;;  %v1820_v27 = vadd.f32 %v904_v8, %v1758_v26  ;;  %v1823_v63 = vadd.f32 %v907_v50, %v1760_v16  ;;  %v937_v28 = vunpack.c.l.bf16 %v1347_v24  ;;  %v1357_v8 = vld [vmem:[%s1941_s2] ss:$0 sm:$0xff] }
  0x68   : > { %v1829_v11 = vadd.f32 %v910_v29, %v1762_v18  ;;  %v938_v43 = vunpack.c.l.bf16 %v1348_v54  ;;  %v939_v32 = vunpack.c.l.bf16 %v1349_v7  ;;  %v940_v22 = vunpack.c.l.bf16 %v1350_v36 }
  0x69   : > { %v941_v40 = vunpack.c.l.bf16 %v1351_v47  ;;  %v942_v45 = vunpack.c.l.bf16 %v1352_v60  ;;  %v943_v46 = vunpack.c.l.bf16 %v1353_v61  ;;  %v944_v48 = vunpack.c.l.bf16 %v1354_v62 }
  0x6a   : > { %v951_v26 = vmul.f32 %v1356_v42, %v937_v28  ;;  %v952_v16 = vmul.f32 %v1356_v42, %v841_v39  ;;  %v953_v49 = vmul.f32 %v1356_v42, %v938_v43  ;;  %v954_v0 = vmul.f32 %v1356_v42, %v842_v31 }
  0x6b   : > { %v955_v52 = vmul.f32 %v1356_v42, %v939_v32  ;;  %v956_v18 = vmul.f32 %v1356_v42, %v843_v13  ;;  %v957_v56 = vmul.f32 %v1356_v42, %v940_v22  ;;  %v958_v57 = vmul.f32 %v1356_v42, %v844_v44  ;;  %v1039_v32 = vld [vmem:[%s1865_s13] sm:$0xff]  ;;  %v1388_v22 = vld [vmem:[%s1856_s10 + $0x8] sm:$0xff]  }
  0x6c   : > { %v959_v1 = vmul.f32 %v1356_v42, %v941_v40  ;;  %v960_v14 = vmul.f32 %v1356_v42, %v845_v6  ;;  %v961_v53 = vmul.f32 %v1356_v42, %v942_v45  ;;  %v962_v39 = vmul.f32 %v1356_v42, %v846_v23  ;;  %v1040_v45 = vld [vmem:[%s1865_s13 + $0x8] sm:$0xff] }
  0x6d   : > { %v963_v37 = vmul.f32 %v1356_v42, %v943_v46  ;;  %v964_v38 = vmul.f32 %v1356_v42, %v847_v19  ;;  %v965_v31 = vmul.f32 %v1356_v42, %v944_v48  ;;  %v966_v33 = vmul.f32 %v1356_v42, %v848_v35  ;;  %v1373_v42 = vld [vmem:[%s1856_s10] sm:$0xff]   ;;  %v1389_v46 = vld [vmem:[%s1856_s10 + $0x10] sm:$0xff]   ;;  %v1390_v48 = vld [vmem:[%s1856_s10 + $0x18] sm:$0xff]  }
  0x6e   : > { %v983_v25 = vrot.slane %v951_v26, 2  ;;  %v984_v13 = vrot.slane %v952_v16, 2  ;;  %v986_v44 = vrot.slane %v953_v49, 2  ;;  %v987_v5 = vrot.slane %v954_v0, 2  ;;  %v1041_v49 = vld [vmem:[%s1865_s13 + $0x10] sm:$0xff]  ;;  %v1043_v0 = vld [vmem:[%s1865_s13 + $0x20] sm:$0xff] }
  0x6f   : > { %v989_v6 = vrot.slane %v955_v52, 2  ;;  %v990_v2 = vrot.slane %v956_v18, 2  ;;  %v992_v30 = vrot.slane %v957_v56, 2  ;;  %v993_v23 = vrot.slane %v958_v57, 2  ;;  %v1044_v56 = vld [vmem:[%s1865_s13 + $0x28] sm:$0xff]  ;;  %v1045_v57 = vld [vmem:[%s1865_s13 + $0x30] sm:$0xff] }
  0x70   : > { %v985_v17 = vsel %vm516_vm1, %v983_v25, %v984_v13  ;;  %v988_v4 = vsel %vm516_vm1, %v986_v44, %v987_v5  ;;  %v995_v19 = vrot.slane %v959_v1, 2  ;;  %v996_v24 = vrot.slane %v960_v14, 2  ;;  %v1046_v1 = vld [vmem:[%s1865_s13 + $0x38] sm:$0xff] }
  0x71   : > { %v991_v12 = vsel %vm516_vm1, %v989_v6, %v990_v2  ;;  %v994_v35 = vsel %vm516_vm1, %v992_v30, %v993_v23  ;;  %v998_v54 = vrot.slane %v961_v53, 2  ;;  %v999_v41 = vrot.slane %v962_v39, 2 }
  0x72   : > { %v997_v55 = vsel %vm516_vm1, %v995_v19, %v996_v24  ;;  %v1001_v3 = vrot.slane %v963_v37, 2  ;;  %v1002_v34 = vrot.slane %v964_v38, 2  ;;  %v1004_v7 = vrot.slane %v965_v31, 2 }
  0x73   : > { %v1000_v15 = vsel %vm516_vm1, %v998_v54, %v999_v41  ;;  %v1005_v36 = vrot.slane %v966_v33, 2  ;;  %v1015_v47 = vadd.f32 %v985_v17, %v1800_v20  ;;  %v1016_v50 = vadd.f32 %v988_v4, %v1802_v21 }
  0x74   : > { %v1003_v60 = vsel %vm516_vm1, %v1001_v3, %v1002_v34  ;;  %v1017_v61 = vadd.f32 %v991_v12, %v1808_v51  ;;  %v1018_v62 = vadd.f32 %v994_v35, %v1811_v58  ;;  %v1019_v29 = vadd.f32 %v997_v55, %v1813_v59 }
  0x75   : > { %v1006_v28 = vsel %vm516_vm1, %v1004_v7, %v1005_v36  ;;  %v1020_v43 = vadd.f32 %v1000_v15, %v1820_v27  ;;  %v1021_v20 = vadd.f32 %v1003_v60, %v1823_v63  ;;  %v1030_v21 = vadd.f32 %v1357_v8, %v1015_v47  ;;  %v1042_v63 = vld [vmem:[%s1865_s13 + $0x18] sm:$0xff] }
  0x76   : > { %v1022_v51 = vadd.f32 %v1006_v28, %v1829_v11  ;;  %v1031_v58 = vadd.f32 %v1357_v8, %v1016_v50  ;;  %v1032_v59 = vadd.f32 %v1357_v8, %v1017_v61  ;;  %v1033_v40 = vadd.f32 %v1357_v8, %v1018_v62 }
  0x77   : > { %v1034_v26 = vadd.f32 %v1357_v8, %v1019_v29  ;;  %v1035_v27 = vadd.f32 %v1357_v8, %v1020_v43  ;;  %v1036_v16 = vadd.f32 %v1357_v8, %v1021_v20  ;;  %v1374_v52 = vunpack.c.l.bf16 %v1373_v42 }
  0x78   : > { %v1037_v18 = vadd.f32 %v1357_v8, %v1022_v51  ;;  %v1375_v11 = vunpack.c.h.bf16 %v1373_v42  ;;  %v1378_v14 = vunpack.c.l.bf16 %v1388_v22  ;;  %v1379_v53 = vunpack.c.h.bf16 %v1388_v22 }
  0x79   : > { %v1382_v39 = vunpack.c.l.bf16 %v1389_v46  ;;  %v1383_v37 = vunpack.c.h.bf16 %v1389_v46  ;;  %v1386_v38 = vunpack.c.l.bf16 %v1390_v48  ;;  %v1387_v31 = vunpack.c.h.bf16 %v1390_v48 }
  0x7a   : > { %v1069_v33 = vmul.f32 %v1475_v9, %v1039_v32  ;;  %v1070_v25 = vmul.f32 %v1475_v9, %v1040_v45  ;;  %v1071_v13 = vmul.f32 %v1475_v9, %v1041_v49  ;;  %v1072_v44 = vmul.f32 %v1475_v9, %v1042_v63 }
  0x7b   : > { %v1073_v5 = vmul.f32 %v1475_v9, %v1043_v0  ;;  %v1074_v6 = vmul.f32 %v1475_v9, %v1044_v56  ;;  %v1075_v2 = vmul.f32 %v1475_v9, %v1045_v57  ;;  %v1076_v30 = vmul.f32 %v1475_v9, %v1046_v1 }
  0x7c   : > { %v1077_v23 = vsub.f32 1.0, %v1374_v52  ;;  %v1078_v17 = vsub.f32 1.0, %v1375_v11  ;;  %v1079_v4 = vsub.f32 1.0, %v1378_v14  ;;  %v1080_v19 = vsub.f32 1.0, %v1379_v53 }
  0x7d   : > { %v1081_v24 = vsub.f32 1.0, %v1382_v39  ;;  %v1082_v12 = vsub.f32 1.0, %v1383_v37  ;;  %v1083_v35 = vsub.f32 1.0, %v1386_v38  ;;  %v1084_v54 = vsub.f32 1.0, %v1387_v31 }
  0x7e   : > { %v1085_v41 = vmul.f32 %v1077_v23, %v1069_v33  ;;  %v1086_v55 = vmul.f32 %v1078_v17, %v1070_v25  ;;  %v1087_v3 = vmul.f32 %v1079_v4, %v1071_v13  ;;  %v1088_v34 = vmul.f32 %v1080_v19, %v1072_v44 }
  0x7f   : > { %v1089_v7 = vmul.f32 %v1081_v24, %v1073_v5  ;;  %v1090_v8 = vmul.f32 %v1082_v12, %v1074_v6  ;;  %v1091_v15 = vmul.f32 %v1083_v35, %v1075_v2  ;;  %v1092_v36 = vmul.f32 %v1084_v54, %v1076_v30 }
  0x80   : > { %v1100_v9 = vmul.f32 %v1477_v10, %v1030_v21  ;;  %v1101_v47 = vmul.f32 %v1477_v10, %v1031_v58  ;;  %v1102_v50 = vmul.f32 %v1477_v10, %v1032_v59  ;;  %v1103_v60 = vmul.f32 %v1477_v10, %v1033_v40 }
  0x81   : > { %v1104_v61 = vmul.f32 %v1477_v10, %v1034_v26  ;;  %v1105_v62 = vmul.f32 %v1477_v10, %v1035_v27  ;;  %v1106_v29 = vmul.f32 %v1477_v10, %v1036_v16  ;;  %v1107_v42 = vmul.f32 %v1477_v10, %v1037_v18 }
  0x82   : > { %v1108_v28 = vadd.f32 %v1100_v9, %v1085_v41  ;;  %v1109_v43 = vadd.f32 %v1101_v47, %v1086_v55  ;;  %v1110_v20 = vadd.f32 %v1102_v50, %v1087_v3  ;;  %v1111_v21 = vadd.f32 %v1103_v60, %v1088_v34 }
  0x83   : > { %v1112_v32 = vadd.f32 %v1104_v61, %v1089_v7  ;;  %v1113_v22 = vadd.f32 %v1105_v62, %v1090_v8  ;;  %v1114_v51 = vadd.f32 %v1106_v29, %v1091_v15  ;;  %v1115_v58 = vadd.f32 %v1107_v42, %v1092_v36 }
  0x84   : > { %1125 = vst.msk [vmem:[%s326_s18] sm:$0xff] %vm1124_vm2, %v1108_v28  ;;  %1126 = vst.msk [vmem:[%s326_s18 + $0x8] sm:$0xff] %vm1124_vm2, %v1109_v43  ;;  %vm1116_vm4 = vcmp.gt.f32.partialorder %v1108_v28, 0.1  ;;  %vm1117_vm5 = vcmp.gt.f32.partialorder %v1109_v43, 0.1 }
  0x85   : > { %1127 = vst.msk [vmem:[%s326_s18 + $0x10] sm:$0xff] %vm1124_vm2, %v1110_v20  ;;  %1128 = vst.msk [vmem:[%s326_s18 + $0x18] sm:$0xff] %vm1124_vm2, %v1111_v21  ;;  %vm1118_vm6 = vcmp.gt.f32.partialorder %v1110_v20, 0.1  ;;  %v1409_v10 = vmov 0.0  }
  0x86   : > { %1129 = vst.msk [vmem:[%s326_s18 + $0x20] sm:$0xff] %vm1124_vm2, %v1112_v32  ;;  %1130 = vst.msk [vmem:[%s326_s18 + $0x28] sm:$0xff] %vm1124_vm2, %v1113_v22  ;;  %v1358_v59 = vsel %vm1116_vm4, 1.0, %v1409_v10  ;;  %v1359_v40 = vsel %vm1117_vm5, 1.0, %v1409_v10  ;;  %v1360_v45 = vsel %vm1118_vm6, 1.0, %v1409_v10 }
  0x87   : > { %1131 = vst.msk [vmem:[%s326_s18 + $0x30] sm:$0xff] %vm1124_vm2, %v1114_v51  ;;  %1132 = vst.msk [vmem:[%s326_s18 + $0x38] sm:$0xff] %vm1124_vm2, %v1115_v58  ;;  %vm1119_vm7 = vcmp.gt.f32.partialorder %v1111_v21, 0.1  ;;  %v1149_v46 = vpack.c.bf16 %v1358_v59, %v1358_v59  ;;  %v1150_v48 = vpack.c.bf16 %v1359_v40, %v1359_v40  ;;  %v1151_v26 = vpack.c.bf16 %v1360_v45, %v1360_v45 }
  0x88   : > { %v1361_v27 = vsel %vm1119_vm7, 1.0, %v1409_v10  ;;  %vm1120_vm8 = vcmp.gt.f32.partialorder %v1112_v32, 0.1  ;;  %vm1121_vm9 = vcmp.gt.f32.partialorder %v1113_v22, 0.1 }
  0x89   : > { %v1152_v16 = vpack.c.bf16 %v1361_v27, %v1361_v27  ;;  %vm1122_vm10 = vcmp.gt.f32.partialorder %v1114_v51, 0.1  ;;  %1158 = vst.msk [vmem:[%s331_s21] sm:$0xf] %vm1157_vm3, %v1149_v46  ;;  %1159 = vst.msk [vmem:[%s331_s21 + $0x4] sm:$0xf] %vm1157_vm3, %v1150_v48 }
  0x8a   : > { %1160 = vst.msk [vmem:[%s331_s21 + $0x8] sm:$0xf] %vm1157_vm3, %v1151_v26  ;;  %v1362_v49 = vsel %vm1120_vm8, 1.0, %v1409_v10  ;;  %v1363_v63 = vsel %vm1121_vm9, 1.0, %v1409_v10  ;;  %v1364_v0 = vsel %vm1122_vm10, 1.0, %v1409_v10 }
  0x8b   : > { %vm1123_vm11 = vcmp.gt.f32.partialorder %v1115_v58, 0.1  ;;  %1161 = vst.msk [vmem:[%s331_s21 + $0xc] sm:$0xf] %vm1157_vm3, %v1152_v16  ;;  %v1153_v52 = vpack.c.bf16 %v1362_v49, %v1362_v49  ;;  %v1154_v18 = vpack.c.bf16 %v1363_v63, %v1363_v63  ;;  %v1155_v56 = vpack.c.bf16 %v1364_v0, %v1364_v0 }
  0x8c   : > { %v1365_v57 = vsel %vm1123_vm11, 1.0, %v1409_v10 }
  0x8d   : > { %v1156_v1 = vpack.c.bf16 %v1365_v57, %v1365_v57  ;;  %1162 = vst.msk [vmem:[%s331_s21 + $0x10] sm:$0xf] %vm1157_vm3, %v1153_v52  ;;  %1163 = vst.msk [vmem:[%s331_s21 + $0x14] sm:$0xf] %vm1157_vm3, %v1154_v18 }
  0x8e   : > { %1164 = vst.msk [vmem:[%s331_s21 + $0x18] sm:$0xf] %vm1157_vm3, %v1155_v56 }
  0x8f   : > { %1165 = vst.msk [vmem:[%s331_s21 + $0x1c] sm:$0xf] %vm1157_vm3, %v1156_v1 }
  0x90 PF: > { %s18_s24 = sadd.s32 1, %s1407_s24  }
  0x91   : > { %p15_p4 = scmp.ge.s32.totalorder %s18_s24, 4  }
  0x93   :  { %17 = sbr.rel (!%p15_p4) target bundleno = 1 (0x1), region = 102 }

// kernel: snn_forward.10
= control target key start
LH: loop header
LB: loop body
LE: loop exit
PB: predicated region body
PF: predicated region fallthrough
CT: control target
= control target key end

     0   :  { %v223_v0 = vmov 0.0   ;;  %vm224_vm0 = vmmov 0   ;;  %v143_v10 = vlaneseq  ;;  %s310_s1 = inlined_call_operand.vmem [shape: bf16[128,128], index: 1, kind: input, shape index: {}]   ;;  %s311_s0 = inlined_call_operand.vmem [shape: bf16[8,128], index: 0, kind: input, shape index: {}]   ;;  %s312_s3 = inlined_call_operand.vmem [shape: f32[1,128], index: 3, kind: input, shape index: {}]   ;;  %s313_s5 = inlined_call_operand.vmem [shape: bf16[8,128], index: 5, kind: input, shape index: {}, may-alias: {5,7}]   ;;  %s314_s4 = inlined_call_operand.vmem [shape: f32[8,128], index: 4, kind: input, shape index: {}, may-alias: {4,6}]   ;;  %s315_s2 = inlined_call_operand.vmem [shape: f32[1,128], index: 2, kind: input, shape index: {}]   ;;  %s316_s6 = inlined_call_operand.vmem [shape: f32[8,128], index: 6, kind: output, shape index: {0}, may-alias: {4,6}]   ;;  %s317_s7 = inlined_call_operand.vmem [shape: bf16[8,128], index: 7, kind: output, shape index: {1}, may-alias: {5,7}]  }
   0x1   :  { %193 = vmatprep.subr.bf16.mxu0 %v223_v0  ;;  %v215_v1 = vld [vmem:[%s310_s1] sm:$0xff]   ;;  %209 = vmatprep.mubr.msk.bf16.mxu0 %vm224_vm0, %v223_v0  ;;  %v216_v2 = vld [vmem:[%s310_s1 + $0x8] sm:$0xff]   ;;  %v217_v3 = vld [vmem:[%s310_s1 + $0x10] sm:$0xff]  }
   0x2   :  { %194 = vmatpush3.bf16.msra.mxu0 %v215_v1  ;;  %v218_v4 = vld [vmem:[%s310_s1 + $0x18] sm:$0xff]   ;;  %v219_v5 = vld [vmem:[%s310_s1 + $0x20] sm:$0xff]   ;;  %v220_v6 = vld [vmem:[%s310_s1 + $0x28] sm:$0xff]   ;;  %v144_v11 = vshrl.u32 %v143_v10, 7 }
   0x3   :  { %195 = vmatprep.subr.bf16.mxu0 %v223_v0  ;;  %v221_v7 = vld [vmem:[%s310_s1 + $0x30] sm:$0xff]   ;;  %v222_v8 = vld [vmem:[%s310_s1 + $0x38] sm:$0xff]   ;;  %v26_v9 = vld [vmem:[%s311_s0] sm:$0xf] }
   0x4   :  { %v145_v12 = vsub.s32 0, %v144_v11  ;;  %v138_v13 = vld [vmem:[%s312_s3] sm:$0x1] }
   0x5   :  { %v140_v14 = vld [vmem:[%s313_s5] sm:$0xf]  ;;  %v151_v18 = vsub.f32 1.0, %v138_v13 }
   0x6   :  { %196 = vmatpush3.bf16.msra.mxu0 %v216_v2  ;;  %v141_v15 = vunpack.c.l.bf16 %v140_v14  ;;  %v146_v16 = vrot.slane %v138_v13, %v145_v12  ;;  %v139_v17 = vld [vmem:[%s314_s4] sm:$0xff] }
   0x7   :  { %197 = vmatprep.subr.bf16.mxu0 %v223_v0  ;;  %v174_v21 = vld [vmem:[%s315_s2] ss:$0 sm:$0xff]  ;;  %v156_v22 = vrot.slane %v151_v18, %v145_v12 }
   0x8   :  { %v148_v19 = vmul.f32 %v146_v16, %v139_v17  ;;  %v149_v20 = vsub.f32 1.0, %v141_v15 }
   0xa   :  { %198 = vmatpush3.bf16.msra.mxu0 %v217_v3  ;;  %v150_v25 = vmul.f32 %v149_v20, %v148_v19 }
   0xb   :  { %199 = vmatprep.subr.bf16.mxu0 %v223_v0 }
   0xe   :  { %200 = vmatpush3.bf16.msra.mxu0 %v218_v4 }
   0xf   :  { %201 = vmatprep.subr.bf16.mxu0 %v223_v0 }
  0x12   :  { %202 = vmatpush3.bf16.msra.mxu0 %v219_v5 }
  0x13   :  { %203 = vmatprep.subr.bf16.mxu0 %v223_v0 }
  0x16   :  { %204 = vmatpush3.bf16.msra.mxu0 %v220_v6 }
  0x17   :  { %205 = vmatprep.subr.bf16.mxu0 %v223_v0 }
  0x1a   :  { %206 = vmatpush3.bf16.msra.mxu0 %v221_v7 }
  0x1b   :  { %207 = vmatprep.subr.bf16.mxu0 %v223_v0 }
  0x1e   :  { %208 = vmatpush3.bf16.msra.mxu0 %v222_v8 }
  0x21   :  { %210 = vmatmul.mubr.bf16.vlgmr.msra.gmra.mrb[0].mxu0 %v26_v9 }
  0xf4   :  { %v132_v23 = vpop.f32.mrb[0].mxu0 }
  0xf5   :  { %v133_v24 = vadd.f32 %v174_v21, %v132_v23  ;;  %v211_v26 = vpop.f32.mrb[1].mxu0 }
  0xf6   :  { %v135_v27 = vpop.f32.mrb[2].mxu0 }
  0xf7   :  { %v158_v28 = vmul.f32 %v156_v22, %v133_v24  ;;  %v212_v29 = vpop.f32.mrb[3].mxu0 }
  0xf9   :  { %v159_v30 = vadd.f32 %v158_v28, %v150_v25 }
  0xfb   :  { %vm160_vm1 = vcmp.gt.f32.partialorder %v159_v30, 0.1  ;;  %161 = vst [vmem:[%s316_s6] sm:$0xff] %v159_v30 }
  0xfc   :  { %v183_v31 = vsel %vm160_vm1, 1.0, %v223_v0 }
  0xfd   :  { %v164_v32 = vpack.c.bf16 %v183_v31, %v183_v31 }
  0xff   :  { %165 = vst [vmem:[%s317_s7] sm:$0xf] %v164_v32 }

// kernel: snn_forward.9
= control target key start
LH: loop header
LB: loop body
LE: loop exit
PB: predicated region body
PF: predicated region fallthrough
CT: control target
= control target key end

     0   :  { %s1082_s13 = smov 0   ;;  %s1315_s0 = inlined_call_operand.vmem [shape: bf16[2,5,5,128], index: 0, kind: input, shape index: {}]   ;;  %s1316_s1 = inlined_call_operand.vmem [shape: bf16[2,5,5,128], index: 1, kind: input, shape index: {}]   ;;  %s1317_s2 = inlined_call_operand.vmem [shape: bf16[2,5,5,128], index: 2, kind: input, shape index: {}]   ;;  %s1318_s3 = inlined_call_operand.vmem [shape: bf16[2,5,5,128], index: 3, kind: input, shape index: {}]   ;;  %s1319_s4 = inlined_call_operand.vmem [shape: f32[9,1,128], index: 4, kind: input, shape index: {}]   ;;  %s1320_s5 = inlined_call_operand.vmem [shape: f32[1,128], index: 5, kind: input, shape index: {}]   ;;  %s1321_s6 = inlined_call_operand.vmem [shape: f32[1,128], index: 6, kind: input, shape index: {}]   ;;  %s1322_s7 = inlined_call_operand.vmem [shape: f32[2,4,4,128], index: 7, kind: input, shape index: {}, may-alias: {7,9}]   ;;  %s1323_s8 = inlined_call_operand.vmem [shape: bf16[2,4,4,128], index: 8, kind: input, shape index: {}, may-alias: {8,10}]   ;;  %s1324_s9 = inlined_call_operand.vmem [shape: f32[2,4,4,128], index: 9, kind: output, shape index: {0}, may-alias: {7,9}]   ;;  %s1325_s10 = inlined_call_operand.vmem [shape: bf16[2,4,4,128], index: 10, kind: output, shape index: {1}, may-alias: {8,10}]  }
   0x1 LB: > { %s951_s14 = sadd.s32 4294967295, %s1024_s13   ;;  %p955_p0 = scmp.ge.s32.totalorder %s1024_s13, 1  ;;  %s1024_s13 = sphi %s1082_s13, %s21_s13  }
   0x2   : > { %p365_p1 = scmp.lt.s32.totalorder %s1024_s13, 3 }
   0x4   : > { %p366_p2 = pnand %p955_p0, %p365_p1 }
   0x5   : > { %p433_p3 = scmp.lt.s32.totalorder (!%p366_p2), %s951_s14, 1  ;;  %v747_v0 = vlaneseq (!%p366_p2)  ;;  %v1096_v1 = vld [vmem:[%s1319_s4] ss:$0 sm:$0xff] (!%p366_p2)  ;;  %v1111_v3 = vld [vmem:[%s1319_s4 + $0x1] ss:$0 sm:$0xff] (!%p366_p2) }
   0x6   : > { %369 = sbr.rel (%p366_p2) target bundleno = 71 (0x47), region = 56  ;;  %v1116_v4 = vld [vmem:[%s1319_s4 + $0x2] ss:$0 sm:$0xff] (!%p366_p2)  ;;  %v733_v5 = vld [vmem:[%s1321_s6] sm:$0x1] (!%p366_p2) }
   0x7   : > { %v748_v2 = vshrl.u32 (!%p366_p2), %v747_v0, 7  ;;  %v1141_v14 = vld [vmem:[%s1319_s4 + $0x3] ss:$0 sm:$0xff] (!%p366_p2)  ;;  %v976_v23 = vld [vmem:[%s1319_s4 + $0x4] ss:$0 sm:$0xff] (!%p366_p2)  ;;  %v764_v27 = vsub.f32 (!%p366_p2), 1.0, %v733_v5 }
   0x8   : > { %v1154_v24 = vld [vmem:[%s1319_s4 + $0x5] ss:$0 sm:$0xff] (!%p366_p2)  ;;  %v1185_v47 = vld [vmem:[%s1319_s4 + $0x6] ss:$0 sm:$0xff] (!%p366_p2)  ;;  %v1190_v48 = vld [vmem:[%s1319_s4 + $0x8] ss:$0 sm:$0xff] (!%p366_p2) }
   0x9   : > { %v749_v18 = vsub.s32 (!%p366_p2), 0, %v748_v2  ;;  %v1202_v57 = vld [vmem:[%s1319_s4 + $0x7] ss:$0 sm:$0xff] (!%p366_p2) }
   0xb   : > { %v1176_v37 = vrot.slane (!%p366_p2), %v733_v5, %v749_v18  ;;  %v1193_v53 = vrot.slane (!%p366_p2), %v764_v27, %v749_v18 }
   0xd   : > { %s1327_s14 = smov (!%p433_p3, %s951_s14), 1 }
   0xe   : > { %s1008_s15 = smul.u32 20, %s1327_s14  ;;  %s1004_s19 = sshll.u32 %s1327_s14, 4 }
   0xf   : > { %s1005_s21 = sshll.u32 %s1327_s14, 3  ;;  %s1161_s30 = scalar_lea.vmem %s1322_s7, %s1004_s19 }
  0x10   : > { %s1101_s20 = scalar_lea.vmem %s1315_s0, %s1008_s15  ;;  %s1106_s23 = scalar_lea.vmem %s1316_s1, %s1008_s15  ;;  %v734_v42 = vld [vmem:[%s1161_s30] sm:$0xf]  ;;  %v735_v43 = vld [vmem:[%s1161_s30 + $0x4] sm:$0xf] }
  0x11   : > { %s1124_s12 = scalar_lea.vmem %s1317_s2, %s1008_s15  ;;  %s1129_s18 = scalar_lea.vmem %s1318_s3, %s1008_s15  ;;  %v473_v6 = vld [vmem:[%s1101_s20] sm:$0x3]  ;;  %v979_v25 = vld [vmem:[%s1101_s20 + $0x4] sm:$0x3]  ;;  %v752_v60 = vmul.f32 %v1176_v37, %v734_v42  ;;  %v1207_v61 = vmul.f32 %v1176_v37, %v735_v43 }
  0x12   : > { %v492_v7 = vld [vmem:[%s1106_s23] sm:$0x3]  ;;  %v478_v9 = vunpack.c.l.bf16 %v473_v6  ;;  %v577_v22 = vld [vmem:[%s1129_s18 + $0x4] sm:$0x3]  ;;  %s1168_s17 = scalar_lea.vmem %s1323_s8, %s1005_s21  ;;  %v578_v31 = vld [vmem:[%s1129_s18 + $0x8] sm:$0x3]  ;;  %v643_v40 = vunpack.c.l.bf16 %v979_v25  ;;  %s1262_s16 = scalar_lea.vmem %s1324_s9, %s1004_s19 }
  0x13   : > { %v516_v8 = vld [vmem:[%s1101_s20] sm:$0x7]  ;;  %v498_v10 = vunpack.c.l.bf16 %v492_v7  ;;  %v991_v26 = vld [vmem:[%s1101_s20 + $0x4] sm:$0x7]  ;;  %v579_v32 = vld [vmem:[%s1129_s18 + $0xc] sm:$0x3]  ;;  %v583_v34 = vunpack.c.l.bf16 %v577_v22  ;;  %v584_v45 = vunpack.c.l.bf16 %v578_v31  ;;  %s1290_s19 = scalar_lea.vmem %s1325_s10, %s1005_s21 }
  0x14   : > { %v522_v11 = vunpack.c.l.bf16 %v516_v8  ;;  %v552_v12 = vld [vmem:[%s1124_s12] sm:$0x3]  ;;  %v488_v19 = vmul.f32 %v1096_v1, %v478_v9  ;;  %v985_v36 = vld [vmem:[%s1106_s23 + $0x4] sm:$0x3]  ;;  %v692_v41 = vunpack.c.l.bf16 %v991_v26  ;;  %v585_v46 = vunpack.c.l.bf16 %v579_v32  ;;  %v739_v58 = vld [vmem:[%s1168_s17 + $0x2] sm:$0x3] }
  0x15   : > { %v576_v13 = vld [vmem:[%s1129_s18] sm:$0x3]  ;;  %v558_v15 = vunpack.c.l.bf16 %v552_v12  ;;  %v508_v20 = vmul.f32 %v1111_v3, %v498_v10  ;;  %v474_v49 = vld [vmem:[%s1101_s20 + $0x4] sm:$0x3]  ;;  %v668_v52 = vunpack.c.l.bf16 %v985_v36  ;;  %v1197_v56 = vmul.f32 %v976_v23, %v583_v34  ;;  %v986_v22 = vld [vmem:[%s1106_s23 + $0x8] sm:$0x3] }
  0x16   : > { %v582_v16 = vunpack.c.l.bf16 %v576_v13  ;;  %v600_v17 = vld [vmem:[%s1124_s12] sm:$0x7]  ;;  %v532_v21 = vmul.f32 %v1116_v4, %v522_v11  ;;  %v493_v54 = vld [vmem:[%s1106_s23 + $0x4] sm:$0x3]  ;;  %v653_v63 = vmul.f32 %v1185_v47, %v643_v40  ;;  %v702_v0 = vmul.f32 %v1190_v48, %v692_v41  ;;  %v992_v11 = vld [vmem:[%s1101_s20 + $0x8] sm:$0x7] }
  0x17   : > { %v512_v28 = vadd.f32 %v508_v20, %v488_v19  ;;  %v568_v30 = vmul.f32 %v1141_v14, %v558_v15  ;;  %v606_v33 = vunpack.c.l.bf16 %v600_v17  ;;  %v738_v44 = vld [vmem:[%s1168_s17] sm:$0x3]  ;;  %v517_v55 = vld [vmem:[%s1101_s20 + $0x4] sm:$0x7]  ;;  %v479_v2 = vunpack.c.l.bf16 %v474_v49  ;;  %v518_v34 = vld [vmem:[%s1101_s20 + $0x8] sm:$0x7] }
  0x18   : > { %v540_v29 = vrot.slane %v532_v21, 1  ;;  %v592_v35 = vmul.f32 %v976_v23, %v582_v16  ;;  %v742_v59 = vunpack.c.l.bf16 %v738_v44  ;;  %v553_v5 = vld [vmem:[%s1124_s12 + $0x4] sm:$0x3]  ;;  %v1213_v7 = vmul.f32 %v976_v23, %v584_v45  ;;  %v980_v21 = vld [vmem:[%s1101_s20 + $0x8] sm:$0x3] }
  0x19   : > { %v616_v39 = vmul.f32 %v1154_v24, %v606_v33  ;;  %v601_v6 = vld [vmem:[%s1124_s12 + $0x4] sm:$0x7]  ;;  %v1215_v8 = vmul.f32 %v976_v23, %v585_v46  ;;  %v499_v9 = vunpack.c.l.bf16 %v493_v54  ;;  %v523_v10 = vunpack.c.l.bf16 %v517_v55  ;;  %v602_v41 = vld [vmem:[%s1124_s12 + $0x8] sm:$0x7]  ;;  %v1234_v42 = vld [vmem:[%s1320_s5] ss:$0 sm:$0xff] }
  0x1a   : > { %v548_v38 = vadd.f32 %v540_v29, %v512_v28  ;;  %v678_v13 = vmul.f32 %v1202_v57, %v668_v52  ;;  %v743_v15 = vunpack.c.l.bf16 %v739_v58  ;;  %v489_v16 = vmul.f32 %v1096_v1, %v479_v2  ;;  %v475_v28 = vld [vmem:[%s1101_s20 + $0x8] sm:$0x3] }
  0x1b   : > { %v624_v51 = vrot.slane %v616_v39, 1  ;;  %v509_v17 = vmul.f32 %v1111_v3, %v499_v9  ;;  %v533_v18 = vmul.f32 %v1116_v4, %v523_v10  ;;  %v559_v19 = vunpack.c.l.bf16 %v553_v5  ;;  %v494_v29 = vld [vmem:[%s1106_s23 + $0x8] sm:$0x3]  ;;  %v981_v5 = vld [vmem:[%s1101_s20 + $0xc] sm:$0x3] }
  0x1c   : > { %v572_v50 = vadd.f32 %v568_v30, %v548_v38  ;;  %v607_v20 = vunpack.c.l.bf16 %v601_v6  ;;  %v710_v25 = vrot.slane %v702_v0, 1  ;;  %v756_v26 = vsub.f32 1.0, %v742_v59  ;;  %v987_v6 = vld [vmem:[%s1106_s23 + $0xc] sm:$0x3] }
  0x1d   : > { %v693_v27 = vunpack.c.l.bf16 %v992_v11  ;;  %v513_v30 = vadd.f32 %v509_v17, %v489_v16  ;;  %v541_v31 = vrot.slane %v533_v18, 1  ;;  %v569_v32 = vmul.f32 %v1141_v14, %v559_v19  ;;  %v476_v9 = vld [vmem:[%s1101_s20 + $0xc] sm:$0x3] }
  0x1e   : > { %v596_v62 = vadd.f32 %v592_v35, %v572_v50  ;;  %v617_v33 = vmul.f32 %v1154_v24, %v607_v20  ;;  %v554_v35 = vld [vmem:[%s1124_s12 + $0x8] sm:$0x3]  ;;  %v757_v38 = vsub.f32 1.0, %v743_v15  ;;  %v644_v39 = vunpack.c.l.bf16 %v980_v21  ;;  %v495_v15 = vld [vmem:[%s1106_s23 + $0xc] sm:$0x3] }
  0x1f   : > { %v669_v40 = vunpack.c.l.bf16 %v986_v22  ;;  %v549_v43 = vadd.f32 %v541_v31, %v513_v30  ;;  %v1237_v44 = vmul.f32 %v1190_v48, %v693_v27  ;;  %v480_v45 = vunpack.c.l.bf16 %v475_v28  ;;  %v519_v20 = vld [vmem:[%s1101_s20 + $0xc] sm:$0x7]  ;;  %v740_v27 = vld [vmem:[%s1168_s17 + $0x4] sm:$0x3] }
  0x20   : > { %v632_v12 = vadd.f32 %v624_v51, %v596_v62  ;;  %v500_v46 = vunpack.c.l.bf16 %v494_v29  ;;  %v625_v50 = vrot.slane %v617_v33, 1  ;;  %v524_v51 = vunpack.c.l.bf16 %v518_v34  ;;  %v1268_v33 = vld [vmem:[%s1161_s30 + $0xc] sm:$0xf] }
  0x21   : > { %v560_v52 = vunpack.c.l.bf16 %v554_v35  ;;  %v573_v54 = vadd.f32 %v569_v32, %v549_v43  ;;  %v490_v55 = vmul.f32 %v1096_v1, %v480_v45  ;;  %v608_v59 = vunpack.c.l.bf16 %v602_v41  ;;  %v736_v32 = vld [vmem:[%s1161_s30 + $0x8] sm:$0xf] }
  0x22   : > { %v657_v23 = vadd.f32 %v653_v63, %v632_v12  ;;  %v510_v58 = vmul.f32 %v1111_v3, %v500_v46  ;;  %v760_v63 = vmul.f32 %v756_v26, %v752_v60  ;;  %v654_v0 = vmul.f32 %v1185_v47, %v644_v39  ;;  %v993_v60 = vld [vmem:[%s1101_s20 + $0xc] sm:$0x7] }
  0x23   : > { %v534_v2 = vmul.f32 %v1116_v4, %v524_v51  ;;  %v597_v10 = vadd.f32 %v1197_v56, %v573_v54  ;;  %v679_v11 = vmul.f32 %v1202_v57, %v669_v40  ;;  %v711_v12 = vrot.slane %v1237_v44, 1  ;;  %v555_v56 = vld [vmem:[%s1124_s12 + $0xc] sm:$0x3]  ;;  %v982_v51 = vld [vmem:[%s1101_s20 + $0x10] sm:$0x3] }
  0x24   : > { %v682_v36 = vadd.f32 %v678_v13, %v657_v23  ;;  %v514_v13 = vadd.f32 %v510_v58, %v490_v55  ;;  %v570_v18 = vmul.f32 %v1141_v14, %v560_v52  ;;  %v618_v19 = vmul.f32 %v1154_v24, %v608_v59  ;;  %v603_v26 = vld [vmem:[%s1124_s12 + $0xc] sm:$0x7]  ;;  %v994_v58 = vld [vmem:[%s1101_s20 + $0x10] sm:$0x7] }
  0x25   : > { %v542_v17 = vrot.slane %v534_v2, 1  ;;  %v633_v21 = vadd.f32 %v625_v50, %v597_v10  ;;  %v645_v22 = vunpack.c.l.bf16 %v981_v5  ;;  %v670_v23 = vunpack.c.l.bf16 %v987_v6 }
  0x26   : > { %v718_v49 = vadd.f32 %v710_v25, %v682_v36  ;;  %v481_v25 = vunpack.c.l.bf16 %v476_v9  ;;  %v694_v30 = vunpack.c.l.bf16 %v993_v60  ;;  %v501_v31 = vunpack.c.l.bf16 %v495_v15 }
  0x27   : > { %v550_v29 = vadd.f32 %v542_v17, %v514_v13  ;;  %v658_v34 = vadd.f32 %v654_v0, %v633_v21  ;;  %v525_v36 = vunpack.c.l.bf16 %v519_v20  ;;  %v561_v39 = vunpack.c.l.bf16 %v555_v56  ;;  %v988_v0 = vld [vmem:[%s1106_s23 + $0x10] sm:$0x3] }
  0x28   : > { %v729_v62 = vadd.f32 %v1234_v42, %v718_v49  ;;  %v491_v35 = vmul.f32 %v1096_v1, %v481_v25  ;;  %v626_v41 = vrot.slane %v618_v19, 1  ;;  %v511_v43 = vmul.f32 %v1111_v3, %v501_v31 }
  0x29   : > { %v574_v40 = vadd.f32 %v570_v18, %v550_v29  ;;  %v609_v44 = vunpack.c.l.bf16 %v603_v26  ;;  %v744_v45 = vunpack.c.l.bf16 %v740_v27  ;;  %v761_v46 = vmul.f32 %v757_v38, %v1207_v61 }
  0x2a   : > { %v771_v16 = vmul.f32 %v1193_v53, %v729_v62  ;;  %v683_v49 = vadd.f32 %v679_v11, %v658_v34  ;;  %v535_v50 = vmul.f32 %v1116_v4, %v525_v36  ;;  %v655_v1 = vmul.f32 %v1185_v47, %v645_v22  ;;  %v741_v11 = vld [vmem:[%s1168_s17 + $0x6] sm:$0x3] }
  0x2b   : > { %v598_v52 = vadd.f32 %v1213_v7, %v574_v40  ;;  %v704_v54 = vmul.f32 %v1190_v48, %v694_v30  ;;  %v515_v55 = vadd.f32 %v511_v43, %v491_v35  ;;  %v571_v62 = vmul.f32 %v1141_v14, %v561_v39 }
  0x2c   : > { %v775_v28 = vadd.f32 %v771_v16, %v760_v63  ;;  %v719_v59 = vadd.f32 %v711_v12, %v683_v49  ;;  %v543_v3 = vrot.slane %v535_v50, 1  ;;  %v619_v61 = vmul.f32 %v1154_v24, %v609_v44 }
  0x2d   : > { %v634_v38 = vadd.f32 %v626_v41, %v598_v52  ;;  %v680_v4 = vmul.f32 %v1202_v57, %v670_v23  ;;  %v646_v63 = vunpack.c.l.bf16 %v982_v51  ;;  %v695_v5 = vunpack.c.l.bf16 %v994_v58 }
  0x2e   : > { %783 = vst [vmem:[%s1262_s16] sm:$0xf] %v775_v28  ;;  %vm779_vm0 = vcmp.gt.f32.partialorder %v775_v28, 0.1  ;;  %v730_v7 = vadd.f32 %v1234_v42, %v719_v59  ;;  %v551_v2 = vadd.f32 %v543_v3, %v515_v55  ;;  %v1026_v14 = vmov 0.0  }
  0x2f   : > { %v998_v6 = vsel %vm779_vm0, 1.0, %v1026_v14  ;;  %v659_v24 = vadd.f32 %v655_v1, %v634_v38  ;;  %v712_v9 = vrot.slane %v704_v54, 1  ;;  %v627_v60 = vrot.slane %v619_v61, 1 }
  0x30   : > { %v795_v10 = vpack.c.bf16 %v998_v6, %v998_v6  ;;  %v772_v12 = vmul.f32 %v1193_v53, %v730_v7  ;;  %v575_v13 = vadd.f32 %v571_v62, %v551_v2  ;;  %v671_v15 = vunpack.c.l.bf16 %v988_v0 }
  0x31   : > { %v754_v16 = vmul.f32 %v1176_v37, %v736_v32  ;;  %v758_v17 = vsub.f32 1.0, %v744_v45  ;;  %v684_v18 = vadd.f32 %v680_v4, %v659_v24  ;;  %v656_v56 = vmul.f32 %v1185_v47, %v646_v63 }
  0x32   : > { %799 = vst [vmem:[%s1290_s19] sm:$0x3] %v795_v10  ;;  %v776_v19 = vadd.f32 %v772_v12, %v761_v46  ;;  %v599_v20 = vadd.f32 %v1215_v8, %v575_v13  ;;  %v705_v21 = vmul.f32 %v1190_v48, %v695_v5  ;;  %v745_v23 = vunpack.c.l.bf16 %v741_v11 }
  0x33   : > { %v720_v22 = vadd.f32 %v712_v9, %v684_v18  ;;  %v681_v26 = vmul.f32 %v1202_v57, %v671_v15  ;;  %v762_v27 = vmul.f32 %v758_v17, %v754_v16  ;;  %v755_v48 = vmul.f32 %v1176_v37, %v1268_v33 }
  0x34   : > { %784 = vst [vmem:[%s1262_s16 + $0x4] sm:$0xf] %v776_v19  ;;  %v635_v25 = vadd.f32 %v627_v60, %v599_v20  ;;  %vm780_vm1 = vcmp.gt.f32.partialorder %v776_v19, 0.1  ;;  %v713_v31 = vrot.slane %v705_v21, 1  ;;  %v759_v32 = vsub.f32 1.0, %v745_v23 }
  0x35   : > { %v731_v28 = vadd.f32 %v1234_v42, %v720_v22  ;;  %v999_v29 = vsel %vm780_vm1, 1.0, %v1026_v14 }
  0x36   : > { %v660_v30 = vadd.f32 %v656_v56, %v635_v25  ;;  %v796_v8 = vpack.c.bf16 %v999_v29, %v999_v29  ;;  %v763_v36 = vmul.f32 %v759_v32, %v755_v48 }
  0x37   : > { %v773_v47 = vmul.f32 %v1193_v53, %v731_v28 }
  0x38   : > { %v685_v34 = vadd.f32 %v681_v26, %v660_v30  ;;  %800 = vst [vmem:[%s1290_s19 + $0x2] sm:$0x3] %v796_v8 }
  0x39   : > { %v777_v57 = vadd.f32 %v773_v47, %v762_v27 }
  0x3a   : > { %v721_v35 = vadd.f32 %v713_v31, %v685_v34 }
  0x3b   : > { %785 = vst [vmem:[%s1262_s16 + $0x8] sm:$0xf] %v777_v57  ;;  %vm781_vm2 = vcmp.gt.f32.partialorder %v777_v57, 0.1 }
  0x3c   : > { %v732_v39 = vadd.f32 %v1234_v42, %v721_v35  ;;  %v1000_v40 = vsel %vm781_vm2, 1.0, %v1026_v14 }
  0x3d   : > { %v797_v41 = vpack.c.bf16 %v1000_v40, %v1000_v40 }
  0x3e   : > { %v774_v43 = vmul.f32 %v1193_v53, %v732_v39 }
  0x3f   : > { %801 = vst [vmem:[%s1290_s19 + $0x4] sm:$0x3] %v797_v41 }
  0x40   : > { %v778_v44 = vadd.f32 %v774_v43, %v763_v36 }
  0x42   : > { %786 = vst [vmem:[%s1262_s16 + $0xc] sm:$0xf] %v778_v44  ;;  %vm782_vm3 = vcmp.gt.f32.partialorder %v778_v44, 0.1 }
  0x43   : > { %v1001_v37 = vsel %vm782_vm3, 1.0, %v1026_v14 }
  0x44   : > { %v798_v33 = vpack.c.bf16 %v1001_v37, %v1001_v37 }
  0x46   : > { %802 = vst [vmem:[%s1290_s19 + $0x6] sm:$0x3] %v798_v33 }
  0x47 PF: > { %s21_s13 = sadd.s32 1, %s1024_s13  }
  0x48   : > { %p18_p4 = scmp.ge.s32.totalorder %s21_s13, 4  }
  0x4a   :  { %20 = sbr.rel (!%p18_p4) target bundleno = 1 (0x1), region = 123 }

// kernel: snn_forward.11
= control target key start
LH: loop header
LB: loop body
LE: loop exit
PB: predicated region body
PF: predicated region fallthrough
CT: control target
= control target key end

     0   :  { %v803_v1 = vmov 0.0   ;;  %vm804_vm0 = vmmov 0   ;;  %vm126_vm1 = vcmask 261120   ;;  %v182_v28 = vlaneseq  ;;  %s1054_s0 = inlined_call_operand.vmem [shape: bf16[2,512], index: 0, kind: input, shape index: {}]   ;;  %s1055_s1 = inlined_call_operand.vmem [shape: bf16[512,32], index: 1, kind: input, shape index: {}]   ;;  %s1056_s2 = inlined_call_operand.vmem [shape: bf16[32,32], index: 2, kind: input, shape index: {}]   ;;  %s1057_s3 = inlined_call_operand.vmem [shape: f32[1,32], index: 3, kind: input, shape index: {}]   ;;  %s1058_s4 = inlined_call_operand.vmem [shape: f32[1,32], index: 4, kind: input, shape index: {}]   ;;  %s1059_s5 = inlined_call_operand.vmem [shape: f32[2,32], index: 5, kind: input, shape index: {}, may-alias: {5,11}]   ;;  %s1060_s6 = inlined_call_operand.vmem [shape: bf16[2,32], index: 6, kind: input, shape index: {}, may-alias: {6,12}]   ;;  %s1061_s7 = inlined_call_operand.vmem [shape: bf16[32,10], index: 7, kind: input, shape index: {}]   ;;  %s1062_s8 = inlined_call_operand.vmem [shape: f32[1,10], index: 8, kind: input, shape index: {}]   ;;  %s1063_s9 = inlined_call_operand.vmem [shape: f32[1,10], index: 9, kind: input, shape index: {}]   ;;  %s1064_s10 = inlined_call_operand.vmem [shape: f32[2,10], index: 10, kind: input, shape index: {}, may-alias: {10,13}]   ;;  %s1065_s11 = inlined_call_operand.vmem [shape: f32[2,32], index: 11, kind: output, shape index: {0}, may-alias: {5,11}]   ;;  %s1066_s12 = inlined_call_operand.vmem [shape: bf16[2,32], index: 12, kind: output, shape index: {1}, may-alias: {6,12}]   ;;  %s1067_s13 = inlined_call_operand.vmem [shape: f32[2,10], index: 13, kind: output, shape index: {2}, may-alias: {10,13}]   ;;  %s1068_s14 = inlined_call_operand.hbm [shape: f32[2,10], index: 14, kind: output, shape index: {3}]  }
   0x1   :  { %v739_v0 = vld [vmem:[%s1056_s2] sm:$0xff]   ;;  %719 = vmatprep.subr.bf16.mxu0 %v803_v1  ;;  %723 = vmatprep.mubr.msk.bf16.mxu0 %vm804_vm0, %v803_v1  ;;  %v742_v4 = vld [vmem:[%s1056_s2 + $0x8] sm:$0xff]   ;;  %v746_v9 = vld [vmem:[%s1055_s1 + $0x50] sm:$0xff]   ;;  %v805_v36 = vmov 1966171168  }
   0x2   :  { %v740_v2 = vld [vmem:[%s1055_s1 + $0x40] sm:$0xff]   ;;  %720 = vmatpush3.bf16.msra.mxu0 %v739_v0  ;;  %v743_v5 = vld [vmem:[%s1055_s1 + $0x48] sm:$0xff]   ;;  %v748_v11 = vld [vmem:[%s1055_s1 + $0x10] sm:$0xff]   ;;  %v183_v33 = vshrl.u32 %v182_v28, 7  ;;  %v180_v37 = vunpack.c.l.s4 %v805_v36 }
   0x3   :  { %v741_v3 = vld [vmem:[%s1055_s1] sm:$0xff]   ;;  %672 = vmatprep.subr.bf16.mxu1 %v740_v2  ;;  %721 = vmatprep.subr.bf16.mxu0 %v803_v1  ;;  %v744_v6 = vld [vmem:[%s1055_s1 + $0x8] sm:$0xff]   ;;  %v750_v13 = vld [vmem:[%s1055_s1 + $0x58] sm:$0xff]  }
   0x4   :  { %673 = vmatpush3.bf16.msra.mxu1 %v741_v3  ;;  %v907_v7 = vld [vmem:[%s1060_s6] sm:$0x1]  ;;  %v749_v12 = vld [vmem:[%s1055_s1 + $0xc8] sm:$0xff]   ;;  %v752_v15 = vld [vmem:[%s1055_s1 + $0x18] sm:$0xff]   ;;  %v181_v40 = vunpack.c.0.s8 %v180_v37 }
   0x5   :  { %674 = vmatprep.subr.bf16.mxu1 %v743_v5  ;;  %v745_v8 = vld [vmem:[%s1055_s1 + $0xc0] sm:$0xff]   ;;  %v751_v14 = vld [vmem:[%s1055_s1 + $0x88] sm:$0xff]   ;;  %v753_v16 = vld [vmem:[%s1055_s1 + $0xd0] sm:$0xff]  }
   0x6   :  { %722 = vmatpush3.bf16.msra.mxu0 %v742_v4  ;;  %v747_v10 = vld [vmem:[%s1055_s1 + $0x80] sm:$0xff]   ;;  %v755_v18 = vld [vmem:[%s1055_s1 + $0x90] sm:$0xff]   ;;  %v757_v20 = vld [vmem:[%s1055_s1 + $0xd8] sm:$0xff]   ;;  %v184_v43 = vsub.s32 %v181_v40, %v183_v33 }
   0x7   :  { %694 = vmatprep.subr.bf16.mxu0 %v745_v8  ;;  %v754_v17 = vld [vmem:[%s1055_s1 + $0x60] sm:$0xff]   ;;  %v758_v21 = vld [vmem:[%s1055_s1 + $0x68] sm:$0xff]   ;;  %v759_v22 = vld [vmem:[%s1055_s1 + $0x98] sm:$0xff]  }
   0x8   :  { %675 = vmatpush3.bf16.msra.mxu1 %v744_v6  ;;  %v756_v19 = vld [vmem:[%s1055_s1 + $0x20] sm:$0xff]   ;;  %v760_v23 = vld [vmem:[%s1055_s1 + $0x28] sm:$0xff]   ;;  %v762_v25 = vld [vmem:[%s1055_s1 + $0x70] sm:$0xff]  }
   0x9   :  { %724 = vmatmul.mubr.msk.bf16.vlgmr.msra.gmra.mrb[0].mxu0 %vm126_vm1, %v907_v7  ;;  %676 = vmatprep.subr.bf16.mxu1 %v746_v9  ;;  %v761_v24 = vld [vmem:[%s1055_s1 + $0xe0] sm:$0xff]   ;;  %v764_v27 = vld [vmem:[%s1055_s1 + $0x30] sm:$0xff]   ;;  %v765_v29 = vld [vmem:[%s1055_s1 + $0xe8] sm:$0xff]  }
   0xa   :  { %695 = vmatpush3.bf16.msra.mxu0 %v747_v10  ;;  %v763_v26 = vld [vmem:[%s1055_s1 + $0xa0] sm:$0xff]   ;;  %v766_v30 = vld [vmem:[%s1055_s1 + $0x78] sm:$0xff]   ;;  %v767_v31 = vld [vmem:[%s1055_s1 + $0xa8] sm:$0xff]  }
   0xb   :  { %696 = vmatprep.subr.bf16.mxu0 %v749_v12  ;;  %v768_v32 = vld [vmem:[%s1055_s1 + $0x38] sm:$0xff]   ;;  %v769_v34 = vld [vmem:[%s1055_s1 + $0xf0] sm:$0xff]   ;;  %v629_v35 = vld.sshfl [vmem:[%s1054_s0] sm:$0x33 pattern:$0x75316420] }
   0xc   :  { %677 = vmatpush3.bf16.msra.mxu1 %v748_v11  ;;  %v770_v38 = vld [vmem:[%s1055_s1 + $0xb0] sm:$0xff]   ;;  %v178_v39 = vcombine.high %v629_v35, %v629_v35  ;;  %v771_v41 = vld [vmem:[%s1055_s1 + $0xf8] sm:$0xff]  }
   0xd   :  { %678 = vmatprep.subr.bf16.mxu1 %v750_v13  ;;  %v772_v42 = vld [vmem:[%s1055_s1 + $0xb8] sm:$0xff]  }
   0xe   :  { %697 = vmatpush3.bf16.msra.mxu0 %v751_v14 }
   0xf   :  { %698 = vmatprep.subr.bf16.mxu0 %v753_v16 }
  0x10   :  { %679 = vmatpush3.bf16.msra.mxu1 %v752_v15 }
  0x11   :  { %680 = vmatprep.subr.bf16.mxu1 %v754_v17 }
  0x12   :  { %699 = vmatpush3.bf16.msra.mxu0 %v755_v18 }
  0x13   :  { %700 = vmatprep.subr.bf16.mxu0 %v757_v20 }
  0x14   :  { %681 = vmatpush3.bf16.msra.mxu1 %v756_v19 }
  0x15   :  { %682 = vmatprep.subr.bf16.mxu1 %v758_v21 }
  0x16   :  { %701 = vmatpush3.bf16.msra.mxu0 %v759_v22 }
  0x17   :  { %702 = vmatprep.subr.bf16.mxu0 %v761_v24 }
  0x18   :  { %683 = vmatpush3.bf16.msra.mxu1 %v760_v23 }
  0x19   :  { %684 = vmatprep.subr.bf16.mxu1 %v762_v25 }
  0x1a   :  { %703 = vmatpush3.bf16.msra.mxu0 %v763_v26 }
  0x1b   :  { %704 = vmatprep.subr.bf16.mxu0 %v765_v29 }
  0x1c   :  { %685 = vmatpush3.bf16.msra.mxu1 %v764_v27 }
  0x1d   :  { %686 = vmatprep.subr.bf16.mxu1 %v766_v30 }
  0x1e   :  { %705 = vmatpush3.bf16.msra.mxu0 %v767_v31 }
  0x1f   :  { %706 = vmatprep.subr.bf16.mxu0 %v769_v34 }
  0x20   :  { %687 = vmatpush3.bf16.msra.mxu1 %v768_v32 }
  0x21   :  { %727 = vmatprep.subr.bf16.mxu1 %v803_v1 }
  0x22   :  { %707 = vmatpush3.bf16.msra.mxu0 %v770_v38 }
  0x23   :  { %708 = vmatprep.subr.bf16.mxu0 %v771_v41 }
  0x24   :  { %20 = vsyncpa [#allocation3], 0  ;;  %v192_v44 = vrot.slane %v178_v39, %v184_v43  ;;  %v185_v45 = vrot.slane %v629_v35, %v184_v43  ;;  %v773_v48 = vld [vmem:[%s1061_s7] sm:$0xff]   ;;  %v774_v49 = vld [vmem:[%s1061_s7 + $0x8] sm:$0xff]   ;;  %v485_v54 = vsub.s32 0, %v183_v33  ;;  %v481_v56 = vunpack.c.l.bf16 %v907_v7 }
  0x25   :  { %v479_v55 = vld [vmem:[%s1058_s4] sm:$0x1]  ;;  %vm504_vm2 = vcmask 254976   ;;  %vm506_vm4 = vcmask 253952   ;;  %vm585_vm5 = vcmask 74752  }
  0x26   :  { %709 = vmatpush3.bf16.msra.mxu0 %v772_v42  ;;  %v194_v46 = vcombine.high %v192_v44, %v192_v44  ;;  %423 = vmatprep.mubr.bf16.mxu1 %v192_v44  ;;  %v193_v47 = vcombine.high %v185_v45, %v185_v45  ;;  %v486_v57 = vrot.slane %v479_v55, %v485_v54  ;;  %v480_v59 = vld [vmem:[%s1059_s5] sm:$0x3]  ;;  %v491_v0 = vsub.f32 1.0, %v479_v55 }
  0x27   :  { %424 = vmatmul.mubr.bf16.vlgmr.msra.gmra.mrb[0].mxu1 %v185_v45  ;;  %v489_v4 = vsub.f32 1.0, %v481_v56  ;;  %v662_v7 = vld [vmem:[%s1057_s3] ss:$0 sm:$0xff] }
  0x28   :  { %463 = vmatprep.mubr.bf16.mxu0 %v194_v46  ;;  %731 = vmatprep.mubr.msk.bf16.mxu1 %vm804_vm0, %v803_v1  ;;  %v488_v5 = vmul.f32 %v486_v57, %v480_v59  ;;  %v496_v12 = vrot.slane %v491_v0, %v485_v54  ;;  %v664_v19 = vld [vmem:[%s1062_s8] ss:$0 sm:$0xff] }
  0x29   :  { %464 = vmatmul.mubr.bf16.vlgmr.msra.gmra.mrb[4].mxu0 %v193_v47  ;;  %728 = vmatpush3.bf16.msra.mxu1 %v773_v48  ;;  %v574_v21 = vld [vmem:[%s1064_s10] sm:$0x3] }
  0x2a   :  { %729 = vmatprep.subr.bf16.mxu1 %v803_v1  ;;  %v490_v13 = vmul.f32 %v489_v4, %v488_v5 }
  0x2d   :  { %730 = vmatpush3.bf16.msra.mxu1 %v774_v49 }
  0xdc   :  { %v164_v50 = vpop.f32.mrb[0].mxu0 }
  0xdd   :  { %v725_v51 = vpop.f32.mrb[1].mxu0 }
  0xde   :  { %v167_v52 = vpop.f32.mrb[2].mxu0 }
  0xdf   :  { %v726_v53 = vpop.f32.mrb[3].mxu0 }
  0xfa   :  { %v688_v58 = vpop.f32.mrb[0].mxu1 }
  0xfb   :  { %v689_v60 = vpop.f32.mrb[1].mxu1 }
  0xfc   :  { %v690_v61 = vadd.f32 %v689_v60, %v688_v58  ;;  %v691_v62 = vpop.f32.mrb[2].mxu1  ;;  %v710_v63 = vpop.f32.mrb[4].mxu0 }
  0xfd   :  { %v692_v2 = vpop.f32.mrb[3].mxu1  ;;  %v711_v3 = vpop.f32.mrb[5].mxu0 }
  0xfe   :  { %v426_v6 = vadd.f32 %v690_v61, %v164_v50  ;;  %v712_v8 = vadd.f32 %v711_v3, %v710_v63  ;;  %v713_v9 = vpop.f32.mrb[6].mxu0 }
  0xff   :  { %v714_v10 = vpop.f32.mrb[7].mxu0 }
 0x100   :  { %v466_v11 = vadd.f32 %v712_v8, %v426_v6 }
 0x102   :  { %v478_v14 = vadd.f32 %v662_v7, %v466_v11 }
 0x104   :  { %v498_v15 = vmul.f32 %v496_v12, %v478_v14 }
 0x106   :  { %v499_v16 = vadd.f32 %v498_v15, %v490_v13 }
 0x108   :  { %vm500_vm3 = vcmp.gt.f32.partialorder %v499_v16, 0.1  ;;  %505 = vst.msk [vmem:[%s1065_s11] sm:$0x3] %vm504_vm2, %v499_v16 }
 0x109   :  { %v663_v17 = vsel %vm500_vm3, 1.0, %v803_v1  ;;  %v668_v1 = vld [vmem:[%s1063_s9] ss:$0 sm:$0xff]  ;;  %s806_s9 = smov [#allocation2]  }
 0x10a   :  { %v503_v18 = vpack.c.bf16 %v663_v17, %v663_v17  ;;  %s612_s10 = sshll.u32 %s806_s9, 4  ;;  %s613_s10 = int_to_ptr.vmem [resolvable:$true] %s612_s10 }
 0x10b   :  { %p784_p1 = scmp.lt.s32.totalorder %s613_s10, %s613_s10 }
 0x10c   :  { %507 = vst.msk [vmem:[%s1066_s12] sm:$0x1] %vm506_vm4, %v503_v18  ;;  %732 = vmatmul.mubr.msk.bf16.vlgmr.msra.gmra.mrb[4].mxu1 %vm126_vm1, %v503_v18 }
 0x1df   :  { %v568_v20 = vpop.f32.mrb[4].mxu1 }
 0x1e0   :  { %v569_v22 = vadd.f32 %v664_v19, %v568_v20  ;;  %v733_v23 = vpop.f32.mrb[5].mxu1 }
 0x1e1   :  { %v571_v24 = vpop.f32.mrb[6].mxu1 }
 0x1e2   :  { %v575_v25 = vsub.f32 %v569_v22, %v574_v21  ;;  %v734_v26 = vpop.f32.mrb[7].mxu1 }
 0x1e4   :  { %v583_v27 = vmul.f32 %v668_v1, %v575_v25 }
 0x1e6   :  { %v584_v28 = vadd.f32 %v583_v27, %v574_v21 }
 0x1e8   :  { %v587_v29 = vsel %vm585_vm5, %v584_v28, -inf  ;;  %586 = vst.msk [vmem:[%s1067_s13] sm:$0x3] %vm585_vm5, %v584_v28  ;;  %s779_s13 = scalar_lea.vmem %s613_s10, 32 }
 0x1e9   :  { %588 = vmax.xlane.f32.xlu0 %v587_v29  ;;  %p780_p0 = scmp.ne.s32.totalorder %s613_s10, %s779_s13  ;;  %p785_p2 = scmp.lt.s32.totalorder %s779_s13, %s779_s13 }
 0x1eb   :  { %p786_p3 = por %p785_p2, %p784_p1 }
 0x1ed   :  { %p787_p4 = pnand %p786_p3, %p780_p0 }
 0x276   :  { %v589_v30 = vpop.xlane.xlu0 %588 }
 0x277   :  { %v590_v31 = vsub.f32 %v584_v28, %v589_v30 }
 0x279   :  { %v591_v32 = vmul.f32 1.442695, %v590_v31 }
 0x27b   :  { %775 = vpow2.f32 %v591_v32 }
 0x285   :  { %v776_v33 = vpop.eup %775 }
 0x286   :  { %v593_v34 = vsel %vm585_vm5, %v776_v33, 0.0 }
 0x287   :  { %594 = vadd.xlane.f32.xlu0 %v593_v34 }
 0x314   :  { %v595_v35 = vpop.xlane.xlu0 %594 }
 0x315   :  { %777 = vlog2.f32 %v595_v35 }
 0x31f   :  { %v778_v36 = vpop.eup %777 }
 0x320   :  { %v597_v37 = vmul.f32 0.6931472, %v778_v36 }
 0x322   :  { %v598_v38 = vsub.f32 %v590_v31, %v597_v37 }
 0x324   :  { %599 = vst.msk [vmem:[#allocation2] sm:$0x3] %vm585_vm5, %v598_v38 }
 0x325   :  { %790 = shalt.err (!%p787_p4)
}
 0x326   :  { %s791_s28 = scalar_lea.hbm %s1068_s14, 32 }
 0x327   :  { %p792_p5 = scmp.ne.s32.totalorder %s1068_s14, %s791_s28  ;;  %p795_p6 = scmp.lt.u32.totalorder %s791_s28, %s1068_s14 }
 0x329   :  { %p797_p7 = pnand %p795_p6, %p792_p5 }
 0x32b   :  { %800 = shalt.err (!%p797_p7)
}
 0x32c   :  { %615 = dma.vmem_to_hbm [thread:$0]  %s613_s10, 32, %s1068_s14, [#allocation3]  }
 0x32d   :  { %801 = dma.done.wait [#allocation3], 32  }
 0x32e   :  { %802 = vsyncadd [#allocation3], 4294967264 }
 0x32f   :  { %625 = vsyncpa [#allocation3], 1 }

</bundles_post_ra>
